<compile_context>
chip_gen: v6e
topology: v6e:2x2x1
jax: 0.10.0
libtpu: 0.0.40
codegen_flags: <defaults>
</compile_context>

<pallas_src>
import functools
import math

import jax
import jax.numpy as jnp
from jax import lax
from jax.experimental import pallas as pl
from jax.experimental.pallas import tpu as pltpu


# --------------------------------------------------------------------------
# helpers
# --------------------------------------------------------------------------
def _pick_tile(dim, prefs):
    """Largest preferred tile that divides `dim`; otherwise the full dim."""
    for t in prefs:
        if t <= dim and dim % t == 0:
            return t
    return dim


@functools.lru_cache(maxsize=None)
def _vmem_limit():
    """~3/4 of physical VMEM: ~48 MiB on v7x (64 MiB/TC), ~96 MiB on v5e/v6e."""
    try:
        cap = pltpu.get_tpu_info().vmem_capacity_bytes
    except Exception:
        return 48 * 1024 * 1024           # conservative, known-good fallback
    return int(min(cap * 3 // 4, 112 * 1024 * 1024))


# --------------------------------------------------------------------------
# Tiled matmul kernel:  y[M,N] = x[M,K] @ wt[K,N]   (bf16 operands, f32 acc)
# --------------------------------------------------------------------------
def _matmul_kernel(x_ref, wt_ref, o_ref, acc_ref):
    @pl.when(pl.program_id(2) == 0)
    def _init():
        acc_ref[...] = jnp.zeros_like(acc_ref)

    acc_ref[...] += jnp.dot(x_ref[...], wt_ref[...],
                            preferred_element_type=jnp.float32)

    @pl.when(pl.program_id(2) == pl.num_programs(2) - 1)
    def _store():
        o_ref[...] = acc_ref[...].astype(o_ref.dtype)


def matmul(x, wt, *, out_dtype=jnp.float32):
    """x: (M, K), wt: (K, N)  ->  (M, N) in out_dtype, f32 accumulation."""
    M, K = x.shape
    K2, N = wt.shape
    assert K == K2
    tm = _pick_tile(M, (512, 256, 128, 64, 32, 16, 8))
    tn = _pick_tile(N, (512, 256, 128))
    tk = _pick_tile(K, (1024, 512, 256, 128))
    grid = (M // tm, N // tn, K // tk)
    return pl.pallas_call(
        _matmul_kernel,
        out_shape=jax.ShapeDtypeStruct((M, N), out_dtype),
        grid=grid,
        in_specs=[pl.BlockSpec((tm, tk), lambda i, j, k: (i, k)),
                  pl.BlockSpec((tk, tn), lambda i, j, k: (k, j))],
        out_specs=pl.BlockSpec((tm, tn), lambda i, j, k: (i, j)),
        scratch_shapes=[pltpu.VMEM((tm, tn), jnp.float32)],
        compiler_params=pltpu.CompilerParams(
            dimension_semantics=("parallel", "parallel", "arbitrary"),
            vmem_limit_bytes=_vmem_limit()),
    )(x, wt)


# --------------------------------------------------------------------------
# One-shot RoPE pass over the Q|K columns of the fused qkv slab (bf16 in/out).
# Q additionally gets the 1/sqrt(D) attention scale folded in.
# --------------------------------------------------------------------------
def _rope_kernel(x_ref, cos_ref, sin_ref, o_ref, *, scale, num_q_heads):
    h = pl.program_id(2)
    x = x_ref[0].astype(jnp.float32)                      # (ts, D)
    half = x.shape[-1] // 2
    rot = pltpu.roll(x, half, axis=1)                     # XLU, sign folded into sin
    r = x * cos_ref[...] + rot * sin_ref[...]
    fac = jnp.where(h < num_q_heads, jnp.float32(scale), jnp.float32(1.0))
    o_ref[0] = (r * fac).astype(o_ref.dtype)


def rope_qk(qkv, cos, sin, *, num_heads, num_kv_heads, head_dim, block_s=None):
    """qkv: (B, S, (Hq+2*Hkv)*D) bf16.  Returns RoPE'd [Q(prescaled) | K] columns
       as (B, S, (Hq+Hkv)*D) bf16.  V columns are left untouched in the slab."""
    B, S, _ = qkv.shape
    D = head_dim
    Hqk = num_heads + num_kv_heads
    if block_s is None:
        block_s = _pick_tile(S, (512, 256, 128))
    ts = block_s
    kernel = functools.partial(_rope_kernel,
                               scale=1.0 / math.sqrt(D), num_q_heads=num_heads)
    return pl.pallas_call(
        kernel,
        out_shape=jax.ShapeDtypeStruct((B, S, Hqk * D), jnp.bfloat16),
        grid=(B, S // ts, Hqk),
        in_specs=[pl.BlockSpec((1, ts, D), lambda b, si, h: (b, si, h)),
                  pl.BlockSpec((ts, D), lambda b, si, h: (si, 0)),
                  pl.BlockSpec((ts, D), lambda b, si, h: (si, 0))],
        out_specs=pl.BlockSpec((1, ts, D), lambda b, si, h: (b, si, h)),
        compiler_params=pltpu.CompilerParams(
            dimension_semantics=("parallel", "parallel", "parallel"),
            vmem_limit_bytes=_vmem_limit()),
    )(qkv, cos, sin)


# --------------------------------------------------------------------------
# Flash attention kernel (pre-RoPE'd Q/K, stacked GQA group, causal skipping)
# --------------------------------------------------------------------------
def _flash_attn_kernel(q_ref, k_ref, v_ref, o_ref,
                       qstk_scr, acc_scr, m_scr, l_scr,
                       *, groups, head_dim, block_s):
    D, ts = head_dim, block_s
    qi = pl.program_id(2)
    ki = pl.program_id(3)

    @pl.when(ki == 0)
    def _init():
        m_scr[...] = jnp.full_like(m_scr, -jnp.inf)
        l_scr[...] = jnp.zeros_like(l_scr)
        acc_scr[...] = jnp.zeros_like(acc_scr)
        # Stack the GQA group's query heads along rows: (ts, groups*D) -> (groups*ts, D).
        # Q is already RoPE'd and pre-scaled by 1/sqrt(D) (bf16), MXU-ready.
        for g in range(groups):
            qstk_scr[g * ts:(g + 1) * ts, :] = q_ref[0, :, g * D:(g + 1) * D]

    def _scores():
        # ONE (groups*ts, D) x (ts, D)^T matmul per kv step -> (groups*ts, ts), f32.
        return lax.dot_general(qstk_scr[...], k_ref[0],
                               (((1,), (1,)), ((), ())),
                               preferred_element_type=jnp.float32)

    def _online_softmax_update(s):
        m_prev = m_scr[...]
        m_new = jnp.maximum(m_prev, jnp.max(s, axis=-1, keepdims=True))
        alpha = jnp.exp(m_prev - m_new)
        p = jnp.exp(s - m_new)
        l_scr[...] = alpha * l_scr[...] + jnp.sum(p, axis=-1, keepdims=True)
        acc_scr[...] = alpha * acc_scr[...] + jnp.dot(
            p.astype(jnp.bfloat16), v_ref[0], preferred_element_type=jnp.float32)
        m_scr[...] = m_new

    # Off-diagonal kv tiles are fully unmasked: no iota/compare/select work at all.
    @pl.when(ki < qi)
    def _off_diagonal():
        _online_softmax_update(_scores())

    # Diagonal tile: apply the causal mask, then normalize and write the output.
    @pl.when(ki == qi)
    def _diagonal_and_finalize():
        row = lax.broadcasted_iota(jnp.int32, (ts, ts), 0)
        col = lax.broadcasted_iota(jnp.int32, (ts, ts), 1)
        mask = (col <= row)[None]                          # same mask for every group
        s = _scores().reshape(groups, ts, ts)
        s = jnp.where(mask, s, -jnp.inf).reshape(groups * ts, ts)
        _online_softmax_update(s)

        out = acc_scr[...] / l_scr[...]                    # exact recip, once per q tile
        for g in range(groups):
            o_ref[0, :, g * D:(g + 1) * D] = out[g * ts:(g + 1) * ts, :].astype(o_ref.dtype)

    # kv tiles with ki > qi are fully masked: nothing runs, and the clamped index
    # maps mean they trigger no new K/V DMAs either.


def flash_attention(qk, qkv, *, num_heads, num_kv_heads, head_dim, block_s=None):
    """qk:  (B, S, (Hq+Hkv)*D) bf16, RoPE'd [Q(prescaled) | K] columns.
       qkv: (B, S, (Hq+2*Hkv)*D) bf16, only the V columns are read.
       Returns the attention output as (B, S, Hq*D) bf16 (o-proj ready)."""
    B, S, _ = qk.shape
    D = head_dim
    Hq, Hkv = num_heads, num_kv_heads
    groups = Hq // Hkv
    gD = groups * D
    if block_s is None:
        block_s = _pick_tile(S, (256, 128))
    ts = block_s
    nq = S // ts
    grid = (B, Hkv, nq, nq)

    # kv-tile index is clamped to the q tile so skipped (fully masked) tiles do not
    # trigger new DMAs.
    q_map = lambda b, kvh, qi, ki: (b, qi, kvh)
    k_map = lambda b, kvh, qi, ki: (b, jnp.minimum(ki, qi), Hq + kvh)
    v_map = lambda b, kvh, qi, ki: (b, jnp.minimum(ki, qi), Hq + Hkv + kvh)
    o_map = lambda b, kvh, qi, ki: (b, qi, kvh)

    kernel = functools.partial(_flash_attn_kernel,
                               groups=groups, head_dim=D, block_s=ts)
    return pl.pallas_call(
        kernel,
        out_shape=jax.ShapeDtypeStruct((B, S, Hq * D), jnp.bfloat16),
        grid=grid,
        in_specs=[
            pl.BlockSpec((1, ts, gD), q_map),   # Q group columns (pre-RoPE'd, bf16)
            pl.BlockSpec((1, ts, D), k_map),    # K columns (pre-RoPE'd, bf16)
            pl.BlockSpec((1, ts, D), v_map),    # V columns of the qkv slab (bf16)
        ],
        out_specs=pl.BlockSpec((1, ts, gD), o_map),
        scratch_shapes=[
            pltpu.VMEM((groups * ts, D), jnp.bfloat16),   # stacked, MXU-ready Q
            pltpu.VMEM((groups * ts, D), jnp.float32),    # output accumulator
            pltpu.VMEM((groups * ts, 1), jnp.float32),    # running max
            pltpu.VMEM((groups * ts, 1), jnp.float32),    # running sum
        ],
        compiler_params=pltpu.CompilerParams(
            dimension_semantics=("parallel", "parallel", "parallel", "arbitrary"),
            vmem_limit_bytes=_vmem_limit()),
    )(qk, qk, qkv)


# --------------------------------------------------------------------------
# Parameter prep (done ONCE) + forward wrapper
# --------------------------------------------------------------------------
def prepare_params(params, dtype=jnp.bfloat16):
    """Fuse q/k/v weights and pre-transpose everything once (torch (N,K) layout in)."""
    qkv_w = jnp.concatenate([params["q_w"], params["k_w"], params["v_w"]], axis=0)
    return {"qkv_wt": qkv_w.T.astype(dtype),        # (hidden, (H+2*Hkv)*D)
            "o_wt": params["o_w"].T.astype(dtype)}  # (H*D, hidden)


def _rope_tables(S, D):
    """cos / sign-folded sin matching the module: pids = arange(4096)+8192, offset=4096-S."""
    pos = jnp.arange(4096 - S, 4096, dtype=jnp.float32) + 8192.0
    inv_freq = 1.0 / (10000.0 ** (jnp.arange(0, D, 2, dtype=jnp.float32) / D))
    freq = jnp.concatenate([inv_freq, inv_freq], axis=-1)             # (D,)
    ang = pos[:, None] * freq[None, :]                                # (S, D)
    half = D // 2
    sign = jnp.concatenate([-jnp.ones((half,), jnp.float32),
                            jnp.ones((half,), jnp.float32)])
    return jnp.cos(ang), jnp.sin(ang) * sign


def j_attention_forward(x, prep, *, num_heads, num_kv_heads, head_dim):
    B, S, hidden = x.shape
    D = head_dim
    assert D % 128 == 0 and D % 2 == 0 and num_heads % num_kv_heads == 0

    # 1) Fused QKV projection (single pass over x): bf16 operands / f32 acc / bf16 out.
    x2d = x.reshape(B * S, hidden).astype(jnp.bfloat16)
    qkv = matmul(x2d, prep["qkv_wt"], out_dtype=jnp.bfloat16).reshape(B, S, -1)

    # 2) RoPE applied ONCE to Q (with 1/sqrt(D) folded in) and K, kept in bf16.
    cos, sin = _rope_tables(S, D)
    qk = rope_qk(qkv, cos, sin, num_heads=num_heads,
                 num_kv_heads=num_kv_heads, head_dim=D)

    # 3) Flash attention (online softmax, stacked GQA group, causal block skipping).
    attn = flash_attention(qk, qkv, num_heads=num_heads,
                           num_kv_heads=num_kv_heads, head_dim=D)   # (B, S, H*D) bf16

    # 4) Output projection (bf16 operands, f32 result).
    out = matmul(attn.reshape(B * S, num_heads * D), prep["o_wt"],
                 out_dtype=jnp.float32)
    return out.reshape(B, S, hidden)


# --------------------------------------------------------------------------
# Pure-JAX references (mirror the PyTorch forward; mxu_dtype=bf16 mirrors the
# kernel's bf16-operand / bf16-intermediate / f32-accumulation recipe)
# --------------------------------------------------------------------------
def _rotate_half(x):
    half = x.shape[-1] // 2
    return jnp.concatenate([-x[..., half:], x[..., :half]], axis=-1)


def reference_forward(x, params, *, num_heads, num_kv_heads, head_dim,
                      mxu_dtype=jnp.float32):
    B, S, hidden = x.shape
    D = head_dim
    groups = num_heads // num_kv_heads
    cast = lambda a: a.astype(mxu_dtype)
    rnd = lambda a: a.astype(mxu_dtype).astype(jnp.float32)   # bf16 intermediate storage

    x2d = x.reshape(B * S, hidden)
    lin = lambda a, w: jnp.dot(cast(a), cast(w).T,
                               preferred_element_type=jnp.float32)
    q = rnd(lin(x2d, params["q_w"])).reshape(B, S, num_heads, D)
    k = rnd(lin(x2d, params["k_w"])).reshape(B, S, num_kv_heads, D)
    v = rnd(lin(x2d, params["v_w"])).reshape(B, S, num_kv_heads, D)

    pos = jnp.arange(4096 - S, 4096, dtype=jnp.float32) + 8192.0
    inv_freq = 1.0 / (10000.0 ** (jnp.arange(0, D, 2, dtype=jnp.float32) / D))
    freq = jnp.concatenate([inv_freq, inv_freq], -1)
    ang = pos[:, None] * freq[None, :]
    cos = jnp.cos(ang)[None, :, None, :]
    sin = jnp.sin(ang)[None, :, None, :]
    q = q * cos + _rotate_half(q) * sin
    k = k * cos + _rotate_half(k) * sin

    qh = q.transpose(0, 2, 1, 3)
    kh = jnp.repeat(k.transpose(0, 2, 1, 3), groups, axis=1)
    vh = jnp.repeat(v.transpose(0, 2, 1, 3), groups, axis=1)

    scale = 1.0 / math.sqrt(D)
    s = jnp.einsum("bhqd,bhkd->bhqk", cast(qh * scale), cast(kh),
                   preferred_element_type=jnp.float32)
    mask = jnp.tril(jnp.ones((S, S), dtype=bool))
    s = jnp.where(mask[None, None], s, -jnp.inf)
    p = jax.nn.softmax(s, axis=-1)
    o = jnp.einsum("bhqk,bhkd->bhqd", cast(p), cast(vh),
                   preferred_element_type=jnp.float32)
    o = o.transpose(0, 2, 1, 3).reshape(B, S, num_heads * D)
    return jnp.dot(cast(o), cast(params["o_w"]).T,
                   preferred_element_type=jnp.float32).reshape(B, S, hidden)


# --------------------------------------------------------------------------
if __name__ == "__main__":
    # S >= 2 * block_s so the multi-kv-tile online-softmax path, the unmasked
    # (ki < qi) path, the skip (ki > qi) path and the clamped index maps all run.
    B, S = 2, 512
    num_heads, num_kv_heads, head_dim = 4, 2, 128     # num_key_value_groups = 2
    hidden = num_heads * head_dim                     # 512

    key = jax.random.PRNGKey(0)
    ks = jax.random.split(key, 5)
    w_scale = 0.05
    params = {
        "q_w": w_scale * jax.random.normal(ks[0], (num_heads * head_dim, hidden), jnp.float32),
        "k_w": w_scale * jax.random.normal(ks[1], (num_kv_heads * head_dim, hidden), jnp.float32),
        "v_w": w_scale * jax.random.normal(ks[2], (num_kv_heads * head_dim, hidden), jnp.float32),
        "o_w": w_scale * jax.random.normal(ks[3], (hidden, num_heads * head_dim), jnp.float32),
    }
    x = jax.random.normal(ks[4], (B, S, hidden), jnp.float32)

    prep = prepare_params(params)
    out = j_attention_forward(x, prep, num_heads=num_heads,
                              num_kv_heads=num_kv_heads, head_dim=head_dim)
    out = jax.block_until_ready(out)
    assert out.shape == (B, S, hidden)

    # Tight structural check vs a reference mirroring the bf16-MXU / bf16-storage recipe.
    ref16 = reference_forward(x, params, num_heads=num_heads,
                              num_kv_heads=num_kv_heads, head_dim=head_dim,
                              mxu_dtype=jnp.bfloat16)
    err16 = float(jnp.max(jnp.abs(out - ref16)))
    assert err16 < 3e-2, f"mismatch vs bf16-MXU reference: max abs err = {err16}"

    # Looser numeric sanity check vs the full-f32 torch-equivalent reference.
    ref32 = reference_forward(x, params, num_heads=num_heads,
                              num_kv_heads=num_kv_heads, head_dim=head_dim,
                              mxu_dtype=jnp.float32)
    err32 = float(jnp.max(jnp.abs(out - ref32)))
    assert err32 < 3e-1, f"mismatch vs f32 reference: max abs err = {err32}"

    print("KERNEL_OK")
</pallas_src>

<mosaic_0001>
module attributes {stable_mosaic.version = 11 : i64} {
  func.func @_matmul_kernel(%arg0: i32, %arg1: i32, %arg2: i32, %arg3: memref<512x512xbf16, #tpu.memory_space<vmem>>, %arg4: memref<512x512xbf16, #tpu.memory_space<vmem>>, %arg5: memref<512x512xbf16, #tpu.memory_space<vmem>>, %arg6: memref<512x512xf32, #tpu.memory_space<vmem>>) attributes {dimension_semantics = [#tpu.dimension_semantics<parallel>, #tpu.dimension_semantics<parallel>, #tpu.dimension_semantics<arbitrary>], iteration_bounds = array<i64: 2, 2, 1>, scalar_prefetch = 0 : i64, scratch_operands = 1 : i64, tpu.core_type = #tpu.core_type<tc>, window_params = [{transform_indices = @transform_0, window_bounds = array<i64: 512, 512>}, {transform_indices = @transform_1, window_bounds = array<i64: 512, 512>}, {transform_indices = @transform_2, window_bounds = array<i64: 512, 512>}]} {
    %c0_i32 = arith.constant 0 : i32
    %0 = arith.cmpi eq, %arg2, %c0_i32 : i32
    %1 = arith.extui %0 : i1 to i32
    %c0_i32_0 = arith.constant 0 : i32
    %2 = arith.cmpi ne, %1, %c0_i32_0 : i32
    scf.if %2 {
      %cst_10 = arith.constant 0.000000e+00 : f32
      %12 = vector.broadcast %cst_10 : f32 to vector<512x512xf32>
      %c0_11 = arith.constant 0 : index
      %c0_12 = arith.constant 0 : index
      %13 = vector.load %arg6[%c0_11, %c0_12] : memref<512x512xf32, #tpu.memory_space<vmem>>, vector<512x512xf32>
      tpu.vector_store %arg6[%c0_11, %c0_12], %12 {strides = array<i32>} : memref<512x512xf32, #tpu.memory_space<vmem>>, vector<512x512xf32>,
    } else {
    }
    %c0 = arith.constant 0 : index
    %c0_1 = arith.constant 0 : index
    %3 = vector.load %arg6[%c0, %c0_1] : memref<512x512xf32, #tpu.memory_space<vmem>>, vector<512x512xf32>
    %c0_2 = arith.constant 0 : index
    %c0_3 = arith.constant 0 : index
    %4 = vector.load %arg3[%c0_2, %c0_3] : memref<512x512xbf16, #tpu.memory_space<vmem>>, vector<512x512xbf16>
    %c0_4 = arith.constant 0 : index
    %c0_5 = arith.constant 0 : index
    %5 = vector.load %arg4[%c0_4, %c0_5] : memref<512x512xbf16, #tpu.memory_space<vmem>>, vector<512x512xbf16>
    %cst = arith.constant dense<0.000000e+00> : vector<512x512xf32>
    %6 = tpu.matmul %4, %5, %cst {dimension_numbers = #tpu.dot_dimension_numbers<[1], [0], [0], [1], [0, 0, 1, 1], [], []>} : vector<512x512xbf16>, vector<512x512xbf16>, vector<512x512xf32> -> vector<512x512xf32>
    %7 = arith.addf %3, %6 : vector<512x512xf32>
    %c0_6 = arith.constant 0 : index
    %c0_7 = arith.constant 0 : index
    %8 = vector.load %arg6[%c0_6, %c0_7] : memref<512x512xf32, #tpu.memory_space<vmem>>, vector<512x512xf32>
    tpu.vector_store %arg6[%c0_6, %c0_7], %7 {strides = array<i32>} : memref<512x512xf32, #tpu.memory_space<vmem>>, vector<512x512xf32>,
    %c0_i32_8 = arith.constant 0 : i32
    %9 = arith.cmpi eq, %arg2, %c0_i32_8 : i32
    %10 = arith.extui %9 : i1 to i32
    %c0_i32_9 = arith.constant 0 : i32
    %11 = arith.cmpi ne, %10, %c0_i32_9 : i32
    scf.if %11 {
      %c0_10 = arith.constant 0 : index
      %c0_11 = arith.constant 0 : index
      %12 = vector.load %arg6[%c0_10, %c0_11] : memref<512x512xf32, #tpu.memory_space<vmem>>, vector<512x512xf32>
      %13 = arith.truncf %12 : vector<512x512xf32> to vector<512x512xbf16>
      %c0_12 = arith.constant 0 : index
      %c0_13 = arith.constant 0 : index
      %14 = vector.load %arg5[%c0_12, %c0_13] : memref<512x512xbf16, #tpu.memory_space<vmem>>, vector<512x512xbf16>
      tpu.vector_store %arg5[%c0_12, %c0_13], %13 {strides = array<i32>} : memref<512x512xbf16, #tpu.memory_space<vmem>>, vector<512x512xbf16>,
    } else {
    }
    return
  }
  func.func @transform_0(%arg0: i32, %arg1: i32, %arg2: i32) -> (i32, i32) {
    %c0_i32 = arith.constant 0 : i32
    return %arg0, %arg2 : i32, i32
  }
  func.func @transform_1(%arg0: i32, %arg1: i32, %arg2: i32) -> (i32, i32) {
    %c0_i32 = arith.constant 0 : i32
    return %arg2, %arg1 : i32, i32
  }
  func.func @transform_2(%arg0: i32, %arg1: i32, %arg2: i32) -> (i32, i32) {
    %c0_i32 = arith.constant 0 : i32
    return %arg0, %arg1 : i32, i32
  }
}

</mosaic_0001>

<bundles_post_ra>
// kernel: tpu_custom_call.1
= control target key start
LH: loop header
LB: loop body
LE: loop exit
PB: predicated region body
PF: predicated region fallthrough
CT: control target
= control target key end

     0   :  { %s7734_s0 = inlined_call_operand.hbm [shape: bf16[1024,512], index: 0, kind: input, shape index: {}]   ;;  %s7735_s1 = inlined_call_operand.hbm [shape: bf16[512,1024], index: 1, kind: input, shape index: {}]   ;;  %s7736_s2 = inlined_call_operand.hbm [shape: bf16[1024,1024], index: 2, kind: output, shape index: {}]  }
   0x1   :  { %7746 = sst [smem:[#allocation18_spill]] %s7734_s0 }
   0x2   :  { %7747 = sst [smem:[#allocation19_spill]] %s7736_s2 }
   0x3   :  { %7 = vsyncpa [#allocation4], 0 }
   0x4   :  { %9 = vsyncpa [#allocation4 + $0x1], 0 }
   0x5   :  { %10 = vsyncpa [#allocation7], 0 }
   0x6   :  { %12 = vsyncpa [#allocation7 + $0x1], 0 }
   0x7   :  { %13 = vsyncpa [#allocation5], 0 }
   0x8   :  { %15 = vsyncpa [#allocation5 + $0x1], 0  ;;  %s6923_s9 = smov 0   ;;  %s6925_s10 = smov 0  }
   0x9   :  { %s6927_s11 = smov 0   ;;  %s6929_s12 = smov 0  }
   0xa   :  { %s6931_s13 = smov 0   ;;  %s6933_s14 = smov 0  }
   0xb   :  { %s6935_s15 = smov 0   ;;  %s6937_s16 = smov 0  }
   0xc   :  { %s6939_s17 = smov 0   ;;  %s6941_s18 = smov 0  }
   0xd   :  { %s6943_s19 = smov 0   ;;  %s6945_s20 = smov 0  }
   0xe   :  { %s6947_s21 = smov 0   ;;  %s6949_s22 = smov 0  }
   0xf LB: > { %7748 = sst [smem:[#allocation12_spill]] %s6885_s19  ;;  %s5506_s23 = sadd.s32 4294967295, %s6897_s22   ;;  %s6897_s22 = sphi %s6949_s22, %s21_s22   ;;  %s6893_s21 = sphi %s6947_s21, %s7778_s21   ;;  %s6889_s20 = sphi %s6945_s20, %s7789_s20   ;;  %s6885_s19 = sphi %s6943_s19, %s7776_s19   ;;  %s6881_s18 = sphi %s6941_s18, %s7788_s18   ;;  %s6877_s17 = sphi %s6939_s17, %s7787_s17   ;;  %s6873_s16 = sphi %s6937_s16, %s7786_s16   ;;  %s6869_s15 = sphi %s6935_s15, %s7785_s15   ;;  %s6865_s14 = sphi %s6933_s14, %s7784_s14   ;;  %s6861_s13 = sphi %s6931_s13, %s7783_s13   ;;  %s6857_s12 = sphi %s6929_s12, %s7782_s12   ;;  %s6853_s11 = sphi %s6927_s11, %s7781_s11   ;;  %s6849_s10 = sphi %s6925_s10, %s7780_s10   ;;  %s6845_s9 = sphi %s6923_s9, %s7779_s9  }
  0x10   : > { %7749 = sst [smem:[#allocation13_spill]] %s6893_s21  ;;  %p56_p0 = scmp.ne.s32.totalorder %s6877_s17, %s6873_s16 }
  0x11   : > { %p57_p1 = scmp.eq.s32.totalorder %s6897_s22, 0  ;;  %p62_p2 = scmp.ne.s32.totalorder %s6873_s16, %s6869_s15 }
  0x12   : > { %p6998_p3 = scmp.eq.s32.totalorder %s5506_s23, 0  ;;  %p7002_p4 = scmp.eq.s32.totalorder %s5506_s23, 3 }
  0x13   : > { %p58_p5 = por %p57_p1, %p56_p0  ;;  %p6061_p7 = scmp.lt.s32.totalorder %s6897_s22, 4 }
  0x14   : > { %p7010_p6 = por %p6998_p3, %p62_p2  ;;  %s142_s29 = sand.u32 1, %s6877_s17  }
  0x15   : > { %s5913_s30 = sshll.u32 %s6893_s21, 14  ;;  %s5510_s3 = sshll.u32 %s142_s29, 10 }
  0x16   : > { %s7753_s0 = sld [smem:[#allocation18_spill]]  ;;  %s146_s7 = scalar_lea.vmem [#allocation3], %s5510_s3 }
  0x17   : > { %s156_s8 = sshll.u32 %s146_s7, 4  ;;  %p7022_p8 = pnand %p6061_p7, %p58_p5  ;;  %s157_s8 = int_to_ptr.vmem [resolvable:$true] %s156_s8 }
  0x18   : > { %s143_s23 = scalar_lea.sflag [#allocation4], %s142_s29  ;;  %s6706_s25 = scalar_lea.vmem %s157_s8, 16384 }
  0x19   : > { %p6695_p9 = pneg %p7022_p8  ;;  %p6707_p10 = scmp.ne.s32.totalorder %s157_s8, %s6706_s25 }
  0x1a   : > { %s6899_s24 = smov [#allocation3]  }
  0x1b   : > { %p6709_p11 = pnand %p6707_p10, %p6695_p9  ;;  %s6711_s2 = sshll.u32 %s6899_s24, 4  ;;  %s6712_s2 = int_to_ptr.vmem [resolvable:$false] %s6711_s2 }
  0x1c   : > { %s155_s6 = scalar_lea.hbm %s7753_s0, %s5913_s30  ;;  %s6713_s30 = scalar_lea.vmem %s6712_s2, 32768 }
  0x1d   : > { %p6710_p12 = pneg %p6709_p11  ;;  %p6714_p13 = scmp.lt.s32.totalorder %s157_s8, %s6712_s2 }
  0x1e   : > { %p6715_p0 = scmp.lt.s32.totalorder %s6713_s30, %s6706_s25 }
  0x20   : > { %p6716_p2 = por %p6715_p0, %p6714_p13 }
  0x22   : > { %p6717_p5 = pnand %p6716_p2, %p6710_p12 }
  0x24   : > { %6720 = shalt.err (!%p6717_p5)
}
  0x25   : > { %s7738_s3 = smov 256   ;;  %s7739_s2 = smov 16  }
  0x26   : > { %6053 = dma.hbm_to_vmem [thread:$0]  (!%p7022_p8), %s155_s6, 16384, %s157_s8, %s143_s23, %s7738_s3, %s7738_s3, %s7739_s2  }
  0x27   : > { %p5517_p9 = scmp.ge.s32.totalorder %s6897_s22, 1  ;;  %p188_p10 = scmp.lt.s32.totalorder %s6897_s22, 5 }
  0x28   : > { %s5507_s25 = sadd.s32 4294967294, %s6897_s22   ;;  %s36_s29 = sadd.s32 1, %s6889_s20 }
  0x29   : > { %p7035_p11 = pnand %p5517_p9, %p188_p10  ;;  %s77_s4 = sadd.s32 1, %s6865_s14 }
  0x2a   : > { %p38_p12 = scmp.ge.s32.totalorder %s36_s29, 2  ;;  %p84_p13 = scmp.ne.s32.totalorder %s6865_s14, %s6861_s13 }
  0x2b   : > { %p90_p0 = scmp.ne.s32.totalorder %s6861_s13, %s6857_s12  ;;  %s105_s5 = sadd.s32 1, %s6853_s11 }
  0x2c   : > { %s7791_s29 = smov (%p38_p12, %s36_s29), 0  ;;  %s7757_s6 = sadd.s32 1, %s6893_s21 }
  0x2d   : > { %7756 = sst [smem:[#allocation14_spill]] %s7791_s29  ;;  %s7793_s6 = smov (!%p38_p12, %s7757_s6), %s6893_s21 }
  0x2e   : > { %s73_s7 = ssub.s32 %s6889_s20, %s7791_s29  ;;  %p7056_p8 = por %p84_p13, %p57_p1 }
  0x2f   : > { %p42_p2 = scmp.ge.s32.totalorder %s7793_s6, 2  ;;  %p75_p5 = scmp.eq.s32.totalorder %s73_s7, 0 }
  0x30   : > { %p7062_p9 = por %p90_p0, %p6998_p3  ;;  %p115_p10 = scmp.ne.s32.totalorder %s6853_s11, %s6849_s10 }
  0x31   : > { %s7795_s6 = smov (%p42_p2, %s7793_s6), 0  ;;  %p121_p13 = scmp.ne.s32.totalorder %s6849_s10, %s6845_s9 }
  0x32   : > { %7760 = sst [smem:[#allocation15_spill]] %s7795_s6  ;;  %s44_s23 = ssub.s32 %s6893_s21, %s7795_s6 }
  0x33   : > { %s7071_s15 = scalar_select %p75_p5, %s6865_s14, %s77_s4  }
  0x34   : > { %p7077_p1 = por %p7002_p4, %p115_p10  ;;  %p47_p12 = scmp.eq.s32.totalorder %s44_s23, 0 }
  0x35   : > { %7761 = sst [smem:[#allocation16_spill]] %s7071_s15  ;;  %s102_s26 = sor.u32 %s73_s7, %s44_s23 }
  0x36   : > { %s7762_s30 = scalar_select %p7077_p1, 1, 0 }
  0x37   : > { %p103_p3 = scmp.eq.s32.totalorder %s102_s26, 0  ;;  %s7764_s3 = sadd.s32 1, %s6877_s17 }
  0x38   : > { %7763 = sst [smem:[#allocation17_spill]] %s7762_s30  ;;  %p122_p0 = scmp.eq.s32.totalorder %s5507_s25, 3 }
  0x39   : > { %s7086_s2 = scalar_select %p47_p12, %s6877_s17, %s7764_s3  }
  0x3a   : > { %s7089_s0 = scalar_select %p103_p3, %s6853_s11, %s105_s5  }
  0x3b   : > { %s166_s4 = sand.u32 1, %s6865_s14   ;;  %p7092_p2 = por %p122_p0, %p121_p13 }
  0x3c   : > { %s5514_s29 = sshll.u32 %s166_s4, 10  ;;  %s5914_s6 = sshll.u32 %s6889_s20, 8 }
  0x3d   : > { %s7765_s27 = scalar_select %p7092_p2, 1, 0 }
  0x3e   : > { %s170_s21 = scalar_lea.vmem [#allocation6], %s5514_s29  ;;  %s179_s7 = scalar_lea.hbm %s7735_s1, %s5914_s6 }
  0x3f   : > { %s180_s15 = sshll.u32 %s170_s21, 4  ;;  %p7104_p4 = pnand %p6061_p7, %p7056_p8  ;;  %s181_s15 = int_to_ptr.vmem [resolvable:$true] %s180_s15 }
  0x40   : > { %s167_s25 = scalar_lea.sflag [#allocation7], %s166_s4  ;;  %s6734_s5 = scalar_lea.vmem %s181_s15, 16384 }
  0x41   : > { %p6723_p5 = pneg %p7104_p4  ;;  %p6735_p10 = scmp.ne.s32.totalorder %s181_s15, %s6734_s5 }
  0x42   : > { %s6902_s21 = smov [#allocation6]  }
  0x43   : > { %p6737_p12 = pnand %p6735_p10, %p6723_p5  ;;  %s6739_s29 = sshll.u32 %s6902_s21, 4  ;;  %s6740_s29 = int_to_ptr.vmem [resolvable:$false] %s6739_s29 }
  0x44   : > { %s6741_s19 = scalar_lea.vmem %s6740_s29, 32768  ;;  %p6742_p13 = scmp.lt.s32.totalorder %s181_s15, %s6740_s29 }
  0x45   : > { %p6738_p3 = pneg %p6737_p12  ;;  %p6743_p0 = scmp.lt.s32.totalorder %s6741_s19, %s6734_s5 }
  0x47   : > { %p6744_p2 = por %p6743_p0, %p6742_p13 }
  0x49   : > { %p6745_p1 = pnand %p6744_p2, %p6738_p3 }
  0x4b   : > { %6748 = shalt.err (!%p6745_p1)
}
  0x4c   : > { %s6903_s6 = smov 512   ;;  %s7767_s8 = smov 16  }
  0x4d   : > { %s7768_s23 = smov 256   ;;  %192 = sbr.rel (%p7035_p11) target bundleno = 875 (0x36b), region = 28 }
  0x4e   : > { %6056 = dma.hbm_to_vmem [thread:$0]  (!%p7104_p4), %s179_s7, 16384, %s181_s15, %s167_s25, %s6903_s6, %s7768_s23, %s7767_s8  }
  0x4f   : > { %s194_s30 = sand.u32 (!%p7035_p11), 1, %s6873_s16  }
  0x50   : > { %s5518_s26 = sshll.u32 (!%p7035_p11), %s194_s30, 10  ;;  %s195_s4 = scalar_lea.sflag (!%p7035_p11), [#allocation4], %s194_s30 }
  0x51   : > { %s7117_s21 = scalar_lea.vmem (!%p7035_p11), [#allocation3], %s5518_s26 }
  0x52   : > { %6832 = dma.done.wait (%p7010_p6), %s195_s4, 16384  }
  0x53   : > { %6834 = vsyncadd (%p7010_p6), %s195_s4, 4294950912  ;;  %s203_s3 = sand.u32 1, %s6861_s13  }
  0x54   : > { %s5519_s5 = sshll.u32 %s203_s3, 10  ;;  %s204_s15 = scalar_lea.sflag [#allocation7], %s203_s3 }
  0x55   : > { %s7124_s7 = scalar_lea.vmem [#allocation6], %s5519_s5 }
  0x56   : > { %6836 = dma.done.wait (%p7062_p9), %s204_s15, 16384  }
  0x57   : > { %6838 = vsyncadd (%p7062_p9), %s204_s15, 4294950912  ;;  %v6181_v0 = vld [vmem:[%s7124_s7 + $0xe4] ss:$16 sps:$4 sm:$0xff]   ;;  %v6185_v2 = vld [vmem:[%s7124_s7 + $0xe0] ss:$16 sps:$4 sm:$0xff]   ;;  %s230_s28 = sand.u32 1, %s6849_s10  }
  0x58   : > { %v6183_v1 = vld [vmem:[%s7124_s7 + $0x2e4] ss:$16 sps:$4 sm:$0xff]   ;;  %2291 = vmatprep.subr.bf16.mxu0 %v6181_v0  ;;  %v6186_v3 = vld [vmem:[%s7124_s7 + $0x2e0] ss:$16 sps:$4 sm:$0xff]   ;;  %v6282_v51 = vld [vmem:[%s7117_s21 + $0xc] ss:$16 sps:$4 sm:$0xff]  }
  0x59   : > { %2644 = vmatprep.subr.bf16.mxu1 %v6183_v1  ;;  %v6187_v4 = vld [vmem:[%s7124_s7 + $0xc4] ss:$16 sps:$4 sm:$0xff]   ;;  %2292 = vmatpush1.bf16.msra.mxu0 %v6185_v2  ;;  %v6191_v6 = vld [vmem:[%s7124_s7 + $0xc0] ss:$16 sps:$4 sm:$0xff]   ;;  %v6285_v2 = vld [vmem:[%s7124_s7 + $0xec] ss:$16 sps:$4 sm:$0xff]  }
  0x5a   : > { %2645 = vmatpush1.bf16.msra.mxu1 %v6186_v3  ;;  %v6189_v5 = vld [vmem:[%s7124_s7 + $0x2c4] ss:$16 sps:$4 sm:$0xff]   ;;  %2293 = vmatprep.subr.bf16.mxu0 %v6187_v4  ;;  %v6192_v7 = vld [vmem:[%s7124_s7 + $0x2c0] ss:$16 sps:$4 sm:$0xff]   ;;  %v6288_v3 = vld [vmem:[%s7124_s7 + $0x2ec] ss:$16 sps:$4 sm:$0xff]  }
  0x5b   : > { %2646 = vmatprep.subr.bf16.mxu1 %v6189_v5  ;;  %v6193_v8 = vld [vmem:[%s7124_s7 + $0xa4] ss:$16 sps:$4 sm:$0xff]   ;;  %v6197_v10 = vld [vmem:[%s7124_s7 + $0xa0] ss:$16 sps:$4 sm:$0xff]   ;;  %2676 = vmatprep.mubr.bf16.mxu1 %v6282_v51  ;;  %v6280_v5 = vld [vmem:[%s7117_s21 + $0x8] ss:$16 sps:$4 sm:$0xff]  }
  0x5c   : > { %v6195_v9 = vld [vmem:[%s7124_s7 + $0x2a4] ss:$16 sps:$4 sm:$0xff]   ;;  %v6198_v11 = vld [vmem:[%s7124_s7 + $0x2a0] ss:$16 sps:$4 sm:$0xff]   ;;  %v6330_v51 = vld [vmem:[%s7117_s21 + $0xa8] ss:$16 sps:$4 sm:$0xff]  }
  0x5d   : > { %2294 = vmatpush1.bf16.msra.mxu0 %v6191_v6  ;;  %v6199_v12 = vld [vmem:[%s7124_s7 + $0x84] ss:$16 sps:$4 sm:$0xff]   ;;  %v6203_v14 = vld [vmem:[%s7124_s7 + $0x80] ss:$16 sps:$4 sm:$0xff]   ;;  %v6283_v6 = vld [vmem:[%s7124_s7 + $0xe8] ss:$16 sps:$4 sm:$0xff]  }
  0x5e   : > { %2647 = vmatpush1.bf16.msra.mxu1 %v6192_v7  ;;  %2295 = vmatprep.subr.bf16.mxu0 %v6193_v8  ;;  %v6201_v13 = vld [vmem:[%s7124_s7 + $0x284] ss:$16 sps:$4 sm:$0xff]   ;;  %v6204_v15 = vld [vmem:[%s7124_s7 + $0x280] ss:$16 sps:$4 sm:$0xff]   ;;  %v6286_v7 = vld [vmem:[%s7124_s7 + $0x2e8] ss:$16 sps:$4 sm:$0xff]  }
  0x5f   : > { %2648 = vmatprep.subr.bf16.mxu1 %v6195_v9  ;;  %v6205_v16 = vld [vmem:[%s7124_s7 + $0x64] ss:$16 sps:$4 sm:$0xff]   ;;  %v6209_v18 = vld [vmem:[%s7124_s7 + $0x60] ss:$16 sps:$4 sm:$0xff]   ;;  %v6291_v9 = vld [vmem:[%s7117_s21 + $0x2c] ss:$16 sps:$4 sm:$0xff]  }
  0x60   : > { %v6207_v17 = vld [vmem:[%s7124_s7 + $0x264] ss:$16 sps:$4 sm:$0xff]   ;;  %v6210_v19 = vld [vmem:[%s7124_s7 + $0x260] ss:$16 sps:$4 sm:$0xff]   ;;  %s5520_s24 = sshll.u32 %s230_s28, 10  ;;  %s7769_s25 = sld [smem:[#allocation12_spill]] }
  0x61   : > { %2296 = vmatpush1.bf16.msra.mxu0 %v6197_v10  ;;  %v6211_v20 = vld [vmem:[%s7124_s7 + $0x44] ss:$16 sps:$4 sm:$0xff]   ;;  %v6215_v22 = vld [vmem:[%s7124_s7 + $0x40] ss:$16 sps:$4 sm:$0xff]   ;;  %v6303_v10 = vld [vmem:[%s7124_s7 + $0xcc] ss:$16 sps:$4 sm:$0xff]  }
  0x62   : > { %2649 = vmatpush1.bf16.msra.mxu1 %v6198_v11  ;;  %2297 = vmatprep.subr.bf16.mxu0 %v6199_v12  ;;  %v6213_v21 = vld [vmem:[%s7124_s7 + $0x244] ss:$16 sps:$4 sm:$0xff]   ;;  %v6216_v23 = vld [vmem:[%s7124_s7 + $0x240] ss:$16 sps:$4 sm:$0xff]   ;;  %v6306_v11 = vld [vmem:[%s7124_s7 + $0x2cc] ss:$16 sps:$4 sm:$0xff]  }
  0x63   : > { %2650 = vmatprep.subr.bf16.mxu1 %v6201_v13  ;;  %v6217_v24 = vld [vmem:[%s7124_s7 + $0x24] ss:$16 sps:$4 sm:$0xff]   ;;  %v6221_v26 = vld [vmem:[%s7124_s7 + $0x20] ss:$16 sps:$4 sm:$0xff]   ;;  %v6301_v12 = vld [vmem:[%s7124_s7 + $0xc8] ss:$16 sps:$4 sm:$0xff]  }
  0x64   : > { %v6219_v25 = vld [vmem:[%s7124_s7 + $0x224] ss:$16 sps:$4 sm:$0xff]   ;;  %v6222_v27 = vld [vmem:[%s7124_s7 + $0x220] ss:$16 sps:$4 sm:$0xff]   ;;  %v6304_v13 = vld [vmem:[%s7124_s7 + $0x2c8] ss:$16 sps:$4 sm:$0xff]  }
  0x65   : > { %2298 = vmatpush1.bf16.msra.mxu0 %v6203_v14  ;;  %v6223_v28 = vld [vmem:[%s7124_s7 + $0x4] ss:$16 sps:$4 sm:$0xff]   ;;  %v6227_v30 = vld [vmem:[%s7124_s7] ss:$16 sps:$4 sm:$0xff]   ;;  %v6321_v14 = vld [vmem:[%s7124_s7 + $0xac] ss:$16 sps:$4 sm:$0xff]  }
  0x66   : > { %2651 = vmatpush1.bf16.msra.mxu1 %v6204_v15  ;;  %2299 = vmatprep.subr.bf16.mxu0 %v6205_v16  ;;  %v6225_v29 = vld [vmem:[%s7124_s7 + $0x204] ss:$16 sps:$4 sm:$0xff]   ;;  %v6228_v31 = vld [vmem:[%s7124_s7 + $0x200] ss:$16 sps:$4 sm:$0xff]   ;;  %v6324_v15 = vld [vmem:[%s7124_s7 + $0x2ac] ss:$16 sps:$4 sm:$0xff]  }
  0x67   : > { %2652 = vmatprep.subr.bf16.mxu1 %v6207_v17  ;;  %v6229_v32 = vld [vmem:[%s7124_s7 + $0x1e4] ss:$16 sps:$4 sm:$0xff]   ;;  %v6233_v34 = vld [vmem:[%s7124_s7 + $0x1e0] ss:$16 sps:$4 sm:$0xff]   ;;  %v6294_v17 = vld [vmem:[%s7117_s21 + $0x28] ss:$16 sps:$4 sm:$0xff]  }
  0x68   : > { %v6231_v33 = vld [vmem:[%s7124_s7 + $0x3e4] ss:$16 sps:$4 sm:$0xff]   ;;  %v6234_v35 = vld [vmem:[%s7124_s7 + $0x3e0] ss:$16 sps:$4 sm:$0xff]   ;;  %s7367_s12 = scalar_lea.vmem [#allocation8], %s5520_s24  ;;  %s5907_s29 = sshll.u32 %s6881_s18, 2 }
  0x69   : > { %2300 = vmatpush1.bf16.msra.mxu0 %v6209_v18  ;;  %v6235_v36 = vld [vmem:[%s7124_s7 + $0x1c4] ss:$16 sps:$4 sm:$0xff]   ;;  %v6239_v38 = vld [vmem:[%s7124_s7 + $0x1c0] ss:$16 sps:$4 sm:$0xff]   ;;  %s6043_s19 = sshll.u32 %s7769_s25, 9  ;;  %s7770_s18 = sld [smem:[#allocation17_spill]] }
  0x6a   : > { %2653 = vmatpush1.bf16.msra.mxu1 %v6210_v19  ;;  %2301 = vmatprep.subr.bf16.mxu0 %v6211_v20  ;;  %v6237_v37 = vld [vmem:[%s7124_s7 + $0x3c4] ss:$16 sps:$4 sm:$0xff]   ;;  %v6240_v39 = vld [vmem:[%s7124_s7 + $0x3c0] ss:$16 sps:$4 sm:$0xff]   ;;  %v6297_v19 = vld [vmem:[%s7117_s21 + $0x4c] ss:$16 sps:$4 sm:$0xff]   ;;  %s5384_s6 = sadd.s32 %s6043_s19, %s5907_s29 }
  0x6b   : > { %2654 = vmatprep.subr.bf16.mxu1 %v6213_v21  ;;  %v6241_v40 = vld [vmem:[%s7124_s7 + $0x1a4] ss:$16 sps:$4 sm:$0xff]   ;;  %v6245_v42 = vld [vmem:[%s7124_s7 + $0x1a0] ss:$16 sps:$4 sm:$0xff]   ;;  %v6319_v20 = vld [vmem:[%s7124_s7 + $0xa8] ss:$16 sps:$4 sm:$0xff]  }
  0x6c   : > { %v6243_v41 = vld [vmem:[%s7124_s7 + $0x3a4] ss:$16 sps:$4 sm:$0xff]   ;;  %v6246_v43 = vld [vmem:[%s7124_s7 + $0x3a0] ss:$16 sps:$4 sm:$0xff]   ;;  %v6322_v21 = vld [vmem:[%s7124_s7 + $0x2a8] ss:$16 sps:$4 sm:$0xff]  }
  0x6d   : > { %2302 = vmatpush1.bf16.msra.mxu0 %v6215_v22  ;;  %v6247_v44 = vld [vmem:[%s7124_s7 + $0x184] ss:$16 sps:$4 sm:$0xff]   ;;  %v6251_v46 = vld [vmem:[%s7124_s7 + $0x180] ss:$16 sps:$4 sm:$0xff]   ;;  %v6339_v22 = vld [vmem:[%s7124_s7 + $0x8c] ss:$16 sps:$4 sm:$0xff]  }
  0x6e   : > { %2655 = vmatpush1.bf16.msra.mxu1 %v6216_v23  ;;  %2303 = vmatprep.subr.bf16.mxu0 %v6217_v24  ;;  %v6249_v45 = vld [vmem:[%s7124_s7 + $0x384] ss:$16 sps:$4 sm:$0xff]   ;;  %v6252_v47 = vld [vmem:[%s7124_s7 + $0x380] ss:$16 sps:$4 sm:$0xff]   ;;  %v6342_v23 = vld [vmem:[%s7124_s7 + $0x28c] ss:$16 sps:$4 sm:$0xff]  }
  0x6f   : > { %2656 = vmatprep.subr.bf16.mxu1 %v6219_v25  ;;  %v6253_v48 = vld [vmem:[%s7124_s7 + $0x164] ss:$16 sps:$4 sm:$0xff]   ;;  %v6257_v52 = vld [vmem:[%s7124_s7 + $0x160] ss:$16 sps:$4 sm:$0xff]   ;;  %v6337_v24 = vld [vmem:[%s7124_s7 + $0x88] ss:$16 sps:$4 sm:$0xff]  }
  0x70   : > { %v6279_v49 = vld [vmem:[%s7117_s21 + $0x4] ss:$16 sps:$4 sm:$0xff]   ;;  %v6258_v53 = vld [vmem:[%s7124_s7 + $0x360] ss:$16 sps:$4 sm:$0xff]   ;;  %s5909_s8 = sshll.u32 %s5384_s6, 6  ;;  %s5387_s23 = sshll.u32 %s7367_s12, 4  ;;  %s7654_s23 = int_to_ptr.vmem [resolvable:$true] %s5387_s23 }
  0x71   : > { %2304 = vmatpush1.bf16.msra.mxu0 %v6221_v26  ;;  %v6255_v50 = vld [vmem:[%s7124_s7 + $0x364] ss:$16 sps:$4 sm:$0xff]   ;;  %2323 = vmatprep.mubr.bf16.mxu0 %v6279_v49  ;;  %v6263_v56 = vld [vmem:[%s7124_s7 + $0x140] ss:$16 sps:$4 sm:$0xff]   ;;  %v6300_v26 = vld [vmem:[%s7117_s21 + $0x48] ss:$16 sps:$4 sm:$0xff]  }
  0x72   : > { %2657 = vmatpush1.bf16.msra.mxu1 %v6222_v27  ;;  %2305 = vmatprep.subr.bf16.mxu0 %v6223_v28  ;;  %v6259_v54 = vld [vmem:[%s7124_s7 + $0x144] ss:$16 sps:$4 sm:$0xff]   ;;  %v6264_v57 = vld [vmem:[%s7124_s7 + $0x340] ss:$16 sps:$4 sm:$0xff]   ;;  %v6340_v27 = vld [vmem:[%s7124_s7 + $0x288] ss:$16 sps:$4 sm:$0xff]  }
  0x73   : > { %2658 = vmatprep.subr.bf16.mxu1 %v6225_v29  ;;  %v6261_v55 = vld [vmem:[%s7124_s7 + $0x344] ss:$16 sps:$4 sm:$0xff]   ;;  %v6269_v60 = vld [vmem:[%s7124_s7 + $0x120] ss:$16 sps:$4 sm:$0xff]   ;;  %v6357_v29 = vld [vmem:[%s7124_s7 + $0x6c] ss:$16 sps:$4 sm:$0xff]  }
  0x74   : > { %v6265_v58 = vld [vmem:[%s7124_s7 + $0x124] ss:$16 sps:$4 sm:$0xff]   ;;  %v6270_v61 = vld [vmem:[%s7124_s7 + $0x320] ss:$16 sps:$4 sm:$0xff]   ;;  %v6327_v49 = vld [vmem:[%s7117_s21 + $0xac] ss:$16 sps:$4 sm:$0xff]  }
  0x75   : > { %2306 = vmatpush1.bf16.msra.mxu0 %v6227_v30  ;;  %v6267_v59 = vld [vmem:[%s7124_s7 + $0x324] ss:$16 sps:$4 sm:$0xff]   ;;  %v6275_v0 = vld [vmem:[%s7124_s7 + $0x100] ss:$16 sps:$4 sm:$0xff]   ;;  %v6309_v30 = vld [vmem:[%s7117_s21 + $0x6c] ss:$16 sps:$4 sm:$0xff]  }
  0x76   : > { %2659 = vmatpush1.bf16.msra.mxu1 %v6228_v31  ;;  %2307 = vmatprep.subr.bf16.mxu0 %v6229_v32  ;;  %v6271_v62 = vld [vmem:[%s7124_s7 + $0x104] ss:$16 sps:$4 sm:$0xff]   ;;  %v6276_v1 = vld [vmem:[%s7124_s7 + $0x300] ss:$16 sps:$4 sm:$0xff]   ;;  %v6360_v31 = vld [vmem:[%s7124_s7 + $0x26c] ss:$16 sps:$4 sm:$0xff]  }
  0x77   : > { %2660 = vmatprep.subr.bf16.mxu1 %v6231_v33  ;;  %v6273_v63 = vld [vmem:[%s7124_s7 + $0x304] ss:$16 sps:$4 sm:$0xff]   ;;  %v6277_v4 = vld [vmem:[%s7117_s21] ss:$16 sps:$4 sm:$0xff]   ;;  %v6355_v32 = vld [vmem:[%s7124_s7 + $0x68] ss:$16 sps:$4 sm:$0xff]  }
  0x78   : > { %v6289_v8 = vld [vmem:[%s7117_s21 + $0x24] ss:$16 sps:$4 sm:$0xff]   ;;  %v6293_v16 = vld [vmem:[%s7117_s21 + $0x20] ss:$16 sps:$4 sm:$0xff]   ;;  %v6358_v33 = vld [vmem:[%s7124_s7 + $0x268] ss:$16 sps:$4 sm:$0xff]  }
  0x79   : > { %2308 = vmatpush2.bf16.msra.mxu0 %v6233_v34  ;;  %v6295_v18 = vld [vmem:[%s7117_s21 + $0x44] ss:$16 sps:$4 sm:$0xff]   ;;  %v6299_v25 = vld [vmem:[%s7117_s21 + $0x40] ss:$16 sps:$4 sm:$0xff]   ;;  %s7771_s4 = sld [smem:[#allocation19_spill]]  ;;  %s7659_s3 = scalar_lea.sflag [#allocation5], %s230_s28 }
  0x7a   : > { %2661 = vmatpush2.bf16.msra.mxu1 %v6234_v35  ;;  %2309 = vmatprep.subr.bf16.mxu0 %v6235_v36  ;;  %v6307_v28 = vld [vmem:[%s7117_s21 + $0x64] ss:$16 sps:$4 sm:$0xff]   ;;  %v6311_v34 = vld [vmem:[%s7117_s21 + $0x60] ss:$16 sps:$4 sm:$0xff]   ;;  %v6312_v35 = vld [vmem:[%s7117_s21 + $0x68] ss:$16 sps:$4 sm:$0xff]  }
  0x7b   : > { %2662 = vmatprep.subr.bf16.mxu1 %v6237_v37  ;;  %v6313_v36 = vld [vmem:[%s7117_s21 + $0x84] ss:$16 sps:$4 sm:$0xff]   ;;  %v6373_v37 = vld [vmem:[%s7124_s7 + $0x48] ss:$16 sps:$4 sm:$0xff]   ;;  %s6749_s5 = scalar_lea.vmem %s7654_s23, 16384  ;;  %p7772_p7 = scmp.ne.s32.totalorder %s7770_s18, 0 }
  0x7c   : > { %p6750_p6 = scmp.ne.s32.totalorder %s7654_s23, %s6749_s5  ;;  %s6904_s15 = smov [#allocation8]  }
  0x7d   : > { %2310 = vmatpush2.bf16.msra.mxu0 %v6239_v38  ;;  %v6375_v38 = vld [vmem:[%s7124_s7 + $0x4c] ss:$16 sps:$4 sm:$0xff]  }
  0x7e   : > { %2663 = vmatpush2.bf16.msra.mxu1 %v6240_v39  ;;  %2311 = vmatprep.subr.bf16.mxu0 %v6241_v40  ;;  %v6376_v39 = vld [vmem:[%s7124_s7 + $0x248] ss:$16 sps:$4 sm:$0xff]   ;;  %v6378_v40 = vld [vmem:[%s7124_s7 + $0x24c] ss:$16 sps:$4 sm:$0xff]   ;;  %p6751_p11 = pnand %p6750_p6, %p7772_p7 }
  0x7f   : > { %2664 = vmatprep.subr.bf16.mxu1 %v6243_v41  ;;  %v6315_v41 = vld [vmem:[%s7117_s21 + $0x8c] ss:$16 sps:$4 sm:$0xff]  }
  0x80   : > { %p6752_p8 = pneg %p6751_p11 }
  0x81   : > { %2312 = vmatpush2.bf16.msra.mxu0 %v6245_v42  ;;  %v6317_v42 = vld [vmem:[%s7117_s21 + $0x80] ss:$16 sps:$4 sm:$0xff]  }
  0x82   : > { %2665 = vmatpush2.bf16.msra.mxu1 %v6246_v43  ;;  %2313 = vmatprep.subr.bf16.mxu0 %v6247_v44  ;;  %v6318_v43 = vld [vmem:[%s7117_s21 + $0x88] ss:$16 sps:$4 sm:$0xff]   ;;  %v6325_v44 = vld [vmem:[%s7117_s21 + $0xa4] ss:$16 sps:$4 sm:$0xff]  }
  0x83   : > { %2666 = vmatprep.subr.bf16.mxu1 %v6249_v45  ;;  %v6391_v45 = vld [vmem:[%s7124_s7 + $0x28] ss:$16 sps:$4 sm:$0xff]  }
  0x85   : > { %2314 = vmatpush2.bf16.msra.mxu0 %v6251_v46  ;;  %v6393_v46 = vld [vmem:[%s7124_s7 + $0x2c] ss:$16 sps:$4 sm:$0xff]  }
  0x86   : > { %2667 = vmatpush2.bf16.msra.mxu1 %v6252_v47  ;;  %2315 = vmatprep.subr.bf16.mxu0 %v6253_v48  ;;  %v6394_v47 = vld [vmem:[%s7124_s7 + $0x228] ss:$16 sps:$4 sm:$0xff]   ;;  %v6396_v48 = vld [vmem:[%s7124_s7 + $0x22c] ss:$16 sps:$4 sm:$0xff]  }
  0x87   : > { %2668 = vmatprep.subr.bf16.mxu1 %v6255_v50  ;;  %v6329_v50 = vld [vmem:[%s7117_s21 + $0xa0] ss:$16 sps:$4 sm:$0xff]  }
  0x89   : > { %2316 = vmatpush2.bf16.msra.mxu0 %v6257_v52  ;;  %v6331_v52 = vld [vmem:[%s7117_s21 + $0xc4] ss:$16 sps:$4 sm:$0xff]  }
  0x8a   : > { %2669 = vmatpush2.bf16.msra.mxu1 %v6258_v53  ;;  %2317 = vmatprep.subr.bf16.mxu0 %v6259_v54  ;;  %v6409_v53 = vld [vmem:[%s7124_s7 + $0x8] ss:$16 sps:$4 sm:$0xff]   ;;  %v6411_v54 = vld [vmem:[%s7124_s7 + $0xc] ss:$16 sps:$4 sm:$0xff]  }
  0x8b   : > { %2670 = vmatprep.subr.bf16.mxu1 %v6261_v55  ;;  %v6412_v55 = vld [vmem:[%s7124_s7 + $0x208] ss:$16 sps:$4 sm:$0xff]  }
  0x8d   : > { %2318 = vmatpush2.bf16.msra.mxu0 %v6263_v56  ;;  %v6414_v56 = vld [vmem:[%s7124_s7 + $0x20c] ss:$16 sps:$4 sm:$0xff]  }
  0x8e   : > { %2671 = vmatpush2.bf16.msra.mxu1 %v6264_v57  ;;  %2319 = vmatprep.subr.bf16.mxu0 %v6265_v58  ;;  %v6333_v57 = vld [vmem:[%s7117_s21 + $0xcc] ss:$16 sps:$4 sm:$0xff]   ;;  %v6335_v58 = vld [vmem:[%s7117_s21 + $0xc0] ss:$16 sps:$4 sm:$0xff]  }
  0x8f   : > { %2672 = vmatprep.subr.bf16.mxu1 %v6267_v59  ;;  %v6336_v59 = vld [vmem:[%s7117_s21 + $0xc8] ss:$16 sps:$4 sm:$0xff]  }
  0x91   : > { %2320 = vmatpush2.bf16.msra.mxu0 %v6269_v60  ;;  %v6343_v60 = vld [vmem:[%s7117_s21 + $0xe4] ss:$16 sps:$4 sm:$0xff]  }
  0x92   : > { %2673 = vmatpush2.bf16.msra.mxu1 %v6270_v61  ;;  %2321 = vmatprep.subr.bf16.mxu0 %v6271_v62  ;;  %v6427_v61 = vld [vmem:[%s7124_s7 + $0x1e8] ss:$16 sps:$4 sm:$0xff]   ;;  %v6429_v62 = vld [vmem:[%s7124_s7 + $0x1ec] ss:$16 sps:$4 sm:$0xff]  }
  0x93   : > { %2674 = vmatprep.subr.bf16.mxu1 %v6273_v63  ;;  %v6430_v63 = vld [vmem:[%s7124_s7 + $0x3e8] ss:$16 sps:$4 sm:$0xff]  }
  0x95   : > { %2322 = vmatpush2.bf16.msra.mxu0 %v6275_v0  ;;  %v6432_v0 = vld [vmem:[%s7124_s7 + $0x3ec] ss:$16 sps:$4 sm:$0xff]  }
  0x96   : > { %2675 = vmatpush2.bf16.msra.mxu1 %v6276_v1  ;;  %2997 = vmatprep.subr.bf16.mxu0 %v6285_v2  ;;  %v6345_v1 = vld [vmem:[%s7117_s21 + $0xec] ss:$16 sps:$4 sm:$0xff]   ;;  %v6347_v2 = vld [vmem:[%s7117_s21 + $0xe0] ss:$16 sps:$4 sm:$0xff]  }
  0x97   : > { %3350 = vmatprep.subr.bf16.mxu1 %v6288_v3  ;;  %v6348_v3 = vld [vmem:[%s7117_s21 + $0xe8] ss:$16 sps:$4 sm:$0xff]  }
  0x98   : > { %2324 = vmatmul.mubr.bf16.vlgmr.msra.gmra.mxu0 %v6277_v4  ;;  %v6349_v4 = vld [vmem:[%s7117_s21 + $0x104] ss:$16 sps:$4 sm:$0xff]  }
  0x99   : > { %2677 = vmatmul.mubr.bf16.vlgmr.msra.gmra.mxu1 %v6280_v5  ;;  %2998 = vmatpush1.bf16.msra.mxu0 %v6283_v6  ;;  %v6445_v5 = vld [vmem:[%s7124_s7 + $0x1c8] ss:$16 sps:$4 sm:$0xff]   ;;  %v6447_v6 = vld [vmem:[%s7124_s7 + $0x1cc] ss:$16 sps:$4 sm:$0xff]  }
  0x9a   : > { %3351 = vmatpush1.bf16.msra.mxu1 %v6286_v7  ;;  %2333 = vmatprep.mubr.bf16.mxu0 %v6289_v8  ;;  %v6448_v7 = vld [vmem:[%s7124_s7 + $0x3c8] ss:$16 sps:$4 sm:$0xff]   ;;  %v6450_v8 = vld [vmem:[%s7124_s7 + $0x3cc] ss:$16 sps:$4 sm:$0xff]  }
  0x9b   : > { %2686 = vmatprep.mubr.bf16.mxu1 %v6291_v9  ;;  %2999 = vmatprep.subr.bf16.mxu0 %v6303_v10  ;;  %v6351_v9 = vld [vmem:[%s7117_s21 + $0x10c] ss:$16 sps:$4 sm:$0xff]   ;;  %v6353_v10 = vld [vmem:[%s7117_s21 + $0x100] ss:$16 sps:$4 sm:$0xff]  }
  0x9c   : > { %3352 = vmatprep.subr.bf16.mxu1 %v6306_v11  ;;  %v6354_v11 = vld [vmem:[%s7117_s21 + $0x108] ss:$16 sps:$4 sm:$0xff]  }
  0x9d   : > { %3000 = vmatpush1.bf16.msra.mxu0 %v6301_v12  ;;  %v6361_v12 = vld [vmem:[%s7117_s21 + $0x124] ss:$16 sps:$4 sm:$0xff]  }
  0x9e   : > { %3353 = vmatpush1.bf16.msra.mxu1 %v6304_v13  ;;  %3001 = vmatprep.subr.bf16.mxu0 %v6321_v14  ;;  %v6463_v13 = vld [vmem:[%s7124_s7 + $0x1a8] ss:$16 sps:$4 sm:$0xff]   ;;  %v6465_v14 = vld [vmem:[%s7124_s7 + $0x1ac] ss:$16 sps:$4 sm:$0xff]  }
  0x9f   : > { %3354 = vmatprep.subr.bf16.mxu1 %v6324_v15  ;;  %v6466_v15 = vld [vmem:[%s7124_s7 + $0x3a8] ss:$16 sps:$4 sm:$0xff]  }
  0xa0   : > { %2334 = vmatmul.mubr.bf16.gmra.mxu0 %v6293_v16  ;;  %v6468_v16 = vld [vmem:[%s7124_s7 + $0x3ac] ss:$16 sps:$4 sm:$0xff]  }
  0xa1   : > { %2687 = vmatmul.mubr.bf16.gmra.mxu1 %v6294_v17  ;;  %2343 = vmatprep.mubr.bf16.mxu0 %v6295_v18  ;;  %v6363_v17 = vld [vmem:[%s7117_s21 + $0x12c] ss:$16 sps:$4 sm:$0xff]   ;;  %v6365_v18 = vld [vmem:[%s7117_s21 + $0x120] ss:$16 sps:$4 sm:$0xff]  }
  0xa2   : > { %2696 = vmatprep.mubr.bf16.mxu1 %v6297_v19  ;;  %3002 = vmatpush1.bf16.msra.mxu0 %v6319_v20  ;;  %v6366_v19 = vld [vmem:[%s7117_s21 + $0x128] ss:$16 sps:$4 sm:$0xff]   ;;  %v6367_v20 = vld [vmem:[%s7117_s21 + $0x144] ss:$16 sps:$4 sm:$0xff]  }
  0xa3   : > { %3355 = vmatpush1.bf16.msra.mxu1 %v6322_v21  ;;  %3003 = vmatprep.subr.bf16.mxu0 %v6339_v22  ;;  %v6481_v21 = vld [vmem:[%s7124_s7 + $0x188] ss:$16 sps:$4 sm:$0xff]   ;;  %v6483_v22 = vld [vmem:[%s7124_s7 + $0x18c] ss:$16 sps:$4 sm:$0xff]  }
  0xa4   : > { %3356 = vmatprep.subr.bf16.mxu1 %v6342_v23  ;;  %v6484_v23 = vld [vmem:[%s7124_s7 + $0x388] ss:$16 sps:$4 sm:$0xff]  }
  0xa6   : > { %3004 = vmatpush1.bf16.msra.mxu0 %v6337_v24  ;;  %v6486_v24 = vld [vmem:[%s7124_s7 + $0x38c] ss:$16 sps:$4 sm:$0xff]  }
  0xa7   : > { %3357 = vmatpush1.bf16.msra.mxu1 %v6340_v27  ;;  %3005 = vmatprep.subr.bf16.mxu0 %v6357_v29  ;;  %v6372_v27 = vld [vmem:[%s7117_s21 + $0x148] ss:$16 sps:$4 sm:$0xff]  }
  0xa8   : > { %3358 = vmatprep.subr.bf16.mxu1 %v6360_v31  ;;  %2344 = vmatmul.mubr.bf16.gmra.mxu0 %v6299_v25  ;;  %v6369_v25 = vld [vmem:[%s7117_s21 + $0x14c] ss:$16 sps:$4 sm:$0xff]   ;;  %v6499_v29 = vld [vmem:[%s7124_s7 + $0x168] ss:$16 sps:$4 sm:$0xff]  }
  0xa9   : > { %2697 = vmatmul.mubr.bf16.gmra.mxu1 %v6300_v26  ;;  %2353 = vmatprep.mubr.bf16.mxu0 %v6307_v28  ;;  %v6371_v26 = vld [vmem:[%s7117_s21 + $0x140] ss:$16 sps:$4 sm:$0xff]   ;;  %v6379_v28 = vld [vmem:[%s7117_s21 + $0x164] ss:$16 sps:$4 sm:$0xff]   ;;  %v6502_v31 = vld [vmem:[%s7124_s7 + $0x368] ss:$16 sps:$4 sm:$0xff]  }
  0xaa   : > { %2706 = vmatprep.mubr.bf16.mxu1 %v6309_v30  ;;  %3006 = vmatpush1.bf16.msra.mxu0 %v6355_v32  ;;  %v6501_v30 = vld [vmem:[%s7124_s7 + $0x16c] ss:$16 sps:$4 sm:$0xff]  }
  0xab   : > { %3359 = vmatpush1.bf16.msra.mxu1 %v6358_v33  ;;  %3007 = vmatprep.subr.bf16.mxu0 %v6375_v38  ;;  %v6504_v32 = vld [vmem:[%s7124_s7 + $0x36c] ss:$16 sps:$4 sm:$0xff]  }
  0xac   : > { %3360 = vmatprep.subr.bf16.mxu1 %v6378_v40  ;;  %v6381_v33 = vld [vmem:[%s7117_s21 + $0x16c] ss:$16 sps:$4 sm:$0xff]  }
  0xad   : > { %v6519_v38 = vld [vmem:[%s7124_s7 + $0x14c] ss:$16 sps:$4 sm:$0xff]  }
  0xae   : > { %3008 = vmatpush1.bf16.msra.mxu0 %v6373_v37  ;;  %v6517_v37 = vld [vmem:[%s7124_s7 + $0x148] ss:$16 sps:$4 sm:$0xff]   ;;  %v6522_v40 = vld [vmem:[%s7124_s7 + $0x34c] ss:$16 sps:$4 sm:$0xff]  }
  0xaf   : > { %3361 = vmatpush1.bf16.msra.mxu1 %v6376_v39  ;;  %3009 = vmatprep.subr.bf16.mxu0 %v6393_v46  ;;  %v6520_v39 = vld [vmem:[%s7124_s7 + $0x348] ss:$16 sps:$4 sm:$0xff]  }
  0xb0   : > { %2354 = vmatmul.mubr.bf16.gmra.mxu0 %v6311_v34  ;;  %3362 = vmatprep.subr.bf16.mxu1 %v6396_v48  ;;  %v6383_v34 = vld [vmem:[%s7117_s21 + $0x160] ss:$16 sps:$4 sm:$0xff]   ;;  %v6535_v46 = vld [vmem:[%s7124_s7 + $0x128] ss:$16 sps:$4 sm:$0xff]  }
  0xb1   : > { %2707 = vmatmul.mubr.bf16.gmra.mxu1 %v6312_v35  ;;  %2363 = vmatprep.mubr.bf16.mxu0 %v6313_v36  ;;  %v6384_v35 = vld [vmem:[%s7117_s21 + $0x168] ss:$16 sps:$4 sm:$0xff]   ;;  %v6385_v36 = vld [vmem:[%s7117_s21 + $0x184] ss:$16 sps:$4 sm:$0xff]  }
  0xb2   : > { %2716 = vmatprep.mubr.bf16.mxu1 %v6315_v41  ;;  %3010 = vmatpush1.bf16.msra.mxu0 %v6391_v45  ;;  %v6387_v41 = vld [vmem:[%s7117_s21 + $0x18c] ss:$16 sps:$4 sm:$0xff]   ;;  %v6538_v48 = vld [vmem:[%s7124_s7 + $0x328] ss:$16 sps:$4 sm:$0xff]  }
  0xb3   : > { %3363 = vmatpush1.bf16.msra.mxu1 %v6394_v47  ;;  %3011 = vmatprep.subr.bf16.mxu0 %v6411_v54  ;;  %v6399_v45 = vld [vmem:[%s7117_s21 + $0x1ac] ss:$16 sps:$4 sm:$0xff]   ;;  %v6407_v54 = vld [vmem:[%s7117_s21 + $0x1c0] ss:$16 sps:$4 sm:$0xff]  }
  0xb4   : > { %3364 = vmatprep.subr.bf16.mxu1 %v6414_v56  ;;  %v6537_v47 = vld [vmem:[%s7124_s7 + $0x12c] ss:$16 sps:$4 sm:$0xff]   ;;  %v6415_v56 = vld [vmem:[%s7117_s21 + $0x1e4] ss:$16 sps:$4 sm:$0xff]  }
  0xb6   : > { %3012 = vmatpush1.bf16.msra.mxu0 %v6409_v53  ;;  %v6405_v53 = vld [vmem:[%s7117_s21 + $0x1cc] ss:$16 sps:$4 sm:$0xff]  }
  0xb7   : > { %3365 = vmatpush1.bf16.msra.mxu1 %v6412_v55  ;;  %3013 = vmatprep.subr.bf16.mxu0 %v6429_v62  ;;  %v6408_v55 = vld [vmem:[%s7117_s21 + $0x1c8] ss:$16 sps:$4 sm:$0xff]  }
  0xb8   : > { %2364 = vmatmul.mubr.bf16.gmra.mxu0 %v6317_v42  ;;  %3366 = vmatprep.subr.bf16.mxu1 %v6432_v0  ;;  %v6389_v42 = vld [vmem:[%s7117_s21 + $0x180] ss:$16 sps:$4 sm:$0xff]   ;;  %v6420_v62 = vld [vmem:[%s7117_s21 + $0x1e8] ss:$16 sps:$4 sm:$0xff]   ;;  %v6421_v0 = vld [vmem:[%s7117_s21 + $0x204] ss:$16 sps:$4 sm:$0xff]  }
  0xb9   : > { %2717 = vmatmul.mubr.bf16.gmra.mxu1 %v6318_v43  ;;  %2373 = vmatprep.mubr.bf16.mxu0 %v6325_v44  ;;  %v6390_v43 = vld [vmem:[%s7117_s21 + $0x188] ss:$16 sps:$4 sm:$0xff]   ;;  %v6397_v44 = vld [vmem:[%s7117_s21 + $0x1a4] ss:$16 sps:$4 sm:$0xff]  }
  0xba   : > { %2726 = vmatprep.mubr.bf16.mxu1 %v6327_v49  ;;  %3014 = vmatpush2.bf16.msra.mxu0 %v6427_v61  ;;  %v6401_v49 = vld [vmem:[%s7117_s21 + $0x1a0] ss:$16 sps:$4 sm:$0xff]  }
  0xbb   : > { %3367 = vmatpush2.bf16.msra.mxu1 %v6430_v63  ;;  %3015 = vmatprep.subr.bf16.mxu0 %v6447_v6  ;;  %v6419_v61 = vld [vmem:[%s7117_s21 + $0x1e0] ss:$16 sps:$4 sm:$0xff]   ;;  %v6558_v63 = vld [vmem:[%s7124_s7 + $0x30c] ss:$16 sps:$4 sm:$0xff]  }
  0xbc   : > { %3368 = vmatprep.subr.bf16.mxu1 %v6450_v8  ;;  %v6437_v6 = vld [vmem:[%s7117_s21 + $0x220] ss:$16 sps:$4 sm:$0xff]   ;;  %v6439_v8 = vld [vmem:[%s7117_s21 + $0x244] ss:$16 sps:$4 sm:$0xff]  }
  0xbe   : > { %3016 = vmatpush2.bf16.msra.mxu0 %v6445_v5  ;;  %v6435_v5 = vld [vmem:[%s7117_s21 + $0x22c] ss:$16 sps:$4 sm:$0xff]  }
  0xbf   : > { %3369 = vmatpush2.bf16.msra.mxu1 %v6448_v7  ;;  %3017 = vmatprep.subr.bf16.mxu0 %v6465_v14  ;;  %v6438_v7 = vld [vmem:[%s7117_s21 + $0x228] ss:$16 sps:$4 sm:$0xff]   ;;  %v6455_v14 = vld [vmem:[%s7117_s21 + $0x260] ss:$16 sps:$4 sm:$0xff]  }
  0xc0   : > { %2374 = vmatmul.mubr.bf16.gmra.mxu0 %v6329_v50  ;;  %3370 = vmatprep.subr.bf16.mxu1 %v6468_v16  ;;  %v6402_v50 = vld [vmem:[%s7117_s21 + $0x1a8] ss:$16 sps:$4 sm:$0xff]   ;;  %v6457_v16 = vld [vmem:[%s7117_s21 + $0x284] ss:$16 sps:$4 sm:$0xff]  }
  0xc1   : > { %2727 = vmatmul.mubr.bf16.gmra.mxu1 %v6330_v51  ;;  %2383 = vmatprep.mubr.bf16.mxu0 %v6331_v52  ;;  %v6540_v51 = vld [vmem:[%s7124_s7 + $0x32c] ss:$16 sps:$4 sm:$0xff]   ;;  %v6403_v52 = vld [vmem:[%s7117_s21 + $0x1c4] ss:$16 sps:$4 sm:$0xff]  }
  0xc2   : > { %2736 = vmatprep.mubr.bf16.mxu1 %v6333_v57  ;;  %3018 = vmatpush2.bf16.msra.mxu0 %v6463_v13  ;;  %v6417_v57 = vld [vmem:[%s7117_s21 + $0x1ec] ss:$16 sps:$4 sm:$0xff]  }
  0xc3   : > { %3371 = vmatpush2.bf16.msra.mxu1 %v6466_v15  ;;  %3019 = vmatprep.subr.bf16.mxu0 %v6483_v22  ;;  %v6453_v13 = vld [vmem:[%s7117_s21 + $0x26c] ss:$16 sps:$4 sm:$0xff]   ;;  %v6456_v15 = vld [vmem:[%s7117_s21 + $0x268] ss:$16 sps:$4 sm:$0xff]   ;;  %v6473_v22 = vld [vmem:[%s7117_s21 + $0x2a0] ss:$16 sps:$4 sm:$0xff]  }
  0xc4   : > { %3372 = vmatprep.subr.bf16.mxu1 %v6486_v24  ;;  %v6475_v24 = vld [vmem:[%s7117_s21 + $0x2c4] ss:$16 sps:$4 sm:$0xff]  }
  0xc6   : > { %3020 = vmatpush2.bf16.msra.mxu0 %v6481_v21  ;;  %v6471_v21 = vld [vmem:[%s7117_s21 + $0x2ac] ss:$16 sps:$4 sm:$0xff]  }
  0xc7   : > { %3373 = vmatpush2.bf16.msra.mxu1 %v6484_v23  ;;  %3021 = vmatprep.subr.bf16.mxu0 %v6501_v30  ;;  %v6474_v23 = vld [vmem:[%s7117_s21 + $0x2a8] ss:$16 sps:$4 sm:$0xff]   ;;  %v6491_v30 = vld [vmem:[%s7117_s21 + $0x2e0] ss:$16 sps:$4 sm:$0xff]  }
  0xc8   : > { %2384 = vmatmul.mubr.bf16.gmra.mxu0 %v6335_v58  ;;  %3374 = vmatprep.subr.bf16.mxu1 %v6504_v32  ;;  %v6553_v58 = vld [vmem:[%s7124_s7 + $0x108] ss:$16 sps:$4 sm:$0xff]   ;;  %v6493_v32 = vld [vmem:[%s7117_s21 + $0x304] ss:$16 sps:$4 sm:$0xff]  }
  0xc9   : > { %2737 = vmatmul.mubr.bf16.gmra.mxu1 %v6336_v59  ;;  %2393 = vmatprep.mubr.bf16.mxu0 %v6343_v60  ;;  %v6555_v59 = vld [vmem:[%s7124_s7 + $0x10c] ss:$16 sps:$4 sm:$0xff]   ;;  %v6556_v60 = vld [vmem:[%s7124_s7 + $0x308] ss:$16 sps:$4 sm:$0xff]   ;;  %s6753_s7 = sshll.u32 %s6904_s15, 4  ;;  %s6754_s7 = int_to_ptr.vmem [resolvable:$false] %s6753_s7 }
  0xca   : > { %2746 = vmatprep.mubr.bf16.mxu1 %v6345_v1  ;;  %3022 = vmatpush2.bf16.msra.mxu0 %v6499_v29  ;;  %v6423_v1 = vld [vmem:[%s7117_s21 + $0x20c] ss:$16 sps:$4 sm:$0xff]   ;;  %s6755_s24 = scalar_lea.vmem %s6754_s7, 32768  ;;  %p6756_p9 = scmp.lt.s32.totalorder %s7654_s23, %s6754_s7 }
  0xcb   : > { %3375 = vmatpush2.bf16.msra.mxu1 %v6502_v31  ;;  %3023 = vmatprep.subr.bf16.mxu0 %v6519_v38  ;;  %v6489_v29 = vld [vmem:[%s7117_s21 + $0x2ec] ss:$16 sps:$4 sm:$0xff]   ;;  %v6492_v31 = vld [vmem:[%s7117_s21 + $0x2e8] ss:$16 sps:$4 sm:$0xff]   ;;  %p6757_p1 = scmp.lt.s32.totalorder %s6755_s24, %s6749_s5 }
  0xcc   : > { %3376 = vmatprep.subr.bf16.mxu1 %v6522_v40 }
  0xcd   : > { %p6758_p2 = por %p6757_p1, %p6756_p9 }
  0xce   : > { %3024 = vmatpush2.bf16.msra.mxu0 %v6517_v37  ;;  %v6507_v37 = vld [vmem:[%s7117_s21 + $0x32c] ss:$16 sps:$4 sm:$0xff]  }
  0xcf   : > { %3377 = vmatpush2.bf16.msra.mxu1 %v6520_v39  ;;  %3025 = vmatprep.subr.bf16.mxu0 %v6537_v47  ;;  %v6510_v47 = vld [vmem:[%s7117_s21 + $0x328] ss:$16 sps:$4 sm:$0xff]   ;;  %p6759_p4 = pnand %p6758_p2, %p6752_p8 }
  0xd0   : > { %2394 = vmatmul.mubr.bf16.gmra.mxu0 %v6347_v2  ;;  %3378 = vmatprep.subr.bf16.mxu1 %v6540_v51  ;;  %v6425_v2 = vld [vmem:[%s7117_s21 + $0x200] ss:$16 sps:$4 sm:$0xff]  }
  0xd1   : > { %2747 = vmatmul.mubr.bf16.gmra.mxu1 %v6348_v3  ;;  %2403 = vmatprep.mubr.bf16.mxu0 %v6349_v4  ;;  %v6426_v3 = vld [vmem:[%s7117_s21 + $0x208] ss:$16 sps:$4 sm:$0xff]   ;;  %v6433_v4 = vld [vmem:[%s7117_s21 + $0x224] ss:$16 sps:$4 sm:$0xff]  }
  0xd2   : > { %2756 = vmatprep.mubr.bf16.mxu1 %v6351_v9  ;;  %3026 = vmatpush2.bf16.msra.mxu0 %v6535_v46  ;;  %v6441_v9 = vld [vmem:[%s7117_s21 + $0x24c] ss:$16 sps:$4 sm:$0xff]   ;;  %v6509_v46 = vld [vmem:[%s7117_s21 + $0x320] ss:$16 sps:$4 sm:$0xff]  }
  0xd3   : > { %3379 = vmatpush2.bf16.msra.mxu1 %v6538_v48  ;;  %3027 = vmatprep.subr.bf16.mxu0 %v6555_v59 }
  0xd4   : > { %3380 = vmatprep.subr.bf16.mxu1 %v6558_v63 }
  0xd6   : > { %3028 = vmatpush2.bf16.msra.mxu0 %v6553_v58 }
  0xd7   : > { %3381 = vmatpush2.bf16.msra.mxu1 %v6556_v60 }
  0xd8   : > { %2404 = vmatmul.mubr.bf16.gmra.mxu0 %v6353_v10  ;;  %v6443_v10 = vld [vmem:[%s7117_s21 + $0x240] ss:$16 sps:$4 sm:$0xff]  }
  0xd9   : > { %2757 = vmatmul.mubr.bf16.gmra.mxu1 %v6354_v11  ;;  %2413 = vmatprep.mubr.bf16.mxu0 %v6361_v12  ;;  %v6444_v11 = vld [vmem:[%s7117_s21 + $0x248] ss:$16 sps:$4 sm:$0xff]   ;;  %v6451_v12 = vld [vmem:[%s7117_s21 + $0x264] ss:$16 sps:$4 sm:$0xff]  }
  0xda   : > { %2766 = vmatprep.mubr.bf16.mxu1 %v6363_v17  ;;  %v6459_v17 = vld [vmem:[%s7117_s21 + $0x28c] ss:$16 sps:$4 sm:$0xff]  }
  0xe0   : > { %2414 = vmatmul.mubr.bf16.gmra.mxu0 %v6365_v18  ;;  %v6461_v18 = vld [vmem:[%s7117_s21 + $0x280] ss:$16 sps:$4 sm:$0xff]  }
  0xe1   : > { %2767 = vmatmul.mubr.bf16.gmra.mxu1 %v6366_v19  ;;  %2423 = vmatprep.mubr.bf16.mxu0 %v6367_v20  ;;  %v6462_v19 = vld [vmem:[%s7117_s21 + $0x288] ss:$16 sps:$4 sm:$0xff]   ;;  %v6469_v20 = vld [vmem:[%s7117_s21 + $0x2a4] ss:$16 sps:$4 sm:$0xff]  }
  0xe2   : > { %2776 = vmatprep.mubr.bf16.mxu1 %v6369_v25  ;;  %v6477_v25 = vld [vmem:[%s7117_s21 + $0x2cc] ss:$16 sps:$4 sm:$0xff]  }
  0xe8   : > { %2424 = vmatmul.mubr.bf16.gmra.mxu0 %v6371_v26  ;;  %v6479_v26 = vld [vmem:[%s7117_s21 + $0x2c0] ss:$16 sps:$4 sm:$0xff]  }
  0xe9   : > { %2777 = vmatmul.mubr.bf16.gmra.mxu1 %v6372_v27  ;;  %2433 = vmatprep.mubr.bf16.mxu0 %v6379_v28  ;;  %v6480_v27 = vld [vmem:[%s7117_s21 + $0x2c8] ss:$16 sps:$4 sm:$0xff]   ;;  %v6487_v28 = vld [vmem:[%s7117_s21 + $0x2e4] ss:$16 sps:$4 sm:$0xff]  }
  0xea   : > { %2786 = vmatprep.mubr.bf16.mxu1 %v6381_v33  ;;  %v6495_v33 = vld [vmem:[%s7117_s21 + $0x30c] ss:$16 sps:$4 sm:$0xff]  }
  0xf0   : > { %2434 = vmatmul.mubr.bf16.gmra.mxu0 %v6383_v34  ;;  %v6497_v34 = vld [vmem:[%s7117_s21 + $0x300] ss:$16 sps:$4 sm:$0xff]  }
  0xf1   : > { %2787 = vmatmul.mubr.bf16.gmra.mxu1 %v6384_v35  ;;  %2443 = vmatprep.mubr.bf16.mxu0 %v6385_v36  ;;  %v6498_v35 = vld [vmem:[%s7117_s21 + $0x308] ss:$16 sps:$4 sm:$0xff]   ;;  %v6505_v36 = vld [vmem:[%s7117_s21 + $0x324] ss:$16 sps:$4 sm:$0xff]  }
  0xf2   : > { %2796 = vmatprep.mubr.bf16.mxu1 %v6387_v41 }
  0xf8   : > { %2444 = vmatmul.mubr.bf16.gmra.mxu0 %v6389_v42 }
  0xf9   : > { %2797 = vmatmul.mubr.bf16.gmra.mxu1 %v6390_v43  ;;  %2453 = vmatprep.mubr.bf16.mxu0 %v6397_v44 }
  0xfa   : > { %2806 = vmatprep.mubr.bf16.mxu1 %v6399_v45 }
 0x100   : > { %2454 = vmatmul.mubr.bf16.gmra.mxu0 %v6401_v49  ;;  %v6511_v49 = vld [vmem:[%s7117_s21 + $0x344] ss:$16 sps:$4 sm:$0xff]  }
 0x101   : > { %2807 = vmatmul.mubr.bf16.gmra.mxu1 %v6402_v50  ;;  %2463 = vmatprep.mubr.bf16.mxu0 %v6403_v52  ;;  %v6513_v50 = vld [vmem:[%s7117_s21 + $0x34c] ss:$16 sps:$4 sm:$0xff]  }
 0x102   : > { %2816 = vmatprep.mubr.bf16.mxu1 %v6405_v53 }
 0x108   : > { %2464 = vmatmul.mubr.bf16.gmra.mxu0 %v6407_v54 }
 0x109   : > { %2817 = vmatmul.mubr.bf16.gmra.mxu1 %v6408_v55  ;;  %2473 = vmatprep.mubr.bf16.mxu0 %v6415_v56 }
 0x10a   : > { %2826 = vmatprep.mubr.bf16.mxu1 %v6417_v57 }
 0x110   : > { %2474 = vmatmul.mubr.bf16.gmra.mxu0 %v6419_v61 }
 0x111   : > { %2827 = vmatmul.mubr.bf16.gmra.mxu1 %v6420_v62  ;;  %2483 = vmatprep.mubr.bf16.mxu0 %v6421_v0  ;;  %v6515_v0 = vld [vmem:[%s7117_s21 + $0x340] ss:$16 sps:$4 sm:$0xff]  }
 0x112   : > { %2836 = vmatprep.mubr.bf16.mxu1 %v6423_v1  ;;  %v6516_v1 = vld [vmem:[%s7117_s21 + $0x348] ss:$16 sps:$4 sm:$0xff]  }
 0x118   : > { %2484 = vmatmul.mubr.bf16.gmra.mxu0 %v6425_v2 }
 0x119   : > { %2837 = vmatmul.mubr.bf16.gmra.mxu1 %v6426_v3  ;;  %2493 = vmatprep.mubr.bf16.mxu0 %v6433_v4  ;;  %v6523_v3 = vld [vmem:[%s7117_s21 + $0x364] ss:$16 sps:$4 sm:$0xff]   ;;  %v6525_v4 = vld [vmem:[%s7117_s21 + $0x36c] ss:$16 sps:$4 sm:$0xff]  }
 0x11a   : > { %2846 = vmatprep.mubr.bf16.mxu1 %v6435_v5 }
 0x120   : > { %2494 = vmatmul.mubr.bf16.gmra.mxu0 %v6437_v6 }
 0x121   : > { %2847 = vmatmul.mubr.bf16.gmra.mxu1 %v6438_v7  ;;  %2503 = vmatprep.mubr.bf16.mxu0 %v6439_v8 }
 0x122   : > { %2856 = vmatprep.mubr.bf16.mxu1 %v6441_v9 }
 0x128   : > { %2504 = vmatmul.mubr.bf16.gmra.mxu0 %v6443_v10 }
 0x129   : > { %2857 = vmatmul.mubr.bf16.gmra.mxu1 %v6444_v11  ;;  %2513 = vmatprep.mubr.bf16.mxu0 %v6451_v12 }
 0x12a   : > { %2866 = vmatprep.mubr.bf16.mxu1 %v6453_v13 }
 0x130   : > { %2514 = vmatmul.mubr.bf16.gmra.mxu0 %v6455_v14 }
 0x131   : > { %2867 = vmatmul.mubr.bf16.gmra.mxu1 %v6456_v15  ;;  %2523 = vmatprep.mubr.bf16.mxu0 %v6457_v16 }
 0x132   : > { %2876 = vmatprep.mubr.bf16.mxu1 %v6459_v17 }
 0x138   : > { %2524 = vmatmul.mubr.bf16.gmra.mxu0 %v6461_v18  ;;  %v6527_v18 = vld [vmem:[%s7117_s21 + $0x360] ss:$16 sps:$4 sm:$0xff]  }
 0x139   : > { %2877 = vmatmul.mubr.bf16.gmra.mxu1 %v6462_v19  ;;  %2533 = vmatprep.mubr.bf16.mxu0 %v6469_v20  ;;  %v6528_v19 = vld [vmem:[%s7117_s21 + $0x368] ss:$16 sps:$4 sm:$0xff]  }
 0x13a   : > { %2886 = vmatprep.mubr.bf16.mxu1 %v6471_v21  ;;  %v6531_v21 = vld [vmem:[%s7117_s21 + $0x384] ss:$16 sps:$4 sm:$0xff]  }
 0x140   : > { %2534 = vmatmul.mubr.bf16.gmra.mxu0 %v6473_v22  ;;  %v6534_v22 = vld [vmem:[%s7117_s21 + $0x38c] ss:$16 sps:$4 sm:$0xff]  }
 0x141   : > { %2887 = vmatmul.mubr.bf16.gmra.mxu1 %v6474_v23  ;;  %2543 = vmatprep.mubr.bf16.mxu0 %v6475_v24 }
 0x142   : > { %2896 = vmatprep.mubr.bf16.mxu1 %v6477_v25 }
 0x148   : > { %2544 = vmatmul.mubr.bf16.gmra.mxu0 %v6479_v26 }
 0x149   : > { %2897 = vmatmul.mubr.bf16.gmra.mxu1 %v6480_v27  ;;  %2553 = vmatprep.mubr.bf16.mxu0 %v6487_v28 }
 0x14a   : > { %2906 = vmatprep.mubr.bf16.mxu1 %v6489_v29 }
 0x150   : > { %2554 = vmatmul.mubr.bf16.gmra.mxu0 %v6491_v30 }
 0x151   : > { %2907 = vmatmul.mubr.bf16.gmra.mxu1 %v6492_v31  ;;  %2563 = vmatprep.mubr.bf16.mxu0 %v6493_v32 }
 0x152   : > { %2916 = vmatprep.mubr.bf16.mxu1 %v6495_v33 }
 0x158   : > { %v2325_v38 = vpop.f32.mrf.mxu0  ;;  %2564 = vmatmul.mubr.bf16.gmra.mxu0 %v6497_v34 }
 0x159   : > { %v2678_v39 = vpop.f32.mrf.mxu1  ;;  %2917 = vmatmul.mubr.bf16.gmra.mxu1 %v6498_v35  ;;  %2573 = vmatprep.mubr.bf16.mxu0 %v6505_v36  ;;  %v6529_v36 = vld [vmem:[%s7117_s21 + $0x380] ss:$16 sps:$4 sm:$0xff]  }
 0x15a   : > { %2926 = vmatprep.mubr.bf16.mxu1 %v6507_v37  ;;  %v2327_v40 = vpop.f32.mrf.mxu0  ;;  %v2679_v42 = vadd.f32 %v2678_v39, %v2325_v38  ;;  %v6532_v37 = vld [vmem:[%s7117_s21 + $0x388] ss:$16 sps:$4 sm:$0xff]   ;;  %v6543_v39 = vld [vmem:[%s7117_s21 + $0x3a4] ss:$16 sps:$4 sm:$0xff]  }
 0x15b   : > { %v2680_v41 = vpop.f32.mrf.mxu1 }
 0x15c   : > { %v2681_v43 = vadd.f32 %v2680_v41, %v2327_v40  ;;  %v2329_v44 = vpop.f32.mrf.mxu0  ;;  %v6546_v40 = vld [vmem:[%s7117_s21 + $0x3ac] ss:$16 sps:$4 sm:$0xff]  }
 0x15d   : > { %v2682_v45 = vpop.f32.mrf.mxu1 }
 0x15e   : > { %v5915_v48 = vpack.c.bf16 %v2681_v43, %v2679_v42  ;;  %v2331_v51 = vpop.f32.mrf.mxu0  ;;  %v2683_v53 = vadd.f32 %v2682_v45, %v2329_v44 }
 0x15f   : > { %v2684_v52 = vpop.f32.mrf.mxu1 }
 0x160   : > { %5242 = vst [vmem:[%s7367_s12] sm:$0xff] %v5915_v48  ;;  %v2685_v54 = vadd.f32 %v2684_v52, %v2331_v51  ;;  %v2335_v55 = vpop.f32.mrf.mxu0  ;;  %2574 = vmatmul.mubr.bf16.gmra.mxu0 %v6509_v46 }
 0x161   : > { %v2688_v56 = vpop.f32.mrf.mxu1  ;;  %2927 = vmatmul.mubr.bf16.gmra.mxu1 %v6510_v47  ;;  %2583 = vmatprep.mubr.bf16.mxu0 %v6511_v49 }
 0x162   : > { %v5917_v57 = vpack.c.bf16 %v2685_v54, %v2683_v53  ;;  %2936 = vmatprep.mubr.bf16.mxu1 %v6513_v50  ;;  %v2337_v58 = vpop.f32.mrf.mxu0  ;;  %v2689_v60 = vadd.f32 %v2688_v56, %v2335_v55  ;;  %v6541_v54 = vld [vmem:[%s7117_s21 + $0x3a0] ss:$16 sps:$4 sm:$0xff]   ;;  %v6544_v55 = vld [vmem:[%s7117_s21 + $0x3a8] ss:$16 sps:$4 sm:$0xff]  }
 0x163   : > { %v2690_v59 = vpop.f32.mrf.mxu1 }
 0x164   : > { %5244 = vst [vmem:[%s7367_s12 + $0x10] sm:$0xff] %v5917_v57  ;;  %v2691_v61 = vadd.f32 %v2690_v59, %v2337_v58  ;;  %v2339_v62 = vpop.f32.mrf.mxu0  ;;  %v6549_v57 = vld [vmem:[%s7117_s21 + $0x3c4] ss:$16 sps:$4 sm:$0xff]   ;;  %v6552_v58 = vld [vmem:[%s7117_s21 + $0x3cc] ss:$16 sps:$4 sm:$0xff]  }
 0x165   : > { %v2692_v63 = vpop.f32.mrf.mxu1 }
 0x166   : > { %v5919_v2 = vpack.c.bf16 %v2691_v61, %v2689_v60  ;;  %v2341_v5 = vpop.f32.mrf.mxu0  ;;  %v2693_v7 = vadd.f32 %v2692_v63, %v2339_v62 }
 0x167   : > { %v2694_v6 = vpop.f32.mrf.mxu1 }
 0x168   : > { %5246 = vst [vmem:[%s7367_s12 + $0x20] sm:$0xff] %v5919_v2  ;;  %v2695_v8 = vadd.f32 %v2694_v6, %v2341_v5  ;;  %v2345_v9 = vpop.f32.mrf.mxu0  ;;  %2584 = vmatmul.mubr.bf16.gmra.mxu0 %v6515_v0 }
 0x169   : > { %v2698_v10 = vpop.f32.mrf.mxu1  ;;  %2937 = vmatmul.mubr.bf16.gmra.mxu1 %v6516_v1  ;;  %2593 = vmatprep.mubr.bf16.mxu0 %v6523_v3 }
 0x16a   : > { %v5921_v11 = vpack.c.bf16 %v2695_v8, %v2693_v7  ;;  %2946 = vmatprep.mubr.bf16.mxu1 %v6525_v4  ;;  %v2347_v12 = vpop.f32.mrf.mxu0  ;;  %v2699_v14 = vadd.f32 %v2698_v10, %v2345_v9  ;;  %v6547_v8 = vld [vmem:[%s7117_s21 + $0x3c0] ss:$16 sps:$4 sm:$0xff]   ;;  %v6550_v9 = vld [vmem:[%s7117_s21 + $0x3c8] ss:$16 sps:$4 sm:$0xff]  }
 0x16b   : > { %v2700_v13 = vpop.f32.mrf.mxu1 }
 0x16c   : > { %5248 = vst [vmem:[%s7367_s12 + $0x30] sm:$0xff] %v5921_v11  ;;  %v2701_v15 = vadd.f32 %v2700_v13, %v2347_v12  ;;  %v2349_v16 = vpop.f32.mrf.mxu0  ;;  %v6561_v11 = vld [vmem:[%s7117_s21 + $0x3e4] ss:$16 sps:$4 sm:$0xff]   ;;  %v6564_v12 = vld [vmem:[%s7117_s21 + $0x3ec] ss:$16 sps:$4 sm:$0xff]  }
 0x16d   : > { %v2702_v17 = vpop.f32.mrf.mxu1 }
 0x16e   : > { %v5923_v20 = vpack.c.bf16 %v2701_v15, %v2699_v14  ;;  %v2351_v23 = vpop.f32.mrf.mxu0  ;;  %v2703_v25 = vadd.f32 %v2702_v17, %v2349_v16 }
 0x16f   : > { %v2704_v24 = vpop.f32.mrf.mxu1 }
 0x170   : > { %5250 = vst [vmem:[%s7367_s12 + $0x40] sm:$0xff] %v5923_v20  ;;  %v2705_v26 = vadd.f32 %v2704_v24, %v2351_v23  ;;  %v2355_v27 = vpop.f32.mrf.mxu0  ;;  %2594 = vmatmul.mubr.bf16.gmra.mxu0 %v6527_v18 }
 0x171   : > { %v2708_v28 = vpop.f32.mrf.mxu1  ;;  %2947 = vmatmul.mubr.bf16.gmra.mxu1 %v6528_v19  ;;  %2603 = vmatprep.mubr.bf16.mxu0 %v6531_v21 }
 0x172   : > { %v5925_v29 = vpack.c.bf16 %v2705_v26, %v2703_v25  ;;  %2956 = vmatprep.mubr.bf16.mxu1 %v6534_v22  ;;  %v2357_v30 = vpop.f32.mrf.mxu0  ;;  %v2709_v32 = vadd.f32 %v2708_v28, %v2355_v27  ;;  %v6559_v26 = vld [vmem:[%s7117_s21 + $0x3e0] ss:$16 sps:$4 sm:$0xff]   ;;  %v6562_v27 = vld [vmem:[%s7117_s21 + $0x3e8] ss:$16 sps:$4 sm:$0xff]  }
 0x173   : > { %v2710_v31 = vpop.f32.mrf.mxu1 }
 0x174   : > { %5252 = vst [vmem:[%s7367_s12 + $0x50] sm:$0xff] %v5925_v29  ;;  %v2711_v33 = vadd.f32 %v2710_v31, %v2357_v30  ;;  %v2359_v34 = vpop.f32.mrf.mxu0 }
 0x175   : > { %v2712_v35 = vpop.f32.mrf.mxu1 }
 0x176   : > { %v5927_v38 = vpack.c.bf16 %v2711_v33, %v2709_v32  ;;  %v2361_v41 = vpop.f32.mrf.mxu0  ;;  %v2713_v43 = vadd.f32 %v2712_v35, %v2359_v34 }
 0x177   : > { %v2714_v42 = vpop.f32.mrf.mxu1 }
 0x178   : > { %5254 = vst [vmem:[%s7367_s12 + $0x60] sm:$0xff] %v5927_v38  ;;  %v2715_v44 = vadd.f32 %v2714_v42, %v2361_v41  ;;  %v2365_v45 = vpop.f32.mrf.mxu0  ;;  %2604 = vmatmul.mubr.bf16.gmra.mxu0 %v6529_v36  ;;  %v6565_v36 = vld [vmem:[%s7117_s21 + $0x4] ss:$16 sps:$4 sm:$0xff]  }
 0x179   : > { %v2718_v46 = vpop.f32.mrf.mxu1  ;;  %2957 = vmatmul.mubr.bf16.gmra.mxu1 %v6532_v37  ;;  %2613 = vmatprep.mubr.bf16.mxu0 %v6543_v39  ;;  %v6566_v37 = vld [vmem:[%s7117_s21 + $0xc] ss:$16 sps:$4 sm:$0xff]  }
 0x17a   : > { %v5929_v47 = vpack.c.bf16 %v2715_v44, %v2713_v43  ;;  %2966 = vmatprep.mubr.bf16.mxu1 %v6546_v40  ;;  %v2367_v48 = vpop.f32.mrf.mxu0  ;;  %v2719_v50 = vadd.f32 %v2718_v46, %v2365_v45 }
 0x17b   : > { %v2720_v49 = vpop.f32.mrf.mxu1 }
 0x17c   : > { %5256 = vst [vmem:[%s7367_s12 + $0x70] sm:$0xff] %v5929_v47  ;;  %v2721_v51 = vadd.f32 %v2720_v49, %v2367_v48  ;;  %v2369_v52 = vpop.f32.mrf.mxu0 }
 0x17d   : > { %v2722_v53 = vpop.f32.mrf.mxu1 }
 0x17e   : > { %v5931_v56 = vpack.c.bf16 %v2721_v51, %v2719_v50  ;;  %v2371_v59 = vpop.f32.mrf.mxu0  ;;  %v2723_v61 = vadd.f32 %v2722_v53, %v2369_v52  ;;  %v6567_v51 = vld [vmem:[%s7117_s21] ss:$16 sps:$4 sm:$0xff]   ;;  %v6568_v52 = vld [vmem:[%s7117_s21 + $0x8] ss:$16 sps:$4 sm:$0xff]  }
 0x17f   : > { %v2724_v60 = vpop.f32.mrf.mxu1 }
 0x180   : > { %5258 = vst [vmem:[%s7367_s12 + $0x80] sm:$0xff] %v5931_v56  ;;  %v2725_v62 = vadd.f32 %v2724_v60, %v2371_v59  ;;  %v2375_v63 = vpop.f32.mrf.mxu0  ;;  %2614 = vmatmul.mubr.bf16.gmra.mxu0 %v6541_v54  ;;  %v6569_v54 = vld [vmem:[%s7117_s21 + $0x24] ss:$16 sps:$4 sm:$0xff]  }
 0x181   : > { %v2728_v0 = vpop.f32.mrf.mxu1  ;;  %2967 = vmatmul.mubr.bf16.gmra.mxu1 %v6544_v55  ;;  %2623 = vmatprep.mubr.bf16.mxu0 %v6549_v57  ;;  %v6570_v55 = vld [vmem:[%s7117_s21 + $0x2c] ss:$16 sps:$4 sm:$0xff]  }
 0x182   : > { %v5933_v1 = vpack.c.bf16 %v2725_v62, %v2723_v61  ;;  %2976 = vmatprep.mubr.bf16.mxu1 %v6552_v58  ;;  %v2377_v2 = vpop.f32.mrf.mxu0  ;;  %v2729_v4 = vadd.f32 %v2728_v0, %v2375_v63 }
 0x183   : > { %v2730_v3 = vpop.f32.mrf.mxu1 }
 0x184   : > { %5260 = vst [vmem:[%s7367_s12 + $0x90] sm:$0xff] %v5933_v1  ;;  %v2731_v5 = vadd.f32 %v2730_v3, %v2377_v2  ;;  %v2379_v6 = vpop.f32.mrf.mxu0 }
 0x185   : > { %v2732_v7 = vpop.f32.mrf.mxu1 }
 0x186   : > { %v5935_v10 = vpack.c.bf16 %v2731_v5, %v2729_v4  ;;  %v2381_v13 = vpop.f32.mrf.mxu0  ;;  %v2733_v15 = vadd.f32 %v2732_v7, %v2379_v6  ;;  %v6571_v5 = vld [vmem:[%s7117_s21 + $0x20] ss:$16 sps:$4 sm:$0xff]   ;;  %v6572_v6 = vld [vmem:[%s7117_s21 + $0x28] ss:$16 sps:$4 sm:$0xff]  }
 0x187   : > { %v2734_v14 = vpop.f32.mrf.mxu1 }
 0x188   : > { %5262 = vst [vmem:[%s7367_s12 + $0xa0] sm:$0xff] %v5935_v10  ;;  %v2735_v16 = vadd.f32 %v2734_v14, %v2381_v13  ;;  %v2385_v17 = vpop.f32.mrf.mxu0  ;;  %2624 = vmatmul.mubr.bf16.gmra.mxu0 %v6547_v8  ;;  %v6573_v8 = vld [vmem:[%s7117_s21 + $0x44] ss:$16 sps:$4 sm:$0xff]  }
 0x189   : > { %v2738_v18 = vpop.f32.mrf.mxu1  ;;  %2977 = vmatmul.mubr.bf16.gmra.mxu1 %v6550_v9  ;;  %2633 = vmatprep.mubr.bf16.mxu0 %v6561_v11  ;;  %v6574_v9 = vld [vmem:[%s7117_s21 + $0x4c] ss:$16 sps:$4 sm:$0xff]  }
 0x18a   : > { %v5937_v19 = vpack.c.bf16 %v2735_v16, %v2733_v15  ;;  %2986 = vmatprep.mubr.bf16.mxu1 %v6564_v12  ;;  %v2387_v20 = vpop.f32.mrf.mxu0  ;;  %v2739_v22 = vadd.f32 %v2738_v18, %v2385_v17 }
 0x18b   : > { %v2740_v21 = vpop.f32.mrf.mxu1 }
 0x18c   : > { %5264 = vst [vmem:[%s7367_s12 + $0xb0] sm:$0xff] %v5937_v19  ;;  %v2741_v23 = vadd.f32 %v2740_v21, %v2387_v20  ;;  %v2389_v24 = vpop.f32.mrf.mxu0 }
 0x18d   : > { %v2742_v25 = vpop.f32.mrf.mxu1 }
 0x18e   : > { %v5939_v28 = vpack.c.bf16 %v2741_v23, %v2739_v22  ;;  %v2391_v29 = vpop.f32.mrf.mxu0  ;;  %v2743_v31 = vadd.f32 %v2742_v25, %v2389_v24  ;;  %v6575_v23 = vld [vmem:[%s7117_s21 + $0x40] ss:$16 sps:$4 sm:$0xff]   ;;  %v6576_v24 = vld [vmem:[%s7117_s21 + $0x48] ss:$16 sps:$4 sm:$0xff]  }
 0x18f   : > { %v2744_v30 = vpop.f32.mrf.mxu1 }
 0x190   : > { %5266 = vst [vmem:[%s7367_s12 + $0xc0] sm:$0xff] %v5939_v28  ;;  %v2745_v32 = vadd.f32 %v2744_v30, %v2391_v29  ;;  %v2395_v33 = vpop.f32.mrf.mxu0  ;;  %2634 = vmatmul.mubr.bf16.gmra.mxu0 %v6559_v26  ;;  %v6577_v26 = vld [vmem:[%s7117_s21 + $0x64] ss:$16 sps:$4 sm:$0xff]  }
 0x191   : > { %v2748_v34 = vpop.f32.mrf.mxu1  ;;  %2987 = vmatmul.mubr.bf16.gmra.mxu1 %v6562_v27  ;;  %3029 = vmatprep.mubr.bf16.mxu0 %v6565_v36  ;;  %v6578_v27 = vld [vmem:[%s7117_s21 + $0x6c] ss:$16 sps:$4 sm:$0xff]  }
 0x192   : > { %v5941_v35 = vpack.c.bf16 %v2745_v32, %v2743_v31  ;;  %3382 = vmatprep.mubr.bf16.mxu1 %v6566_v37  ;;  %v2397_v38 = vpop.f32.mrf.mxu0  ;;  %v2749_v40 = vadd.f32 %v2748_v34, %v2395_v33 }
 0x193   : > { %v2750_v39 = vpop.f32.mrf.mxu1 }
 0x194   : > { %5268 = vst [vmem:[%s7367_s12 + $0xd0] sm:$0xff] %v5941_v35  ;;  %v2751_v41 = vadd.f32 %v2750_v39, %v2397_v38  ;;  %v2399_v42 = vpop.f32.mrf.mxu0 }
 0x195   : > { %v2752_v43 = vpop.f32.mrf.mxu1 }
 0x196   : > { %v5943_v44 = vpack.c.bf16 %v2751_v41, %v2749_v40  ;;  %v2401_v45 = vpop.f32.mrf.mxu0  ;;  %v2753_v47 = vadd.f32 %v2752_v43, %v2399_v42  ;;  %v6579_v41 = vld [vmem:[%s7117_s21 + $0x60] ss:$16 sps:$4 sm:$0xff]   ;;  %v6580_v42 = vld [vmem:[%s7117_s21 + $0x68] ss:$16 sps:$4 sm:$0xff]  }
 0x197   : > { %v2754_v46 = vpop.f32.mrf.mxu1 }
 0x198   : > { %5270 = vst [vmem:[%s7367_s12 + $0xe0] sm:$0xff] %v5943_v44  ;;  %v2755_v48 = vadd.f32 %v2754_v46, %v2401_v45  ;;  %v2405_v49 = vpop.f32.mrf.mxu0  ;;  %3030 = vmatmul.mubr.bf16.vlgmr.msra.gmra.mxu0 %v6567_v51  ;;  %v6581_v44 = vld [vmem:[%s7117_s21 + $0x84] ss:$16 sps:$4 sm:$0xff]   ;;  %v6582_v45 = vld [vmem:[%s7117_s21 + $0x8c] ss:$16 sps:$4 sm:$0xff]  }
 0x199   : > { %v2758_v50 = vpop.f32.mrf.mxu1  ;;  %3383 = vmatmul.mubr.bf16.vlgmr.msra.gmra.mxu1 %v6568_v52  ;;  %3039 = vmatprep.mubr.bf16.mxu0 %v6569_v54 }
 0x19a   : > { %v5945_v53 = vpack.c.bf16 %v2755_v48, %v2753_v47  ;;  %3392 = vmatprep.mubr.bf16.mxu1 %v6570_v55  ;;  %v2407_v56 = vpop.f32.mrf.mxu0  ;;  %v2759_v58 = vadd.f32 %v2758_v50, %v2405_v49 }
 0x19b   : > { %v2760_v57 = vpop.f32.mrf.mxu1 }
 0x19c   : > { %5272 = vst [vmem:[%s7367_s12 + $0xf0] sm:$0xff] %v5945_v53  ;;  %v2761_v59 = vadd.f32 %v2760_v57, %v2407_v56  ;;  %v2409_v60 = vpop.f32.mrf.mxu0 }
 0x19d   : > { %v2762_v61 = vpop.f32.mrf.mxu1 }
 0x19e   : > { %v5947_v62 = vpack.c.bf16 %v2761_v59, %v2759_v58  ;;  %v2411_v63 = vpop.f32.mrf.mxu0  ;;  %v2763_v1 = vadd.f32 %v2762_v61, %v2409_v60  ;;  %v6583_v59 = vld [vmem:[%s7117_s21 + $0x80] ss:$16 sps:$4 sm:$0xff]   ;;  %v6584_v60 = vld [vmem:[%s7117_s21 + $0x88] ss:$16 sps:$4 sm:$0xff]  }
 0x19f   : > { %v2764_v0 = vpop.f32.mrf.mxu1 }
 0x1a0   : > { %5274 = vst [vmem:[%s7367_s12 + $0x100] sm:$0xff] %v5947_v62  ;;  %v2765_v2 = vadd.f32 %v2764_v0, %v2411_v63  ;;  %v2415_v3 = vpop.f32.mrf.mxu0  ;;  %3040 = vmatmul.mubr.bf16.gmra.mxu0 %v6571_v5  ;;  %v6585_v62 = vld [vmem:[%s7117_s21 + $0xa4] ss:$16 sps:$4 sm:$0xff]   ;;  %v6586_v63 = vld [vmem:[%s7117_s21 + $0xac] ss:$16 sps:$4 sm:$0xff]  }
 0x1a1   : > { %v2768_v4 = vpop.f32.mrf.mxu1  ;;  %3393 = vmatmul.mubr.bf16.gmra.mxu1 %v6572_v6  ;;  %3049 = vmatprep.mubr.bf16.mxu0 %v6573_v8 }
 0x1a2   : > { %v5949_v7 = vpack.c.bf16 %v2765_v2, %v2763_v1  ;;  %3402 = vmatprep.mubr.bf16.mxu1 %v6574_v9  ;;  %v2417_v10 = vpop.f32.mrf.mxu0  ;;  %v2769_v12 = vadd.f32 %v2768_v4, %v2415_v3 }
 0x1a3   : > { %v2770_v11 = vpop.f32.mrf.mxu1 }
 0x1a4   : > { %5276 = vst [vmem:[%s7367_s12 + $0x110] sm:$0xff] %v5949_v7  ;;  %v2771_v13 = vadd.f32 %v2770_v11, %v2417_v10  ;;  %v2419_v14 = vpop.f32.mrf.mxu0 }
 0x1a5   : > { %v2772_v15 = vpop.f32.mrf.mxu1 }
 0x1a6   : > { %v5951_v16 = vpack.c.bf16 %v2771_v13, %v2769_v12  ;;  %v2421_v17 = vpop.f32.mrf.mxu0  ;;  %v2773_v19 = vadd.f32 %v2772_v15, %v2419_v14  ;;  %v6587_v13 = vld [vmem:[%s7117_s21 + $0xa0] ss:$16 sps:$4 sm:$0xff]   ;;  %v6588_v14 = vld [vmem:[%s7117_s21 + $0xa8] ss:$16 sps:$4 sm:$0xff]  }
 0x1a7   : > { %v2774_v18 = vpop.f32.mrf.mxu1 }
 0x1a8   : > { %5278 = vst [vmem:[%s7367_s12 + $0x120] sm:$0xff] %v5951_v16  ;;  %v2775_v20 = vadd.f32 %v2774_v18, %v2421_v17  ;;  %v2425_v21 = vpop.f32.mrf.mxu0  ;;  %3050 = vmatmul.mubr.bf16.gmra.mxu0 %v6575_v23  ;;  %v6589_v16 = vld [vmem:[%s7117_s21 + $0xc4] ss:$16 sps:$4 sm:$0xff]   ;;  %v6590_v17 = vld [vmem:[%s7117_s21 + $0xcc] ss:$16 sps:$4 sm:$0xff]  }
 0x1a9   : > { %v2778_v22 = vpop.f32.mrf.mxu1  ;;  %3403 = vmatmul.mubr.bf16.gmra.mxu1 %v6576_v24  ;;  %3059 = vmatprep.mubr.bf16.mxu0 %v6577_v26 }
 0x1aa   : > { %v5953_v25 = vpack.c.bf16 %v2775_v20, %v2773_v19  ;;  %3412 = vmatprep.mubr.bf16.mxu1 %v6578_v27  ;;  %v2427_v28 = vpop.f32.mrf.mxu0  ;;  %v2779_v30 = vadd.f32 %v2778_v22, %v2425_v21 }
 0x1ab   : > { %v2780_v29 = vpop.f32.mrf.mxu1 }
 0x1ac   : > { %5280 = vst [vmem:[%s7367_s12 + $0x130] sm:$0xff] %v5953_v25  ;;  %v2781_v31 = vadd.f32 %v2780_v29, %v2427_v28  ;;  %v2429_v32 = vpop.f32.mrf.mxu0 }
 0x1ad   : > { %v2782_v33 = vpop.f32.mrf.mxu1 }
 0x1ae   : > { %v5955_v34 = vpack.c.bf16 %v2781_v31, %v2779_v30  ;;  %v2431_v35 = vpop.f32.mrf.mxu0  ;;  %v2783_v37 = vadd.f32 %v2782_v33, %v2429_v32  ;;  %v6591_v31 = vld [vmem:[%s7117_s21 + $0xc0] ss:$16 sps:$4 sm:$0xff]   ;;  %v6592_v32 = vld [vmem:[%s7117_s21 + $0xc8] ss:$16 sps:$4 sm:$0xff]  }
 0x1af   : > { %v2784_v36 = vpop.f32.mrf.mxu1 }
 0x1b0   : > { %5282 = vst [vmem:[%s7367_s12 + $0x140] sm:$0xff] %v5955_v34  ;;  %v2785_v38 = vadd.f32 %v2784_v36, %v2431_v35  ;;  %v2435_v39 = vpop.f32.mrf.mxu0  ;;  %3060 = vmatmul.mubr.bf16.gmra.mxu0 %v6579_v41  ;;  %v6593_v34 = vld [vmem:[%s7117_s21 + $0xe4] ss:$16 sps:$4 sm:$0xff]   ;;  %v6594_v35 = vld [vmem:[%s7117_s21 + $0xec] ss:$16 sps:$4 sm:$0xff]  }
 0x1b1   : > { %v2788_v40 = vpop.f32.mrf.mxu1  ;;  %3413 = vmatmul.mubr.bf16.gmra.mxu1 %v6580_v42  ;;  %3069 = vmatprep.mubr.bf16.mxu0 %v6581_v44 }
 0x1b2   : > { %v5957_v43 = vpack.c.bf16 %v2785_v38, %v2783_v37  ;;  %3422 = vmatprep.mubr.bf16.mxu1 %v6582_v45  ;;  %v2437_v46 = vpop.f32.mrf.mxu0  ;;  %v2789_v48 = vadd.f32 %v2788_v40, %v2435_v39 }
 0x1b3   : > { %v2790_v47 = vpop.f32.mrf.mxu1 }
 0x1b4   : > { %5284 = vst [vmem:[%s7367_s12 + $0x150] sm:$0xff] %v5957_v43  ;;  %v2791_v49 = vadd.f32 %v2790_v47, %v2437_v46  ;;  %v2439_v50 = vpop.f32.mrf.mxu0 }
 0x1b5   : > { %v2792_v51 = vpop.f32.mrf.mxu1 }
 0x1b6   : > { %v5959_v52 = vpack.c.bf16 %v2791_v49, %v2789_v48  ;;  %v2441_v53 = vpop.f32.mrf.mxu0  ;;  %v2793_v55 = vadd.f32 %v2792_v51, %v2439_v50  ;;  %v6595_v49 = vld [vmem:[%s7117_s21 + $0xe0] ss:$16 sps:$4 sm:$0xff]   ;;  %v6596_v50 = vld [vmem:[%s7117_s21 + $0xe8] ss:$16 sps:$4 sm:$0xff]  }
 0x1b7   : > { %v2794_v54 = vpop.f32.mrf.mxu1 }
 0x1b8   : > { %5286 = vst [vmem:[%s7367_s12 + $0x160] sm:$0xff] %v5959_v52  ;;  %v2795_v56 = vadd.f32 %v2794_v54, %v2441_v53  ;;  %v2445_v57 = vpop.f32.mrf.mxu0  ;;  %3070 = vmatmul.mubr.bf16.gmra.mxu0 %v6583_v59  ;;  %v6597_v52 = vld [vmem:[%s7117_s21 + $0x104] ss:$16 sps:$4 sm:$0xff]   ;;  %v6598_v53 = vld [vmem:[%s7117_s21 + $0x10c] ss:$16 sps:$4 sm:$0xff]  }
 0x1b9   : > { %v2798_v58 = vpop.f32.mrf.mxu1  ;;  %3423 = vmatmul.mubr.bf16.gmra.mxu1 %v6584_v60  ;;  %3079 = vmatprep.mubr.bf16.mxu0 %v6585_v62 }
 0x1ba   : > { %v5961_v61 = vpack.c.bf16 %v2795_v56, %v2793_v55  ;;  %3432 = vmatprep.mubr.bf16.mxu1 %v6586_v63  ;;  %v2447_v0 = vpop.f32.mrf.mxu0  ;;  %v2799_v2 = vadd.f32 %v2798_v58, %v2445_v57 }
 0x1bb   : > { %v2800_v1 = vpop.f32.mrf.mxu1 }
 0x1bc   : > { %5288 = vst [vmem:[%s7367_s12 + $0x170] sm:$0xff] %v5961_v61  ;;  %v2801_v3 = vadd.f32 %v2800_v1, %v2447_v0  ;;  %v2449_v4 = vpop.f32.mrf.mxu0 }
 0x1bd   : > { %v2802_v5 = vpop.f32.mrf.mxu1 }
 0x1be   : > { %v5963_v6 = vpack.c.bf16 %v2801_v3, %v2799_v2  ;;  %v2451_v7 = vpop.f32.mrf.mxu0  ;;  %v2803_v9 = vadd.f32 %v2802_v5, %v2449_v4  ;;  %v6599_v3 = vld [vmem:[%s7117_s21 + $0x100] ss:$16 sps:$4 sm:$0xff]   ;;  %v6600_v4 = vld [vmem:[%s7117_s21 + $0x108] ss:$16 sps:$4 sm:$0xff]  }
 0x1bf   : > { %v2804_v8 = vpop.f32.mrf.mxu1 }
 0x1c0   : > { %5290 = vst [vmem:[%s7367_s12 + $0x180] sm:$0xff] %v5963_v6  ;;  %v2805_v10 = vadd.f32 %v2804_v8, %v2451_v7  ;;  %v2455_v11 = vpop.f32.mrf.mxu0  ;;  %3080 = vmatmul.mubr.bf16.gmra.mxu0 %v6587_v13  ;;  %v6601_v6 = vld [vmem:[%s7117_s21 + $0x124] ss:$16 sps:$4 sm:$0xff]   ;;  %v6602_v7 = vld [vmem:[%s7117_s21 + $0x12c] ss:$16 sps:$4 sm:$0xff]  }
 0x1c1   : > { %v2808_v12 = vpop.f32.mrf.mxu1  ;;  %3433 = vmatmul.mubr.bf16.gmra.mxu1 %v6588_v14  ;;  %3089 = vmatprep.mubr.bf16.mxu0 %v6589_v16 }
 0x1c2   : > { %v5965_v15 = vpack.c.bf16 %v2805_v10, %v2803_v9  ;;  %3442 = vmatprep.mubr.bf16.mxu1 %v6590_v17  ;;  %v2457_v18 = vpop.f32.mrf.mxu0  ;;  %v2809_v20 = vadd.f32 %v2808_v12, %v2455_v11 }
 0x1c3   : > { %v2810_v19 = vpop.f32.mrf.mxu1 }
 0x1c4   : > { %5292 = vst [vmem:[%s7367_s12 + $0x190] sm:$0xff] %v5965_v15  ;;  %v2811_v21 = vadd.f32 %v2810_v19, %v2457_v18  ;;  %v2459_v22 = vpop.f32.mrf.mxu0 }
 0x1c5   : > { %v2812_v23 = vpop.f32.mrf.mxu1 }
 0x1c6   : > { %v5967_v24 = vpack.c.bf16 %v2811_v21, %v2809_v20  ;;  %v2461_v25 = vpop.f32.mrf.mxu0  ;;  %v2813_v27 = vadd.f32 %v2812_v23, %v2459_v22  ;;  %v6603_v21 = vld [vmem:[%s7117_s21 + $0x120] ss:$16 sps:$4 sm:$0xff]   ;;  %v6604_v22 = vld [vmem:[%s7117_s21 + $0x128] ss:$16 sps:$4 sm:$0xff]  }
 0x1c7   : > { %v2814_v26 = vpop.f32.mrf.mxu1 }
 0x1c8   : > { %5294 = vst [vmem:[%s7367_s12 + $0x1a0] sm:$0xff] %v5967_v24  ;;  %v2815_v28 = vadd.f32 %v2814_v26, %v2461_v25  ;;  %v2465_v29 = vpop.f32.mrf.mxu0  ;;  %3090 = vmatmul.mubr.bf16.gmra.mxu0 %v6591_v31  ;;  %v6605_v24 = vld [vmem:[%s7117_s21 + $0x144] ss:$16 sps:$4 sm:$0xff]   ;;  %v6606_v25 = vld [vmem:[%s7117_s21 + $0x14c] ss:$16 sps:$4 sm:$0xff]  }
 0x1c9   : > { %v2818_v30 = vpop.f32.mrf.mxu1  ;;  %3443 = vmatmul.mubr.bf16.gmra.mxu1 %v6592_v32  ;;  %3099 = vmatprep.mubr.bf16.mxu0 %v6593_v34 }
 0x1ca   : > { %v5969_v33 = vpack.c.bf16 %v2815_v28, %v2813_v27  ;;  %3452 = vmatprep.mubr.bf16.mxu1 %v6594_v35  ;;  %v2467_v36 = vpop.f32.mrf.mxu0  ;;  %v2819_v38 = vadd.f32 %v2818_v30, %v2465_v29 }
 0x1cb   : > { %v2820_v37 = vpop.f32.mrf.mxu1 }
 0x1cc   : > { %5296 = vst [vmem:[%s7367_s12 + $0x1b0] sm:$0xff] %v5969_v33  ;;  %v2821_v39 = vadd.f32 %v2820_v37, %v2467_v36  ;;  %v2469_v40 = vpop.f32.mrf.mxu0 }
 0x1cd   : > { %v2822_v41 = vpop.f32.mrf.mxu1 }
 0x1ce   : > { %v5971_v42 = vpack.c.bf16 %v2821_v39, %v2819_v38  ;;  %v2471_v43 = vpop.f32.mrf.mxu0  ;;  %v2823_v45 = vadd.f32 %v2822_v41, %v2469_v40  ;;  %v6607_v39 = vld [vmem:[%s7117_s21 + $0x140] ss:$16 sps:$4 sm:$0xff]   ;;  %v6608_v40 = vld [vmem:[%s7117_s21 + $0x148] ss:$16 sps:$4 sm:$0xff]  }
 0x1cf   : > { %v2824_v44 = vpop.f32.mrf.mxu1 }
 0x1d0   : > { %5298 = vst [vmem:[%s7367_s12 + $0x1c0] sm:$0xff] %v5971_v42  ;;  %v2825_v46 = vadd.f32 %v2824_v44, %v2471_v43  ;;  %v2475_v47 = vpop.f32.mrf.mxu0  ;;  %3100 = vmatmul.mubr.bf16.gmra.mxu0 %v6595_v49  ;;  %v6609_v42 = vld [vmem:[%s7117_s21 + $0x164] ss:$16 sps:$4 sm:$0xff]   ;;  %v6610_v43 = vld [vmem:[%s7117_s21 + $0x16c] ss:$16 sps:$4 sm:$0xff]  }
 0x1d1   : > { %v2828_v48 = vpop.f32.mrf.mxu1  ;;  %3453 = vmatmul.mubr.bf16.gmra.mxu1 %v6596_v50  ;;  %3109 = vmatprep.mubr.bf16.mxu0 %v6597_v52 }
 0x1d2   : > { %v5973_v51 = vpack.c.bf16 %v2825_v46, %v2823_v45  ;;  %3462 = vmatprep.mubr.bf16.mxu1 %v6598_v53  ;;  %v2477_v54 = vpop.f32.mrf.mxu0  ;;  %v2829_v56 = vadd.f32 %v2828_v48, %v2475_v47 }
 0x1d3   : > { %v2830_v55 = vpop.f32.mrf.mxu1 }
 0x1d4   : > { %5300 = vst [vmem:[%s7367_s12 + $0x1d0] sm:$0xff] %v5973_v51  ;;  %v2831_v57 = vadd.f32 %v2830_v55, %v2477_v54  ;;  %v2479_v58 = vpop.f32.mrf.mxu0 }
 0x1d5   : > { %v2832_v59 = vpop.f32.mrf.mxu1 }
 0x1d6   : > { %v5975_v60 = vpack.c.bf16 %v2831_v57, %v2829_v56  ;;  %v2481_v61 = vpop.f32.mrf.mxu0  ;;  %v2833_v63 = vadd.f32 %v2832_v59, %v2479_v58  ;;  %v6611_v57 = vld [vmem:[%s7117_s21 + $0x160] ss:$16 sps:$4 sm:$0xff]   ;;  %v6612_v58 = vld [vmem:[%s7117_s21 + $0x168] ss:$16 sps:$4 sm:$0xff]  }
 0x1d7   : > { %v2834_v62 = vpop.f32.mrf.mxu1 }
 0x1d8   : > { %5302 = vst [vmem:[%s7367_s12 + $0x1e0] sm:$0xff] %v5975_v60  ;;  %v2835_v0 = vadd.f32 %v2834_v62, %v2481_v61  ;;  %v2485_v1 = vpop.f32.mrf.mxu0  ;;  %3110 = vmatmul.mubr.bf16.gmra.mxu0 %v6599_v3  ;;  %v6613_v60 = vld [vmem:[%s7117_s21 + $0x184] ss:$16 sps:$4 sm:$0xff]   ;;  %v6614_v61 = vld [vmem:[%s7117_s21 + $0x18c] ss:$16 sps:$4 sm:$0xff]  }
 0x1d9   : > { %v2838_v2 = vpop.f32.mrf.mxu1  ;;  %3463 = vmatmul.mubr.bf16.gmra.mxu1 %v6600_v4  ;;  %3119 = vmatprep.mubr.bf16.mxu0 %v6601_v6 }
 0x1da   : > { %v5977_v5 = vpack.c.bf16 %v2835_v0, %v2833_v63  ;;  %3472 = vmatprep.mubr.bf16.mxu1 %v6602_v7  ;;  %v2487_v8 = vpop.f32.mrf.mxu0  ;;  %v2839_v10 = vadd.f32 %v2838_v2, %v2485_v1 }
 0x1db   : > { %v2840_v9 = vpop.f32.mrf.mxu1 }
 0x1dc   : > { %5304 = vst [vmem:[%s7367_s12 + $0x1f0] sm:$0xff] %v5977_v5  ;;  %v2841_v11 = vadd.f32 %v2840_v9, %v2487_v8  ;;  %v2489_v12 = vpop.f32.mrf.mxu0 }
 0x1dd   : > { %v2842_v13 = vpop.f32.mrf.mxu1 }
 0x1de   : > { %v5979_v14 = vpack.c.bf16 %v2841_v11, %v2839_v10  ;;  %v2491_v15 = vpop.f32.mrf.mxu0  ;;  %v2843_v17 = vadd.f32 %v2842_v13, %v2489_v12  ;;  %v6615_v11 = vld [vmem:[%s7117_s21 + $0x180] ss:$16 sps:$4 sm:$0xff]   ;;  %v6616_v12 = vld [vmem:[%s7117_s21 + $0x188] ss:$16 sps:$4 sm:$0xff]  }
 0x1df   : > { %v2844_v16 = vpop.f32.mrf.mxu1 }
 0x1e0   : > { %5306 = vst [vmem:[%s7367_s12 + $0x200] sm:$0xff] %v5979_v14  ;;  %v2845_v18 = vadd.f32 %v2844_v16, %v2491_v15  ;;  %v2495_v19 = vpop.f32.mrf.mxu0  ;;  %3120 = vmatmul.mubr.bf16.gmra.mxu0 %v6603_v21  ;;  %v6617_v14 = vld [vmem:[%s7117_s21 + $0x1a4] ss:$16 sps:$4 sm:$0xff]   ;;  %v6618_v15 = vld [vmem:[%s7117_s21 + $0x1ac] ss:$16 sps:$4 sm:$0xff]  }
 0x1e1   : > { %v2848_v20 = vpop.f32.mrf.mxu1  ;;  %3473 = vmatmul.mubr.bf16.gmra.mxu1 %v6604_v22  ;;  %3129 = vmatprep.mubr.bf16.mxu0 %v6605_v24 }
 0x1e2   : > { %v5981_v23 = vpack.c.bf16 %v2845_v18, %v2843_v17  ;;  %3482 = vmatprep.mubr.bf16.mxu1 %v6606_v25  ;;  %v2497_v26 = vpop.f32.mrf.mxu0  ;;  %v2849_v28 = vadd.f32 %v2848_v20, %v2495_v19 }
 0x1e3   : > { %v2850_v27 = vpop.f32.mrf.mxu1 }
 0x1e4   : > { %5308 = vst [vmem:[%s7367_s12 + $0x210] sm:$0xff] %v5981_v23  ;;  %v2851_v29 = vadd.f32 %v2850_v27, %v2497_v26  ;;  %v2499_v30 = vpop.f32.mrf.mxu0 }
 0x1e5   : > { %v2852_v31 = vpop.f32.mrf.mxu1 }
 0x1e6   : > { %v5983_v32 = vpack.c.bf16 %v2851_v29, %v2849_v28  ;;  %v2501_v33 = vpop.f32.mrf.mxu0  ;;  %v2853_v35 = vadd.f32 %v2852_v31, %v2499_v30  ;;  %v6619_v29 = vld [vmem:[%s7117_s21 + $0x1a0] ss:$16 sps:$4 sm:$0xff]   ;;  %v6620_v30 = vld [vmem:[%s7117_s21 + $0x1a8] ss:$16 sps:$4 sm:$0xff]  }
 0x1e7   : > { %v2854_v34 = vpop.f32.mrf.mxu1 }
 0x1e8   : > { %5310 = vst [vmem:[%s7367_s12 + $0x220] sm:$0xff] %v5983_v32  ;;  %v2855_v36 = vadd.f32 %v2854_v34, %v2501_v33  ;;  %v2505_v37 = vpop.f32.mrf.mxu0  ;;  %3130 = vmatmul.mubr.bf16.gmra.mxu0 %v6607_v39  ;;  %v6621_v32 = vld [vmem:[%s7117_s21 + $0x1c4] ss:$16 sps:$4 sm:$0xff]   ;;  %v6622_v33 = vld [vmem:[%s7117_s21 + $0x1cc] ss:$16 sps:$4 sm:$0xff]  }
 0x1e9   : > { %v2858_v38 = vpop.f32.mrf.mxu1  ;;  %3483 = vmatmul.mubr.bf16.gmra.mxu1 %v6608_v40  ;;  %3139 = vmatprep.mubr.bf16.mxu0 %v6609_v42 }
 0x1ea   : > { %v5985_v41 = vpack.c.bf16 %v2855_v36, %v2853_v35  ;;  %3492 = vmatprep.mubr.bf16.mxu1 %v6610_v43  ;;  %v2507_v44 = vpop.f32.mrf.mxu0  ;;  %v2859_v46 = vadd.f32 %v2858_v38, %v2505_v37 }
 0x1eb   : > { %v2860_v45 = vpop.f32.mrf.mxu1 }
 0x1ec   : > { %5312 = vst [vmem:[%s7367_s12 + $0x230] sm:$0xff] %v5985_v41  ;;  %v2861_v47 = vadd.f32 %v2860_v45, %v2507_v44  ;;  %v2509_v48 = vpop.f32.mrf.mxu0 }
 0x1ed   : > { %v2862_v49 = vpop.f32.mrf.mxu1 }
 0x1ee   : > { %v5987_v50 = vpack.c.bf16 %v2861_v47, %v2859_v46  ;;  %v2511_v51 = vpop.f32.mrf.mxu0  ;;  %v2863_v53 = vadd.f32 %v2862_v49, %v2509_v48  ;;  %v6623_v47 = vld [vmem:[%s7117_s21 + $0x1c0] ss:$16 sps:$4 sm:$0xff]   ;;  %v6624_v48 = vld [vmem:[%s7117_s21 + $0x1c8] ss:$16 sps:$4 sm:$0xff]  }
 0x1ef   : > { %v2864_v52 = vpop.f32.mrf.mxu1 }
 0x1f0   : > { %5314 = vst [vmem:[%s7367_s12 + $0x240] sm:$0xff] %v5987_v50  ;;  %v2865_v54 = vadd.f32 %v2864_v52, %v2511_v51  ;;  %v2515_v55 = vpop.f32.mrf.mxu0  ;;  %3140 = vmatmul.mubr.bf16.gmra.mxu0 %v6611_v57  ;;  %v6625_v50 = vld [vmem:[%s7117_s21 + $0x1e4] ss:$16 sps:$4 sm:$0xff]   ;;  %v6626_v51 = vld [vmem:[%s7117_s21 + $0x1ec] ss:$16 sps:$4 sm:$0xff]  }
 0x1f1   : > { %v2868_v56 = vpop.f32.mrf.mxu1  ;;  %3493 = vmatmul.mubr.bf16.gmra.mxu1 %v6612_v58  ;;  %3149 = vmatprep.mubr.bf16.mxu0 %v6613_v60 }
 0x1f2   : > { %v5989_v59 = vpack.c.bf16 %v2865_v54, %v2863_v53  ;;  %3502 = vmatprep.mubr.bf16.mxu1 %v6614_v61  ;;  %v2517_v62 = vpop.f32.mrf.mxu0  ;;  %v2869_v0 = vadd.f32 %v2868_v56, %v2515_v55 }
 0x1f3   : > { %v2870_v63 = vpop.f32.mrf.mxu1 }
 0x1f4   : > { %5316 = vst [vmem:[%s7367_s12 + $0x250] sm:$0xff] %v5989_v59  ;;  %v2871_v1 = vadd.f32 %v2870_v63, %v2517_v62  ;;  %v2519_v2 = vpop.f32.mrf.mxu0 }
 0x1f5   : > { %v2872_v3 = vpop.f32.mrf.mxu1 }
 0x1f6   : > { %v5991_v4 = vpack.c.bf16 %v2871_v1, %v2869_v0  ;;  %v2521_v5 = vpop.f32.mrf.mxu0  ;;  %v2873_v7 = vadd.f32 %v2872_v3, %v2519_v2  ;;  %v6627_v1 = vld [vmem:[%s7117_s21 + $0x1e0] ss:$16 sps:$4 sm:$0xff]   ;;  %v6628_v2 = vld [vmem:[%s7117_s21 + $0x1e8] ss:$16 sps:$4 sm:$0xff]  }
 0x1f7   : > { %v2874_v6 = vpop.f32.mrf.mxu1 }
 0x1f8   : > { %5318 = vst [vmem:[%s7367_s12 + $0x260] sm:$0xff] %v5991_v4  ;;  %v2875_v8 = vadd.f32 %v2874_v6, %v2521_v5  ;;  %v2525_v9 = vpop.f32.mrf.mxu0  ;;  %3150 = vmatmul.mubr.bf16.gmra.mxu0 %v6615_v11  ;;  %v6629_v4 = vld [vmem:[%s7117_s21 + $0x204] ss:$16 sps:$4 sm:$0xff]   ;;  %v6630_v5 = vld [vmem:[%s7117_s21 + $0x20c] ss:$16 sps:$4 sm:$0xff]  }
 0x1f9   : > { %v2878_v10 = vpop.f32.mrf.mxu1  ;;  %3503 = vmatmul.mubr.bf16.gmra.mxu1 %v6616_v12  ;;  %3159 = vmatprep.mubr.bf16.mxu0 %v6617_v14 }
 0x1fa   : > { %v5993_v13 = vpack.c.bf16 %v2875_v8, %v2873_v7  ;;  %3512 = vmatprep.mubr.bf16.mxu1 %v6618_v15  ;;  %v2527_v16 = vpop.f32.mrf.mxu0  ;;  %v2879_v18 = vadd.f32 %v2878_v10, %v2525_v9 }
 0x1fb   : > { %v2880_v17 = vpop.f32.mrf.mxu1 }
 0x1fc   : > { %5320 = vst [vmem:[%s7367_s12 + $0x270] sm:$0xff] %v5993_v13  ;;  %v2881_v19 = vadd.f32 %v2880_v17, %v2527_v16  ;;  %v2529_v20 = vpop.f32.mrf.mxu0 }
 0x1fd   : > { %v2882_v21 = vpop.f32.mrf.mxu1 }
 0x1fe   : > { %v5995_v22 = vpack.c.bf16 %v2881_v19, %v2879_v18  ;;  %v2531_v23 = vpop.f32.mrf.mxu0  ;;  %v2883_v25 = vadd.f32 %v2882_v21, %v2529_v20  ;;  %v6631_v19 = vld [vmem:[%s7117_s21 + $0x200] ss:$16 sps:$4 sm:$0xff]   ;;  %v6632_v20 = vld [vmem:[%s7117_s21 + $0x208] ss:$16 sps:$4 sm:$0xff]  }
 0x1ff   : > { %v2884_v24 = vpop.f32.mrf.mxu1 }
 0x200   : > { %5322 = vst [vmem:[%s7367_s12 + $0x280] sm:$0xff] %v5995_v22  ;;  %v2885_v26 = vadd.f32 %v2884_v24, %v2531_v23  ;;  %v2535_v27 = vpop.f32.mrf.mxu0  ;;  %3160 = vmatmul.mubr.bf16.gmra.mxu0 %v6619_v29  ;;  %v6633_v22 = vld [vmem:[%s7117_s21 + $0x224] ss:$16 sps:$4 sm:$0xff]   ;;  %v6634_v23 = vld [vmem:[%s7117_s21 + $0x22c] ss:$16 sps:$4 sm:$0xff]  }
 0x201   : > { %v2888_v28 = vpop.f32.mrf.mxu1  ;;  %3513 = vmatmul.mubr.bf16.gmra.mxu1 %v6620_v30  ;;  %3169 = vmatprep.mubr.bf16.mxu0 %v6621_v32 }
 0x202   : > { %v5997_v31 = vpack.c.bf16 %v2885_v26, %v2883_v25  ;;  %3522 = vmatprep.mubr.bf16.mxu1 %v6622_v33  ;;  %v2537_v34 = vpop.f32.mrf.mxu0  ;;  %v2889_v36 = vadd.f32 %v2888_v28, %v2535_v27 }
 0x203   : > { %v2890_v35 = vpop.f32.mrf.mxu1 }
 0x204   : > { %5324 = vst [vmem:[%s7367_s12 + $0x290] sm:$0xff] %v5997_v31  ;;  %v2891_v37 = vadd.f32 %v2890_v35, %v2537_v34  ;;  %v2539_v38 = vpop.f32.mrf.mxu0 }
 0x205   : > { %v2892_v39 = vpop.f32.mrf.mxu1 }
 0x206   : > { %v5999_v40 = vpack.c.bf16 %v2891_v37, %v2889_v36  ;;  %v2541_v41 = vpop.f32.mrf.mxu0  ;;  %v2893_v43 = vadd.f32 %v2892_v39, %v2539_v38  ;;  %v6635_v37 = vld [vmem:[%s7117_s21 + $0x220] ss:$16 sps:$4 sm:$0xff]   ;;  %v6636_v38 = vld [vmem:[%s7117_s21 + $0x228] ss:$16 sps:$4 sm:$0xff]  }
 0x207   : > { %v2894_v42 = vpop.f32.mrf.mxu1 }
 0x208   : > { %5326 = vst [vmem:[%s7367_s12 + $0x2a0] sm:$0xff] %v5999_v40  ;;  %v2895_v44 = vadd.f32 %v2894_v42, %v2541_v41  ;;  %v2545_v45 = vpop.f32.mrf.mxu0  ;;  %3170 = vmatmul.mubr.bf16.gmra.mxu0 %v6623_v47  ;;  %v6637_v40 = vld [vmem:[%s7117_s21 + $0x244] ss:$16 sps:$4 sm:$0xff]   ;;  %v6638_v41 = vld [vmem:[%s7117_s21 + $0x24c] ss:$16 sps:$4 sm:$0xff]  }
 0x209   : > { %v2898_v46 = vpop.f32.mrf.mxu1  ;;  %3523 = vmatmul.mubr.bf16.gmra.mxu1 %v6624_v48  ;;  %3179 = vmatprep.mubr.bf16.mxu0 %v6625_v50 }
 0x20a   : > { %v6001_v49 = vpack.c.bf16 %v2895_v44, %v2893_v43  ;;  %3532 = vmatprep.mubr.bf16.mxu1 %v6626_v51  ;;  %v2547_v52 = vpop.f32.mrf.mxu0  ;;  %v2899_v54 = vadd.f32 %v2898_v46, %v2545_v45 }
 0x20b   : > { %v2900_v53 = vpop.f32.mrf.mxu1 }
 0x20c   : > { %5328 = vst [vmem:[%s7367_s12 + $0x2b0] sm:$0xff] %v6001_v49  ;;  %v2901_v55 = vadd.f32 %v2900_v53, %v2547_v52  ;;  %v2549_v56 = vpop.f32.mrf.mxu0 }
 0x20d   : > { %v2902_v57 = vpop.f32.mrf.mxu1 }
 0x20e   : > { %v6003_v58 = vpack.c.bf16 %v2901_v55, %v2899_v54  ;;  %v2551_v59 = vpop.f32.mrf.mxu0  ;;  %v2903_v61 = vadd.f32 %v2902_v57, %v2549_v56  ;;  %v6639_v55 = vld [vmem:[%s7117_s21 + $0x240] ss:$16 sps:$4 sm:$0xff]   ;;  %v6640_v56 = vld [vmem:[%s7117_s21 + $0x248] ss:$16 sps:$4 sm:$0xff]  }
 0x20f   : > { %v2904_v60 = vpop.f32.mrf.mxu1 }
 0x210   : > { %5330 = vst [vmem:[%s7367_s12 + $0x2c0] sm:$0xff] %v6003_v58  ;;  %v2905_v62 = vadd.f32 %v2904_v60, %v2551_v59  ;;  %v2555_v63 = vpop.f32.mrf.mxu0  ;;  %3180 = vmatmul.mubr.bf16.gmra.mxu0 %v6627_v1  ;;  %v6641_v58 = vld [vmem:[%s7117_s21 + $0x264] ss:$16 sps:$4 sm:$0xff]   ;;  %v6642_v59 = vld [vmem:[%s7117_s21 + $0x26c] ss:$16 sps:$4 sm:$0xff]  }
 0x211   : > { %v2908_v0 = vpop.f32.mrf.mxu1  ;;  %3533 = vmatmul.mubr.bf16.gmra.mxu1 %v6628_v2  ;;  %3189 = vmatprep.mubr.bf16.mxu0 %v6629_v4 }
 0x212   : > { %v6005_v3 = vpack.c.bf16 %v2905_v62, %v2903_v61  ;;  %3542 = vmatprep.mubr.bf16.mxu1 %v6630_v5  ;;  %v2557_v6 = vpop.f32.mrf.mxu0  ;;  %v2909_v8 = vadd.f32 %v2908_v0, %v2555_v63 }
 0x213   : > { %v2910_v7 = vpop.f32.mrf.mxu1 }
 0x214   : > { %5332 = vst [vmem:[%s7367_s12 + $0x2d0] sm:$0xff] %v6005_v3  ;;  %v2911_v9 = vadd.f32 %v2910_v7, %v2557_v6  ;;  %v2559_v10 = vpop.f32.mrf.mxu0 }
 0x215   : > { %v2912_v11 = vpop.f32.mrf.mxu1 }
 0x216   : > { %v6007_v12 = vpack.c.bf16 %v2911_v9, %v2909_v8  ;;  %v2561_v13 = vpop.f32.mrf.mxu0  ;;  %v2913_v15 = vadd.f32 %v2912_v11, %v2559_v10  ;;  %v6643_v9 = vld [vmem:[%s7117_s21 + $0x260] ss:$16 sps:$4 sm:$0xff]   ;;  %v6644_v10 = vld [vmem:[%s7117_s21 + $0x268] ss:$16 sps:$4 sm:$0xff]  }
 0x217   : > { %v2914_v14 = vpop.f32.mrf.mxu1 }
 0x218   : > { %5334 = vst [vmem:[%s7367_s12 + $0x2e0] sm:$0xff] %v6007_v12  ;;  %v2915_v16 = vadd.f32 %v2914_v14, %v2561_v13  ;;  %v2565_v17 = vpop.f32.mrf.mxu0  ;;  %3190 = vmatmul.mubr.bf16.gmra.mxu0 %v6631_v19  ;;  %v6645_v12 = vld [vmem:[%s7117_s21 + $0x284] ss:$16 sps:$4 sm:$0xff]   ;;  %v6646_v13 = vld [vmem:[%s7117_s21 + $0x28c] ss:$16 sps:$4 sm:$0xff]  }
 0x219   : > { %v2918_v18 = vpop.f32.mrf.mxu1  ;;  %3543 = vmatmul.mubr.bf16.gmra.mxu1 %v6632_v20  ;;  %3199 = vmatprep.mubr.bf16.mxu0 %v6633_v22 }
 0x21a   : > { %v6009_v21 = vpack.c.bf16 %v2915_v16, %v2913_v15  ;;  %3552 = vmatprep.mubr.bf16.mxu1 %v6634_v23  ;;  %v2567_v24 = vpop.f32.mrf.mxu0  ;;  %v2919_v26 = vadd.f32 %v2918_v18, %v2565_v17 }
 0x21b   : > { %v2920_v25 = vpop.f32.mrf.mxu1 }
 0x21c   : > { %5336 = vst [vmem:[%s7367_s12 + $0x2f0] sm:$0xff] %v6009_v21  ;;  %v2921_v27 = vadd.f32 %v2920_v25, %v2567_v24  ;;  %v2569_v28 = vpop.f32.mrf.mxu0 }
 0x21d   : > { %v2922_v29 = vpop.f32.mrf.mxu1 }
 0x21e   : > { %v6011_v30 = vpack.c.bf16 %v2921_v27, %v2919_v26  ;;  %v2571_v31 = vpop.f32.mrf.mxu0  ;;  %v2923_v33 = vadd.f32 %v2922_v29, %v2569_v28  ;;  %v6647_v27 = vld [vmem:[%s7117_s21 + $0x280] ss:$16 sps:$4 sm:$0xff]   ;;  %v6648_v28 = vld [vmem:[%s7117_s21 + $0x288] ss:$16 sps:$4 sm:$0xff]  }
 0x21f   : > { %v2924_v32 = vpop.f32.mrf.mxu1 }
 0x220   : > { %5338 = vst [vmem:[%s7367_s12 + $0x300] sm:$0xff] %v6011_v30  ;;  %v2925_v34 = vadd.f32 %v2924_v32, %v2571_v31  ;;  %v2575_v35 = vpop.f32.mrf.mxu0  ;;  %3200 = vmatmul.mubr.bf16.gmra.mxu0 %v6635_v37  ;;  %v6649_v30 = vld [vmem:[%s7117_s21 + $0x2a4] ss:$16 sps:$4 sm:$0xff]   ;;  %v6650_v31 = vld [vmem:[%s7117_s21 + $0x2ac] ss:$16 sps:$4 sm:$0xff]  }
 0x221   : > { %v2928_v36 = vpop.f32.mrf.mxu1  ;;  %3553 = vmatmul.mubr.bf16.gmra.mxu1 %v6636_v38  ;;  %3209 = vmatprep.mubr.bf16.mxu0 %v6637_v40 }
 0x222   : > { %v6013_v39 = vpack.c.bf16 %v2925_v34, %v2923_v33  ;;  %3562 = vmatprep.mubr.bf16.mxu1 %v6638_v41  ;;  %v2577_v42 = vpop.f32.mrf.mxu0  ;;  %v2929_v44 = vadd.f32 %v2928_v36, %v2575_v35 }
 0x223   : > { %v2930_v43 = vpop.f32.mrf.mxu1 }
 0x224   : > { %5340 = vst [vmem:[%s7367_s12 + $0x310] sm:$0xff] %v6013_v39  ;;  %v2931_v45 = vadd.f32 %v2930_v43, %v2577_v42  ;;  %v2579_v46 = vpop.f32.mrf.mxu0 }
 0x225   : > { %v2932_v47 = vpop.f32.mrf.mxu1 }
 0x226   : > { %v6015_v48 = vpack.c.bf16 %v2931_v45, %v2929_v44  ;;  %v2581_v49 = vpop.f32.mrf.mxu0  ;;  %v2933_v51 = vadd.f32 %v2932_v47, %v2579_v46  ;;  %v6651_v45 = vld [vmem:[%s7117_s21 + $0x2a0] ss:$16 sps:$4 sm:$0xff]   ;;  %v6652_v46 = vld [vmem:[%s7117_s21 + $0x2a8] ss:$16 sps:$4 sm:$0xff]  }
 0x227   : > { %v2934_v50 = vpop.f32.mrf.mxu1 }
 0x228   : > { %5342 = vst [vmem:[%s7367_s12 + $0x320] sm:$0xff] %v6015_v48  ;;  %v2935_v52 = vadd.f32 %v2934_v50, %v2581_v49  ;;  %v2585_v53 = vpop.f32.mrf.mxu0  ;;  %3210 = vmatmul.mubr.bf16.gmra.mxu0 %v6639_v55  ;;  %v6653_v48 = vld [vmem:[%s7117_s21 + $0x2c4] ss:$16 sps:$4 sm:$0xff]   ;;  %v6654_v49 = vld [vmem:[%s7117_s21 + $0x2cc] ss:$16 sps:$4 sm:$0xff]  }
 0x229   : > { %v2938_v54 = vpop.f32.mrf.mxu1  ;;  %3563 = vmatmul.mubr.bf16.gmra.mxu1 %v6640_v56  ;;  %3219 = vmatprep.mubr.bf16.mxu0 %v6641_v58 }
 0x22a   : > { %v6017_v57 = vpack.c.bf16 %v2935_v52, %v2933_v51  ;;  %3572 = vmatprep.mubr.bf16.mxu1 %v6642_v59  ;;  %v2587_v60 = vpop.f32.mrf.mxu0  ;;  %v2939_v62 = vadd.f32 %v2938_v54, %v2585_v53 }
 0x22b   : > { %v2940_v61 = vpop.f32.mrf.mxu1 }
 0x22c   : > { %5344 = vst [vmem:[%s7367_s12 + $0x330] sm:$0xff] %v6017_v57  ;;  %v2941_v63 = vadd.f32 %v2940_v61, %v2587_v60  ;;  %v2589_v0 = vpop.f32.mrf.mxu0 }
 0x22d   : > { %v2942_v1 = vpop.f32.mrf.mxu1 }
 0x22e   : > { %v6019_v2 = vpack.c.bf16 %v2941_v63, %v2939_v62  ;;  %v2591_v3 = vpop.f32.mrf.mxu0  ;;  %v2943_v5 = vadd.f32 %v2942_v1, %v2589_v0  ;;  %v6655_v63 = vld [vmem:[%s7117_s21 + $0x2c0] ss:$16 sps:$4 sm:$0xff]   ;;  %v6656_v0 = vld [vmem:[%s7117_s21 + $0x2c8] ss:$16 sps:$4 sm:$0xff]  }
 0x22f   : > { %v2944_v4 = vpop.f32.mrf.mxu1 }
 0x230   : > { %5346 = vst [vmem:[%s7367_s12 + $0x340] sm:$0xff] %v6019_v2  ;;  %v2945_v6 = vadd.f32 %v2944_v4, %v2591_v3  ;;  %v2595_v7 = vpop.f32.mrf.mxu0  ;;  %3220 = vmatmul.mubr.bf16.gmra.mxu0 %v6643_v9  ;;  %v6657_v2 = vld [vmem:[%s7117_s21 + $0x2e4] ss:$16 sps:$4 sm:$0xff]   ;;  %v6658_v3 = vld [vmem:[%s7117_s21 + $0x2ec] ss:$16 sps:$4 sm:$0xff]  }
 0x231   : > { %v2948_v8 = vpop.f32.mrf.mxu1  ;;  %3573 = vmatmul.mubr.bf16.gmra.mxu1 %v6644_v10  ;;  %3229 = vmatprep.mubr.bf16.mxu0 %v6645_v12 }
 0x232   : > { %v6021_v11 = vpack.c.bf16 %v2945_v6, %v2943_v5  ;;  %3582 = vmatprep.mubr.bf16.mxu1 %v6646_v13  ;;  %v2597_v14 = vpop.f32.mrf.mxu0  ;;  %v2949_v16 = vadd.f32 %v2948_v8, %v2595_v7 }
 0x233   : > { %v2950_v15 = vpop.f32.mrf.mxu1 }
 0x234   : > { %5348 = vst [vmem:[%s7367_s12 + $0x350] sm:$0xff] %v6021_v11  ;;  %v2951_v17 = vadd.f32 %v2950_v15, %v2597_v14  ;;  %v2599_v18 = vpop.f32.mrf.mxu0 }
 0x235   : > { %v2952_v19 = vpop.f32.mrf.mxu1 }
 0x236   : > { %v6023_v20 = vpack.c.bf16 %v2951_v17, %v2949_v16  ;;  %v2601_v21 = vpop.f32.mrf.mxu0  ;;  %v2953_v23 = vadd.f32 %v2952_v19, %v2599_v18  ;;  %v6659_v17 = vld [vmem:[%s7117_s21 + $0x2e0] ss:$16 sps:$4 sm:$0xff]   ;;  %v6660_v18 = vld [vmem:[%s7117_s21 + $0x2e8] ss:$16 sps:$4 sm:$0xff]  }
 0x237   : > { %v2954_v22 = vpop.f32.mrf.mxu1 }
 0x238   : > { %5350 = vst [vmem:[%s7367_s12 + $0x360] sm:$0xff] %v6023_v20  ;;  %v2955_v24 = vadd.f32 %v2954_v22, %v2601_v21  ;;  %v2605_v25 = vpop.f32.mrf.mxu0  ;;  %3230 = vmatmul.mubr.bf16.gmra.mxu0 %v6647_v27  ;;  %v6661_v20 = vld [vmem:[%s7117_s21 + $0x304] ss:$16 sps:$4 sm:$0xff]   ;;  %v6662_v21 = vld [vmem:[%s7117_s21 + $0x30c] ss:$16 sps:$4 sm:$0xff]  }
 0x239   : > { %v2958_v26 = vpop.f32.mrf.mxu1  ;;  %3583 = vmatmul.mubr.bf16.gmra.mxu1 %v6648_v28  ;;  %3239 = vmatprep.mubr.bf16.mxu0 %v6649_v30 }
 0x23a   : > { %v6025_v29 = vpack.c.bf16 %v2955_v24, %v2953_v23  ;;  %3592 = vmatprep.mubr.bf16.mxu1 %v6650_v31  ;;  %v2607_v32 = vpop.f32.mrf.mxu0  ;;  %v2959_v34 = vadd.f32 %v2958_v26, %v2605_v25 }
 0x23b   : > { %v2960_v33 = vpop.f32.mrf.mxu1 }
 0x23c   : > { %5352 = vst [vmem:[%s7367_s12 + $0x370] sm:$0xff] %v6025_v29  ;;  %v2961_v35 = vadd.f32 %v2960_v33, %v2607_v32  ;;  %v2609_v36 = vpop.f32.mrf.mxu0 }
 0x23d   : > { %v2962_v37 = vpop.f32.mrf.mxu1 }
 0x23e   : > { %v6027_v38 = vpack.c.bf16 %v2961_v35, %v2959_v34  ;;  %v2611_v39 = vpop.f32.mrf.mxu0  ;;  %v2963_v41 = vadd.f32 %v2962_v37, %v2609_v36  ;;  %v6663_v34 = vld [vmem:[%s7117_s21 + $0x300] ss:$16 sps:$4 sm:$0xff]   ;;  %v6664_v36 = vld [vmem:[%s7117_s21 + $0x308] ss:$16 sps:$4 sm:$0xff]  }
 0x23f   : > { %v2964_v40 = vpop.f32.mrf.mxu1 }
 0x240   : > { %5354 = vst [vmem:[%s7367_s12 + $0x380] sm:$0xff] %v6027_v38  ;;  %v2965_v42 = vadd.f32 %v2964_v40, %v2611_v39  ;;  %v2615_v43 = vpop.f32.mrf.mxu0  ;;  %3240 = vmatmul.mubr.bf16.gmra.mxu0 %v6651_v45  ;;  %v6665_v38 = vld [vmem:[%s7117_s21 + $0x324] ss:$16 sps:$4 sm:$0xff]   ;;  %v6666_v39 = vld [vmem:[%s7117_s21 + $0x32c] ss:$16 sps:$4 sm:$0xff]  }
 0x241   : > { %v2968_v44 = vpop.f32.mrf.mxu1  ;;  %3593 = vmatmul.mubr.bf16.gmra.mxu1 %v6652_v46  ;;  %3249 = vmatprep.mubr.bf16.mxu0 %v6653_v48 }
 0x242   : > { %v6029_v47 = vpack.c.bf16 %v2965_v42, %v2963_v41  ;;  %3602 = vmatprep.mubr.bf16.mxu1 %v6654_v49  ;;  %v2617_v50 = vpop.f32.mrf.mxu0  ;;  %v2969_v52 = vadd.f32 %v2968_v44, %v2615_v43 }
 0x243   : > { %v2970_v51 = vpop.f32.mrf.mxu1 }
 0x244   : > { %5356 = vst [vmem:[%s7367_s12 + $0x390] sm:$0xff] %v6029_v47  ;;  %v2971_v53 = vadd.f32 %v2970_v51, %v2617_v50  ;;  %v2619_v54 = vpop.f32.mrf.mxu0 }
 0x245   : > { %v2972_v55 = vpop.f32.mrf.mxu1 }
 0x246   : > { %v6031_v56 = vpack.c.bf16 %v2971_v53, %v2969_v52  ;;  %v2621_v57 = vpop.f32.mrf.mxu0  ;;  %v2973_v59 = vadd.f32 %v2972_v55, %v2619_v54  ;;  %v6667_v52 = vld [vmem:[%s7117_s21 + $0x320] ss:$16 sps:$4 sm:$0xff]   ;;  %v6668_v54 = vld [vmem:[%s7117_s21 + $0x328] ss:$16 sps:$4 sm:$0xff]  }
 0x247   : > { %v2974_v58 = vpop.f32.mrf.mxu1 }
 0x248   : > { %5358 = vst [vmem:[%s7367_s12 + $0x3a0] sm:$0xff] %v6031_v56  ;;  %v2975_v60 = vadd.f32 %v2974_v58, %v2621_v57  ;;  %v2625_v61 = vpop.f32.mrf.mxu0  ;;  %3250 = vmatmul.mubr.bf16.gmra.mxu0 %v6655_v63  ;;  %v6669_v56 = vld [vmem:[%s7117_s21 + $0x344] ss:$16 sps:$4 sm:$0xff]   ;;  %v6670_v57 = vld [vmem:[%s7117_s21 + $0x34c] ss:$16 sps:$4 sm:$0xff]  }
 0x249   : > { %v2978_v62 = vpop.f32.mrf.mxu1  ;;  %3603 = vmatmul.mubr.bf16.gmra.mxu1 %v6656_v0  ;;  %3259 = vmatprep.mubr.bf16.mxu0 %v6657_v2 }
 0x24a   : > { %v6033_v1 = vpack.c.bf16 %v2975_v60, %v2973_v59  ;;  %3612 = vmatprep.mubr.bf16.mxu1 %v6658_v3  ;;  %v2627_v4 = vpop.f32.mrf.mxu0  ;;  %v2979_v6 = vadd.f32 %v2978_v62, %v2625_v61 }
 0x24b   : > { %v2980_v5 = vpop.f32.mrf.mxu1 }
 0x24c   : > { %5360 = vst [vmem:[%s7367_s12 + $0x3b0] sm:$0xff] %v6033_v1  ;;  %v2981_v7 = vadd.f32 %v2980_v5, %v2627_v4  ;;  %v2629_v8 = vpop.f32.mrf.mxu0 }
 0x24d   : > { %v2982_v9 = vpop.f32.mrf.mxu1 }
 0x24e   : > { %v6035_v10 = vpack.c.bf16 %v2981_v7, %v2979_v6  ;;  %v2631_v11 = vpop.f32.mrf.mxu0  ;;  %v2983_v13 = vadd.f32 %v2982_v9, %v2629_v8  ;;  %v6671_v6 = vld [vmem:[%s7117_s21 + $0x340] ss:$16 sps:$4 sm:$0xff]   ;;  %v6672_v8 = vld [vmem:[%s7117_s21 + $0x348] ss:$16 sps:$4 sm:$0xff]  }
 0x24f   : > { %v2984_v12 = vpop.f32.mrf.mxu1 }
 0x250   : > { %5362 = vst [vmem:[%s7367_s12 + $0x3c0] sm:$0xff] %v6035_v10  ;;  %v2985_v14 = vadd.f32 %v2984_v12, %v2631_v11  ;;  %v2635_v15 = vpop.f32.mrf.mxu0  ;;  %3260 = vmatmul.mubr.bf16.gmra.mxu0 %v6659_v17  ;;  %v6673_v10 = vld [vmem:[%s7117_s21 + $0x364] ss:$16 sps:$4 sm:$0xff]   ;;  %v6674_v11 = vld [vmem:[%s7117_s21 + $0x36c] ss:$16 sps:$4 sm:$0xff]  }
 0x251   : > { %v2988_v16 = vpop.f32.mrf.mxu1  ;;  %3613 = vmatmul.mubr.bf16.gmra.mxu1 %v6660_v18  ;;  %3269 = vmatprep.mubr.bf16.mxu0 %v6661_v20 }
 0x252   : > { %v6037_v19 = vpack.c.bf16 %v2985_v14, %v2983_v13  ;;  %3622 = vmatprep.mubr.bf16.mxu1 %v6662_v21  ;;  %v2637_v22 = vpop.f32.mrf.mxu0  ;;  %v2989_v24 = vadd.f32 %v2988_v16, %v2635_v15 }
 0x253   : > { %v2990_v23 = vpop.f32.mrf.mxu1 }
 0x254   : > { %5364 = vst [vmem:[%s7367_s12 + $0x3d0] sm:$0xff] %v6037_v19  ;;  %v2991_v25 = vadd.f32 %v2990_v23, %v2637_v22  ;;  %v2639_v26 = vpop.f32.mrf.mxu0 }
 0x255   : > { %v2992_v27 = vpop.f32.mrf.mxu1 }
 0x256   : > { %v6039_v28 = vpack.c.bf16 %v2991_v25, %v2989_v24  ;;  %v2641_v29 = vpop.f32.mrf.mxu0  ;;  %v2993_v31 = vadd.f32 %v2992_v27, %v2639_v26  ;;  %v6675_v24 = vld [vmem:[%s7117_s21 + $0x360] ss:$16 sps:$4 sm:$0xff]   ;;  %v6676_v26 = vld [vmem:[%s7117_s21 + $0x368] ss:$16 sps:$4 sm:$0xff]  }
 0x257   : > { %v2994_v30 = vpop.f32.mrf.mxu1 }
 0x258   : > { %5366 = vst [vmem:[%s7367_s12 + $0x3e0] sm:$0xff] %v6039_v28  ;;  %v2995_v32 = vadd.f32 %v2994_v30, %v2641_v29  ;;  %v3031_v33 = vpop.f32.mrf.mxu0  ;;  %3270 = vmatmul.mubr.bf16.gmra.mxu0 %v6663_v34  ;;  %v6677_v28 = vld [vmem:[%s7117_s21 + $0x384] ss:$16 sps:$4 sm:$0xff]   ;;  %v6678_v29 = vld [vmem:[%s7117_s21 + $0x38c] ss:$16 sps:$4 sm:$0xff]  }
 0x259   : > { %v3384_v35 = vpop.f32.mrf.mxu1  ;;  %3623 = vmatmul.mubr.bf16.gmra.mxu1 %v6664_v36  ;;  %3279 = vmatprep.mubr.bf16.mxu0 %v6665_v38 }
 0x25a   : > { %v6041_v37 = vpack.c.bf16 %v2995_v32, %v2993_v31  ;;  %3632 = vmatprep.mubr.bf16.mxu1 %v6666_v39  ;;  %v3033_v40 = vpop.f32.mrf.mxu0  ;;  %v3385_v42 = vadd.f32 %v3384_v35, %v3031_v33 }
 0x25b   : > { %v3386_v41 = vpop.f32.mrf.mxu1 }
 0x25c   : > { %5368 = vst [vmem:[%s7367_s12 + $0x3f0] sm:$0xff] %v6041_v37  ;;  %v3387_v43 = vadd.f32 %v3386_v41, %v3033_v40  ;;  %v3035_v44 = vpop.f32.mrf.mxu0 }
 0x25d   : > { %v3388_v45 = vpop.f32.mrf.mxu1 }
 0x25e   : > { %v5916_v46 = vpack.c.bf16 %v3387_v43, %v3385_v42  ;;  %v3037_v47 = vpop.f32.mrf.mxu0  ;;  %v3389_v49 = vadd.f32 %v3388_v45, %v3035_v44  ;;  %v6679_v42 = vld [vmem:[%s7117_s21 + $0x380] ss:$16 sps:$4 sm:$0xff]   ;;  %v6680_v44 = vld [vmem:[%s7117_s21 + $0x388] ss:$16 sps:$4 sm:$0xff]  }
 0x25f   : > { %v3390_v48 = vpop.f32.mrf.mxu1 }
 0x260   : > { %5243 = vst [vmem:[%s7367_s12 + $0x8] sm:$0xff] %v5916_v46  ;;  %v3391_v50 = vadd.f32 %v3390_v48, %v3037_v47  ;;  %v3041_v51 = vpop.f32.mrf.mxu0  ;;  %3280 = vmatmul.mubr.bf16.gmra.mxu0 %v6667_v52  ;;  %v6681_v46 = vld [vmem:[%s7117_s21 + $0x3a4] ss:$16 sps:$4 sm:$0xff]   ;;  %v6682_v47 = vld [vmem:[%s7117_s21 + $0x3ac] ss:$16 sps:$4 sm:$0xff]  }
 0x261   : > { %v3394_v53 = vpop.f32.mrf.mxu1  ;;  %3633 = vmatmul.mubr.bf16.gmra.mxu1 %v6668_v54  ;;  %3289 = vmatprep.mubr.bf16.mxu0 %v6669_v56 }
 0x262   : > { %v5918_v55 = vpack.c.bf16 %v3391_v50, %v3389_v49  ;;  %3642 = vmatprep.mubr.bf16.mxu1 %v6670_v57  ;;  %v3043_v58 = vpop.f32.mrf.mxu0  ;;  %v3395_v60 = vadd.f32 %v3394_v53, %v3041_v51 }
 0x263   : > { %v3396_v59 = vpop.f32.mrf.mxu1 }
 0x264   : > { %5245 = vst [vmem:[%s7367_s12 + $0x18] sm:$0xff] %v5918_v55  ;;  %v3397_v61 = vadd.f32 %v3396_v59, %v3043_v58  ;;  %v3045_v62 = vpop.f32.mrf.mxu0 }
 0x265   : > { %v3398_v63 = vpop.f32.mrf.mxu1 }
 0x266   : > { %v5920_v0 = vpack.c.bf16 %v3397_v61, %v3395_v60  ;;  %v3047_v1 = vpop.f32.mrf.mxu0  ;;  %v3399_v3 = vadd.f32 %v3398_v63, %v3045_v62  ;;  %v6683_v60 = vld [vmem:[%s7117_s21 + $0x3a0] ss:$16 sps:$4 sm:$0xff]   ;;  %v6684_v62 = vld [vmem:[%s7117_s21 + $0x3a8] ss:$16 sps:$4 sm:$0xff]  }
 0x267   : > { %v3400_v2 = vpop.f32.mrf.mxu1 }
 0x268   : > { %5247 = vst [vmem:[%s7367_s12 + $0x28] sm:$0xff] %v5920_v0  ;;  %v3401_v4 = vadd.f32 %v3400_v2, %v3047_v1  ;;  %v3051_v5 = vpop.f32.mrf.mxu0  ;;  %3290 = vmatmul.mubr.bf16.gmra.mxu0 %v6671_v6  ;;  %v6685_v0 = vld [vmem:[%s7117_s21 + $0x3c4] ss:$16 sps:$4 sm:$0xff]   ;;  %v6686_v1 = vld [vmem:[%s7117_s21 + $0x3cc] ss:$16 sps:$4 sm:$0xff]  }
 0x269   : > { %v3404_v7 = vpop.f32.mrf.mxu1  ;;  %3643 = vmatmul.mubr.bf16.gmra.mxu1 %v6672_v8  ;;  %3299 = vmatprep.mubr.bf16.mxu0 %v6673_v10 }
 0x26a   : > { %v5922_v9 = vpack.c.bf16 %v3401_v4, %v3399_v3  ;;  %3652 = vmatprep.mubr.bf16.mxu1 %v6674_v11  ;;  %v3053_v12 = vpop.f32.mrf.mxu0  ;;  %v3405_v14 = vadd.f32 %v3404_v7, %v3051_v5 }
 0x26b   : > { %v3406_v13 = vpop.f32.mrf.mxu1 }
 0x26c   : > { %5249 = vst [vmem:[%s7367_s12 + $0x38] sm:$0xff] %v5922_v9  ;;  %v3407_v15 = vadd.f32 %v3406_v13, %v3053_v12  ;;  %v3055_v16 = vpop.f32.mrf.mxu0 }
 0x26d   : > { %v3408_v17 = vpop.f32.mrf.mxu1 }
 0x26e   : > { %v5924_v18 = vpack.c.bf16 %v3407_v15, %v3405_v14  ;;  %v3057_v19 = vpop.f32.mrf.mxu0  ;;  %v3409_v21 = vadd.f32 %v3408_v17, %v3055_v16  ;;  %v6687_v14 = vld [vmem:[%s7117_s21 + $0x3c0] ss:$16 sps:$4 sm:$0xff]   ;;  %v6688_v16 = vld [vmem:[%s7117_s21 + $0x3c8] ss:$16 sps:$4 sm:$0xff]  }
 0x26f   : > { %v3410_v20 = vpop.f32.mrf.mxu1 }
 0x270   : > { %5251 = vst [vmem:[%s7367_s12 + $0x48] sm:$0xff] %v5924_v18  ;;  %v3411_v22 = vadd.f32 %v3410_v20, %v3057_v19  ;;  %v3061_v23 = vpop.f32.mrf.mxu0  ;;  %3300 = vmatmul.mubr.bf16.gmra.mxu0 %v6675_v24  ;;  %v6689_v18 = vld [vmem:[%s7117_s21 + $0x3e4] ss:$16 sps:$4 sm:$0xff]   ;;  %v6690_v19 = vld [vmem:[%s7117_s21 + $0x3ec] ss:$16 sps:$4 sm:$0xff]  }
 0x271   : > { %v3414_v25 = vpop.f32.mrf.mxu1  ;;  %3653 = vmatmul.mubr.bf16.gmra.mxu1 %v6676_v26  ;;  %3309 = vmatprep.mubr.bf16.mxu0 %v6677_v28 }
 0x272   : > { %v5926_v27 = vpack.c.bf16 %v3411_v22, %v3409_v21  ;;  %3662 = vmatprep.mubr.bf16.mxu1 %v6678_v29  ;;  %v3063_v30 = vpop.f32.mrf.mxu0  ;;  %v3415_v32 = vadd.f32 %v3414_v25, %v3061_v23 }
 0x273   : > { %v3416_v31 = vpop.f32.mrf.mxu1 }
 0x274   : > { %5253 = vst [vmem:[%s7367_s12 + $0x58] sm:$0xff] %v5926_v27  ;;  %v3417_v33 = vadd.f32 %v3416_v31, %v3063_v30  ;;  %v3065_v34 = vpop.f32.mrf.mxu0 }
 0x275   : > { %v3418_v35 = vpop.f32.mrf.mxu1 }
 0x276   : > { %v5928_v36 = vpack.c.bf16 %v3417_v33, %v3415_v32  ;;  %v3067_v37 = vpop.f32.mrf.mxu0  ;;  %v3419_v39 = vadd.f32 %v3418_v35, %v3065_v34  ;;  %v6691_v32 = vld [vmem:[%s7117_s21 + $0x3e0] ss:$16 sps:$4 sm:$0xff]   ;;  %v6692_v34 = vld [vmem:[%s7117_s21 + $0x3e8] ss:$16 sps:$4 sm:$0xff]   ;;  %s7652_s21 = scalar_lea.hbm %s7771_s4, %s5909_s8 }
 0x277   : > { %v3420_v38 = vpop.f32.mrf.mxu1 }
 0x278   : > { %5255 = vst [vmem:[%s7367_s12 + $0x68] sm:$0xff] %v5928_v36  ;;  %v3421_v40 = vadd.f32 %v3420_v38, %v3067_v37  ;;  %v3071_v41 = vpop.f32.mrf.mxu0  ;;  %3310 = vmatmul.mubr.bf16.gmra.mxu0 %v6679_v42 }
 0x279   : > { %v3424_v43 = vpop.f32.mrf.mxu1  ;;  %3663 = vmatmul.mubr.bf16.gmra.mxu1 %v6680_v44  ;;  %3319 = vmatprep.mubr.bf16.mxu0 %v6681_v46 }
 0x27a   : > { %v5930_v45 = vpack.c.bf16 %v3421_v40, %v3419_v39  ;;  %3672 = vmatprep.mubr.bf16.mxu1 %v6682_v47  ;;  %v3073_v48 = vpop.f32.mrf.mxu0  ;;  %v3425_v50 = vadd.f32 %v3424_v43, %v3071_v41 }
 0x27b   : > { %v3426_v49 = vpop.f32.mrf.mxu1 }
 0x27c   : > { %5257 = vst [vmem:[%s7367_s12 + $0x78] sm:$0xff] %v5930_v45  ;;  %v3427_v51 = vadd.f32 %v3426_v49, %v3073_v48  ;;  %v3075_v52 = vpop.f32.mrf.mxu0 }
 0x27d   : > { %v3428_v53 = vpop.f32.mrf.mxu1 }
 0x27e   : > { %v5932_v54 = vpack.c.bf16 %v3427_v51, %v3425_v50  ;;  %v3077_v55 = vpop.f32.mrf.mxu0  ;;  %v3429_v57 = vadd.f32 %v3428_v53, %v3075_v52 }
 0x27f   : > { %v3430_v56 = vpop.f32.mrf.mxu1 }
 0x280   : > { %5259 = vst [vmem:[%s7367_s12 + $0x88] sm:$0xff] %v5932_v54  ;;  %v3431_v58 = vadd.f32 %v3430_v56, %v3077_v55  ;;  %v3081_v59 = vpop.f32.mrf.mxu0  ;;  %3320 = vmatmul.mubr.bf16.gmra.mxu0 %v6683_v60 }
 0x281   : > { %v3434_v61 = vpop.f32.mrf.mxu1  ;;  %3673 = vmatmul.mubr.bf16.gmra.mxu1 %v6684_v62  ;;  %3329 = vmatprep.mubr.bf16.mxu0 %v6685_v0 }
 0x282   : > { %v5934_v63 = vpack.c.bf16 %v3431_v58, %v3429_v57  ;;  %3682 = vmatprep.mubr.bf16.mxu1 %v6686_v1  ;;  %v3083_v2 = vpop.f32.mrf.mxu0  ;;  %v3435_v4 = vadd.f32 %v3434_v61, %v3081_v59 }
 0x283   : > { %v3436_v3 = vpop.f32.mrf.mxu1 }
 0x284   : > { %5261 = vst [vmem:[%s7367_s12 + $0x98] sm:$0xff] %v5934_v63  ;;  %v3437_v5 = vadd.f32 %v3436_v3, %v3083_v2  ;;  %v3085_v6 = vpop.f32.mrf.mxu0 }
 0x285   : > { %v3438_v7 = vpop.f32.mrf.mxu1 }
 0x286   : > { %v5936_v8 = vpack.c.bf16 %v3437_v5, %v3435_v4  ;;  %v3087_v9 = vpop.f32.mrf.mxu0  ;;  %v3439_v11 = vadd.f32 %v3438_v7, %v3085_v6 }
 0x287   : > { %v3440_v10 = vpop.f32.mrf.mxu1 }
 0x288   : > { %5263 = vst [vmem:[%s7367_s12 + $0xa8] sm:$0xff] %v5936_v8  ;;  %v3441_v12 = vadd.f32 %v3440_v10, %v3087_v9  ;;  %v3091_v13 = vpop.f32.mrf.mxu0  ;;  %3330 = vmatmul.mubr.bf16.gmra.mxu0 %v6687_v14 }
 0x289   : > { %v3444_v15 = vpop.f32.mrf.mxu1  ;;  %3683 = vmatmul.mubr.bf16.gmra.mxu1 %v6688_v16  ;;  %3339 = vmatprep.mubr.bf16.mxu0 %v6689_v18 }
 0x28a   : > { %v5938_v17 = vpack.c.bf16 %v3441_v12, %v3439_v11  ;;  %3692 = vmatprep.mubr.bf16.mxu1 %v6690_v19  ;;  %v3093_v20 = vpop.f32.mrf.mxu0  ;;  %v3445_v22 = vadd.f32 %v3444_v15, %v3091_v13 }
 0x28b   : > { %v3446_v21 = vpop.f32.mrf.mxu1 }
 0x28c   : > { %5265 = vst [vmem:[%s7367_s12 + $0xb8] sm:$0xff] %v5938_v17  ;;  %v3447_v23 = vadd.f32 %v3446_v21, %v3093_v20  ;;  %v3095_v24 = vpop.f32.mrf.mxu0 }
 0x28d   : > { %v3448_v25 = vpop.f32.mrf.mxu1 }
 0x28e   : > { %v5940_v26 = vpack.c.bf16 %v3447_v23, %v3445_v22  ;;  %v3097_v27 = vpop.f32.mrf.mxu0  ;;  %v3449_v29 = vadd.f32 %v3448_v25, %v3095_v24 }
 0x28f   : > { %v3450_v28 = vpop.f32.mrf.mxu1 }
 0x290   : > { %5267 = vst [vmem:[%s7367_s12 + $0xc8] sm:$0xff] %v5940_v26  ;;  %v3451_v30 = vadd.f32 %v3450_v28, %v3097_v27  ;;  %v3101_v31 = vpop.f32.mrf.mxu0  ;;  %3340 = vmatmul.mubr.bf16.gmra.mxu0 %v6691_v32 }
 0x291   : > { %v3454_v33 = vpop.f32.mrf.mxu1  ;;  %3693 = vmatmul.mubr.bf16.gmra.mxu1 %v6692_v34 }
 0x292   : > { %v5942_v35 = vpack.c.bf16 %v3451_v30, %v3449_v29  ;;  %v3103_v36 = vpop.f32.mrf.mxu0  ;;  %v3455_v38 = vadd.f32 %v3454_v33, %v3101_v31 }
 0x293   : > { %v3456_v37 = vpop.f32.mrf.mxu1 }
 0x294   : > { %5269 = vst [vmem:[%s7367_s12 + $0xd8] sm:$0xff] %v5942_v35  ;;  %v3457_v39 = vadd.f32 %v3456_v37, %v3103_v36  ;;  %v3105_v40 = vpop.f32.mrf.mxu0 }
 0x295   : > { %v3458_v41 = vpop.f32.mrf.mxu1 }
 0x296   : > { %v5944_v42 = vpack.c.bf16 %v3457_v39, %v3455_v38  ;;  %v3107_v43 = vpop.f32.mrf.mxu0  ;;  %v3459_v45 = vadd.f32 %v3458_v41, %v3105_v40 }
 0x297   : > { %v3460_v44 = vpop.f32.mrf.mxu1 }
 0x298   : > { %5271 = vst [vmem:[%s7367_s12 + $0xe8] sm:$0xff] %v5944_v42  ;;  %v3461_v46 = vadd.f32 %v3460_v44, %v3107_v43  ;;  %v3111_v47 = vpop.f32.mrf.mxu0 }
 0x299   : > { %v3464_v48 = vpop.f32.mrf.mxu1 }
 0x29a   : > { %v5946_v49 = vpack.c.bf16 %v3461_v46, %v3459_v45  ;;  %v3113_v50 = vpop.f32.mrf.mxu0  ;;  %v3465_v52 = vadd.f32 %v3464_v48, %v3111_v47 }
 0x29b   : > { %v3466_v51 = vpop.f32.mrf.mxu1 }
 0x29c   : > { %5273 = vst [vmem:[%s7367_s12 + $0xf8] sm:$0xff] %v5946_v49  ;;  %v3467_v53 = vadd.f32 %v3466_v51, %v3113_v50  ;;  %v3115_v54 = vpop.f32.mrf.mxu0 }
 0x29d   : > { %v3468_v55 = vpop.f32.mrf.mxu1 }
 0x29e   : > { %v5948_v56 = vpack.c.bf16 %v3467_v53, %v3465_v52  ;;  %v3117_v57 = vpop.f32.mrf.mxu0  ;;  %v3469_v59 = vadd.f32 %v3468_v55, %v3115_v54 }
 0x29f   : > { %v3470_v58 = vpop.f32.mrf.mxu1 }
 0x2a0   : > { %5275 = vst [vmem:[%s7367_s12 + $0x108] sm:$0xff] %v5948_v56  ;;  %v3471_v60 = vadd.f32 %v3470_v58, %v3117_v57  ;;  %v3121_v61 = vpop.f32.mrf.mxu0 }
 0x2a1   : > { %v3474_v62 = vpop.f32.mrf.mxu1 }
 0x2a2   : > { %v5950_v63 = vpack.c.bf16 %v3471_v60, %v3469_v59  ;;  %v3123_v0 = vpop.f32.mrf.mxu0  ;;  %v3475_v2 = vadd.f32 %v3474_v62, %v3121_v61 }
 0x2a3   : > { %v3476_v1 = vpop.f32.mrf.mxu1 }
 0x2a4   : > { %5277 = vst [vmem:[%s7367_s12 + $0x118] sm:$0xff] %v5950_v63  ;;  %v3477_v3 = vadd.f32 %v3476_v1, %v3123_v0  ;;  %v3125_v4 = vpop.f32.mrf.mxu0 }
 0x2a5   : > { %v3478_v5 = vpop.f32.mrf.mxu1 }
 0x2a6   : > { %v5952_v6 = vpack.c.bf16 %v3477_v3, %v3475_v2  ;;  %v3127_v7 = vpop.f32.mrf.mxu0  ;;  %v3479_v9 = vadd.f32 %v3478_v5, %v3125_v4 }
 0x2a7   : > { %v3480_v8 = vpop.f32.mrf.mxu1 }
 0x2a8   : > { %5279 = vst [vmem:[%s7367_s12 + $0x128] sm:$0xff] %v5952_v6  ;;  %v3481_v10 = vadd.f32 %v3480_v8, %v3127_v7  ;;  %v3131_v11 = vpop.f32.mrf.mxu0 }
 0x2a9   : > { %v3484_v12 = vpop.f32.mrf.mxu1 }
 0x2aa   : > { %v5954_v13 = vpack.c.bf16 %v3481_v10, %v3479_v9  ;;  %v3133_v14 = vpop.f32.mrf.mxu0  ;;  %v3485_v16 = vadd.f32 %v3484_v12, %v3131_v11 }
 0x2ab   : > { %v3486_v15 = vpop.f32.mrf.mxu1 }
 0x2ac   : > { %5281 = vst [vmem:[%s7367_s12 + $0x138] sm:$0xff] %v5954_v13  ;;  %v3487_v17 = vadd.f32 %v3486_v15, %v3133_v14  ;;  %v3135_v18 = vpop.f32.mrf.mxu0 }
 0x2ad   : > { %v3488_v19 = vpop.f32.mrf.mxu1 }
 0x2ae   : > { %v5956_v20 = vpack.c.bf16 %v3487_v17, %v3485_v16  ;;  %v3137_v21 = vpop.f32.mrf.mxu0  ;;  %v3489_v23 = vadd.f32 %v3488_v19, %v3135_v18 }
 0x2af   : > { %v3490_v22 = vpop.f32.mrf.mxu1 }
 0x2b0   : > { %5283 = vst [vmem:[%s7367_s12 + $0x148] sm:$0xff] %v5956_v20  ;;  %v3491_v24 = vadd.f32 %v3490_v22, %v3137_v21  ;;  %v3141_v25 = vpop.f32.mrf.mxu0 }
 0x2b1   : > { %v3494_v26 = vpop.f32.mrf.mxu1 }
 0x2b2   : > { %v5958_v27 = vpack.c.bf16 %v3491_v24, %v3489_v23  ;;  %v3143_v28 = vpop.f32.mrf.mxu0  ;;  %v3495_v30 = vadd.f32 %v3494_v26, %v3141_v25 }
 0x2b3   : > { %v3496_v29 = vpop.f32.mrf.mxu1 }
 0x2b4   : > { %5285 = vst [vmem:[%s7367_s12 + $0x158] sm:$0xff] %v5958_v27  ;;  %v3497_v31 = vadd.f32 %v3496_v29, %v3143_v28  ;;  %v3145_v32 = vpop.f32.mrf.mxu0 }
 0x2b5   : > { %v3498_v33 = vpop.f32.mrf.mxu1 }
 0x2b6   : > { %v5960_v34 = vpack.c.bf16 %v3497_v31, %v3495_v30  ;;  %v3147_v35 = vpop.f32.mrf.mxu0  ;;  %v3499_v37 = vadd.f32 %v3498_v33, %v3145_v32 }
 0x2b7   : > { %v3500_v36 = vpop.f32.mrf.mxu1 }
 0x2b8   : > { %5287 = vst [vmem:[%s7367_s12 + $0x168] sm:$0xff] %v5960_v34  ;;  %v3501_v38 = vadd.f32 %v3500_v36, %v3147_v35  ;;  %v3151_v39 = vpop.f32.mrf.mxu0 }
 0x2b9   : > { %v3504_v40 = vpop.f32.mrf.mxu1 }
 0x2ba   : > { %v5962_v41 = vpack.c.bf16 %v3501_v38, %v3499_v37  ;;  %v3153_v42 = vpop.f32.mrf.mxu0  ;;  %v3505_v44 = vadd.f32 %v3504_v40, %v3151_v39 }
 0x2bb   : > { %v3506_v43 = vpop.f32.mrf.mxu1 }
 0x2bc   : > { %5289 = vst [vmem:[%s7367_s12 + $0x178] sm:$0xff] %v5962_v41  ;;  %v3507_v45 = vadd.f32 %v3506_v43, %v3153_v42  ;;  %v3155_v46 = vpop.f32.mrf.mxu0 }
 0x2bd   : > { %v3508_v47 = vpop.f32.mrf.mxu1 }
 0x2be   : > { %v5964_v48 = vpack.c.bf16 %v3507_v45, %v3505_v44  ;;  %v3157_v49 = vpop.f32.mrf.mxu0  ;;  %v3509_v51 = vadd.f32 %v3508_v47, %v3155_v46 }
 0x2bf   : > { %v3510_v50 = vpop.f32.mrf.mxu1 }
 0x2c0   : > { %5291 = vst [vmem:[%s7367_s12 + $0x188] sm:$0xff] %v5964_v48  ;;  %v3511_v52 = vadd.f32 %v3510_v50, %v3157_v49  ;;  %v3161_v53 = vpop.f32.mrf.mxu0 }
 0x2c1   : > { %v3514_v54 = vpop.f32.mrf.mxu1 }
 0x2c2   : > { %v5966_v55 = vpack.c.bf16 %v3511_v52, %v3509_v51  ;;  %v3163_v56 = vpop.f32.mrf.mxu0  ;;  %v3515_v58 = vadd.f32 %v3514_v54, %v3161_v53 }
 0x2c3   : > { %v3516_v57 = vpop.f32.mrf.mxu1 }
 0x2c4   : > { %5293 = vst [vmem:[%s7367_s12 + $0x198] sm:$0xff] %v5966_v55  ;;  %v3517_v59 = vadd.f32 %v3516_v57, %v3163_v56  ;;  %v3165_v60 = vpop.f32.mrf.mxu0 }
 0x2c5   : > { %v3518_v61 = vpop.f32.mrf.mxu1 }
 0x2c6   : > { %v5968_v62 = vpack.c.bf16 %v3517_v59, %v3515_v58  ;;  %v3167_v63 = vpop.f32.mrf.mxu0  ;;  %v3519_v1 = vadd.f32 %v3518_v61, %v3165_v60 }
 0x2c7   : > { %v3520_v0 = vpop.f32.mrf.mxu1 }
 0x2c8   : > { %5295 = vst [vmem:[%s7367_s12 + $0x1a8] sm:$0xff] %v5968_v62  ;;  %v3521_v2 = vadd.f32 %v3520_v0, %v3167_v63  ;;  %v3171_v3 = vpop.f32.mrf.mxu0 }
 0x2c9   : > { %v3524_v4 = vpop.f32.mrf.mxu1 }
 0x2ca   : > { %v5970_v5 = vpack.c.bf16 %v3521_v2, %v3519_v1  ;;  %v3173_v6 = vpop.f32.mrf.mxu0  ;;  %v3525_v8 = vadd.f32 %v3524_v4, %v3171_v3 }
 0x2cb   : > { %v3526_v7 = vpop.f32.mrf.mxu1 }
 0x2cc   : > { %5297 = vst [vmem:[%s7367_s12 + $0x1b8] sm:$0xff] %v5970_v5  ;;  %v3527_v9 = vadd.f32 %v3526_v7, %v3173_v6  ;;  %v3175_v10 = vpop.f32.mrf.mxu0 }
 0x2cd   : > { %v3528_v11 = vpop.f32.mrf.mxu1 }
 0x2ce   : > { %v5972_v12 = vpack.c.bf16 %v3527_v9, %v3525_v8  ;;  %v3177_v13 = vpop.f32.mrf.mxu0  ;;  %v3529_v15 = vadd.f32 %v3528_v11, %v3175_v10 }
 0x2cf   : > { %v3530_v14 = vpop.f32.mrf.mxu1 }
 0x2d0   : > { %5299 = vst [vmem:[%s7367_s12 + $0x1c8] sm:$0xff] %v5972_v12  ;;  %v3531_v16 = vadd.f32 %v3530_v14, %v3177_v13  ;;  %v3181_v17 = vpop.f32.mrf.mxu0 }
 0x2d1   : > { %v3534_v18 = vpop.f32.mrf.mxu1 }
 0x2d2   : > { %v5974_v19 = vpack.c.bf16 %v3531_v16, %v3529_v15  ;;  %v3183_v20 = vpop.f32.mrf.mxu0  ;;  %v3535_v22 = vadd.f32 %v3534_v18, %v3181_v17 }
 0x2d3   : > { %v3536_v21 = vpop.f32.mrf.mxu1 }
 0x2d4   : > { %5301 = vst [vmem:[%s7367_s12 + $0x1d8] sm:$0xff] %v5974_v19  ;;  %v3537_v23 = vadd.f32 %v3536_v21, %v3183_v20  ;;  %v3185_v24 = vpop.f32.mrf.mxu0 }
 0x2d5   : > { %v3538_v25 = vpop.f32.mrf.mxu1 }
 0x2d6   : > { %v5976_v26 = vpack.c.bf16 %v3537_v23, %v3535_v22  ;;  %v3187_v27 = vpop.f32.mrf.mxu0  ;;  %v3539_v29 = vadd.f32 %v3538_v25, %v3185_v24 }
 0x2d7   : > { %v3540_v28 = vpop.f32.mrf.mxu1 }
 0x2d8   : > { %5303 = vst [vmem:[%s7367_s12 + $0x1e8] sm:$0xff] %v5976_v26  ;;  %v3541_v30 = vadd.f32 %v3540_v28, %v3187_v27  ;;  %v3191_v31 = vpop.f32.mrf.mxu0 }
 0x2d9   : > { %v3544_v32 = vpop.f32.mrf.mxu1 }
 0x2da   : > { %v5978_v33 = vpack.c.bf16 %v3541_v30, %v3539_v29  ;;  %v3193_v34 = vpop.f32.mrf.mxu0  ;;  %v3545_v36 = vadd.f32 %v3544_v32, %v3191_v31 }
 0x2db   : > { %v3546_v35 = vpop.f32.mrf.mxu1 }
 0x2dc   : > { %5305 = vst [vmem:[%s7367_s12 + $0x1f8] sm:$0xff] %v5978_v33  ;;  %v3547_v37 = vadd.f32 %v3546_v35, %v3193_v34  ;;  %v3195_v38 = vpop.f32.mrf.mxu0 }
 0x2dd   : > { %v3548_v39 = vpop.f32.mrf.mxu1 }
 0x2de   : > { %v5980_v40 = vpack.c.bf16 %v3547_v37, %v3545_v36  ;;  %v3197_v41 = vpop.f32.mrf.mxu0  ;;  %v3549_v43 = vadd.f32 %v3548_v39, %v3195_v38 }
 0x2df   : > { %v3550_v42 = vpop.f32.mrf.mxu1 }
 0x2e0   : > { %5307 = vst [vmem:[%s7367_s12 + $0x208] sm:$0xff] %v5980_v40  ;;  %v3551_v44 = vadd.f32 %v3550_v42, %v3197_v41  ;;  %v3201_v45 = vpop.f32.mrf.mxu0 }
 0x2e1   : > { %v3554_v46 = vpop.f32.mrf.mxu1 }
 0x2e2   : > { %v5982_v47 = vpack.c.bf16 %v3551_v44, %v3549_v43  ;;  %v3203_v48 = vpop.f32.mrf.mxu0  ;;  %v3555_v50 = vadd.f32 %v3554_v46, %v3201_v45 }
 0x2e3   : > { %v3556_v49 = vpop.f32.mrf.mxu1 }
 0x2e4   : > { %5309 = vst [vmem:[%s7367_s12 + $0x218] sm:$0xff] %v5982_v47  ;;  %v3557_v51 = vadd.f32 %v3556_v49, %v3203_v48  ;;  %v3205_v52 = vpop.f32.mrf.mxu0 }
 0x2e5   : > { %v3558_v53 = vpop.f32.mrf.mxu1 }
 0x2e6   : > { %v5984_v54 = vpack.c.bf16 %v3557_v51, %v3555_v50  ;;  %v3207_v55 = vpop.f32.mrf.mxu0  ;;  %v3559_v57 = vadd.f32 %v3558_v53, %v3205_v52 }
 0x2e7   : > { %v3560_v56 = vpop.f32.mrf.mxu1 }
 0x2e8   : > { %5311 = vst [vmem:[%s7367_s12 + $0x228] sm:$0xff] %v5984_v54  ;;  %v3561_v58 = vadd.f32 %v3560_v56, %v3207_v55  ;;  %v3211_v59 = vpop.f32.mrf.mxu0 }
 0x2e9   : > { %v3564_v60 = vpop.f32.mrf.mxu1 }
 0x2ea   : > { %v5986_v61 = vpack.c.bf16 %v3561_v58, %v3559_v57  ;;  %v3213_v62 = vpop.f32.mrf.mxu0  ;;  %v3565_v0 = vadd.f32 %v3564_v60, %v3211_v59 }
 0x2eb   : > { %v3566_v63 = vpop.f32.mrf.mxu1 }
 0x2ec   : > { %5313 = vst [vmem:[%s7367_s12 + $0x238] sm:$0xff] %v5986_v61  ;;  %v3567_v1 = vadd.f32 %v3566_v63, %v3213_v62  ;;  %v3215_v2 = vpop.f32.mrf.mxu0 }
 0x2ed   : > { %v3568_v3 = vpop.f32.mrf.mxu1 }
 0x2ee   : > { %v5988_v4 = vpack.c.bf16 %v3567_v1, %v3565_v0  ;;  %v3217_v5 = vpop.f32.mrf.mxu0  ;;  %v3569_v7 = vadd.f32 %v3568_v3, %v3215_v2 }
 0x2ef   : > { %v3570_v6 = vpop.f32.mrf.mxu1 }
 0x2f0   : > { %5315 = vst [vmem:[%s7367_s12 + $0x248] sm:$0xff] %v5988_v4  ;;  %v3571_v8 = vadd.f32 %v3570_v6, %v3217_v5  ;;  %v3221_v9 = vpop.f32.mrf.mxu0 }
 0x2f1   : > { %v3574_v10 = vpop.f32.mrf.mxu1 }
 0x2f2   : > { %v5990_v11 = vpack.c.bf16 %v3571_v8, %v3569_v7  ;;  %v3223_v12 = vpop.f32.mrf.mxu0  ;;  %v3575_v14 = vadd.f32 %v3574_v10, %v3221_v9 }
 0x2f3   : > { %v3576_v13 = vpop.f32.mrf.mxu1 }
 0x2f4   : > { %5317 = vst [vmem:[%s7367_s12 + $0x258] sm:$0xff] %v5990_v11  ;;  %v3577_v15 = vadd.f32 %v3576_v13, %v3223_v12  ;;  %v3225_v16 = vpop.f32.mrf.mxu0 }
 0x2f5   : > { %v3578_v17 = vpop.f32.mrf.mxu1 }
 0x2f6   : > { %v5992_v18 = vpack.c.bf16 %v3577_v15, %v3575_v14  ;;  %v3227_v19 = vpop.f32.mrf.mxu0  ;;  %v3579_v21 = vadd.f32 %v3578_v17, %v3225_v16 }
 0x2f7   : > { %v3580_v20 = vpop.f32.mrf.mxu1 }
 0x2f8   : > { %5319 = vst [vmem:[%s7367_s12 + $0x268] sm:$0xff] %v5992_v18  ;;  %v3581_v22 = vadd.f32 %v3580_v20, %v3227_v19  ;;  %v3231_v23 = vpop.f32.mrf.mxu0 }
 0x2f9   : > { %v3584_v24 = vpop.f32.mrf.mxu1 }
 0x2fa   : > { %v5994_v25 = vpack.c.bf16 %v3581_v22, %v3579_v21  ;;  %v3233_v26 = vpop.f32.mrf.mxu0  ;;  %v3585_v28 = vadd.f32 %v3584_v24, %v3231_v23 }
 0x2fb   : > { %v3586_v27 = vpop.f32.mrf.mxu1 }
 0x2fc   : > { %5321 = vst [vmem:[%s7367_s12 + $0x278] sm:$0xff] %v5994_v25  ;;  %v3587_v29 = vadd.f32 %v3586_v27, %v3233_v26  ;;  %v3235_v30 = vpop.f32.mrf.mxu0 }
 0x2fd   : > { %v3588_v31 = vpop.f32.mrf.mxu1 }
 0x2fe   : > { %v5996_v32 = vpack.c.bf16 %v3587_v29, %v3585_v28  ;;  %v3237_v33 = vpop.f32.mrf.mxu0  ;;  %v3589_v35 = vadd.f32 %v3588_v31, %v3235_v30 }
 0x2ff   : > { %v3590_v34 = vpop.f32.mrf.mxu1 }
 0x300   : > { %5323 = vst [vmem:[%s7367_s12 + $0x288] sm:$0xff] %v5996_v32  ;;  %v3591_v36 = vadd.f32 %v3590_v34, %v3237_v33  ;;  %v3241_v37 = vpop.f32.mrf.mxu0 }
 0x301   : > { %v3594_v38 = vpop.f32.mrf.mxu1 }
 0x302   : > { %v5998_v39 = vpack.c.bf16 %v3591_v36, %v3589_v35  ;;  %v3243_v40 = vpop.f32.mrf.mxu0  ;;  %v3595_v42 = vadd.f32 %v3594_v38, %v3241_v37 }
 0x303   : > { %v3596_v41 = vpop.f32.mrf.mxu1 }
 0x304   : > { %5325 = vst [vmem:[%s7367_s12 + $0x298] sm:$0xff] %v5998_v39  ;;  %v3597_v43 = vadd.f32 %v3596_v41, %v3243_v40  ;;  %v3245_v44 = vpop.f32.mrf.mxu0 }
 0x305   : > { %v3598_v45 = vpop.f32.mrf.mxu1 }
 0x306   : > { %v6000_v46 = vpack.c.bf16 %v3597_v43, %v3595_v42  ;;  %v3247_v47 = vpop.f32.mrf.mxu0  ;;  %v3599_v49 = vadd.f32 %v3598_v45, %v3245_v44 }
 0x307   : > { %v3600_v48 = vpop.f32.mrf.mxu1 }
 0x308   : > { %5327 = vst [vmem:[%s7367_s12 + $0x2a8] sm:$0xff] %v6000_v46  ;;  %v3601_v50 = vadd.f32 %v3600_v48, %v3247_v47  ;;  %v3251_v51 = vpop.f32.mrf.mxu0 }
 0x309   : > { %v3604_v52 = vpop.f32.mrf.mxu1 }
 0x30a   : > { %v6002_v53 = vpack.c.bf16 %v3601_v50, %v3599_v49  ;;  %v3253_v54 = vpop.f32.mrf.mxu0  ;;  %v3605_v56 = vadd.f32 %v3604_v52, %v3251_v51 }
 0x30b   : > { %v3606_v55 = vpop.f32.mrf.mxu1 }
 0x30c   : > { %5329 = vst [vmem:[%s7367_s12 + $0x2b8] sm:$0xff] %v6002_v53  ;;  %v3607_v57 = vadd.f32 %v3606_v55, %v3253_v54  ;;  %v3255_v58 = vpop.f32.mrf.mxu0 }
 0x30d   : > { %v3608_v59 = vpop.f32.mrf.mxu1 }
 0x30e   : > { %v6004_v60 = vpack.c.bf16 %v3607_v57, %v3605_v56  ;;  %v3257_v61 = vpop.f32.mrf.mxu0  ;;  %v3609_v63 = vadd.f32 %v3608_v59, %v3255_v58 }
 0x30f   : > { %v3610_v62 = vpop.f32.mrf.mxu1 }
 0x310   : > { %5331 = vst [vmem:[%s7367_s12 + $0x2c8] sm:$0xff] %v6004_v60  ;;  %v3611_v0 = vadd.f32 %v3610_v62, %v3257_v61  ;;  %v3261_v1 = vpop.f32.mrf.mxu0 }
 0x311   : > { %v3614_v2 = vpop.f32.mrf.mxu1 }
 0x312   : > { %v6006_v3 = vpack.c.bf16 %v3611_v0, %v3609_v63  ;;  %v3263_v4 = vpop.f32.mrf.mxu0  ;;  %v3615_v6 = vadd.f32 %v3614_v2, %v3261_v1 }
 0x313   : > { %v3616_v5 = vpop.f32.mrf.mxu1 }
 0x314   : > { %5333 = vst [vmem:[%s7367_s12 + $0x2d8] sm:$0xff] %v6006_v3  ;;  %v3617_v7 = vadd.f32 %v3616_v5, %v3263_v4  ;;  %v3265_v8 = vpop.f32.mrf.mxu0 }
 0x315   : > { %v3618_v9 = vpop.f32.mrf.mxu1 }
 0x316   : > { %v6008_v10 = vpack.c.bf16 %v3617_v7, %v3615_v6  ;;  %v3267_v11 = vpop.f32.mrf.mxu0  ;;  %v3619_v13 = vadd.f32 %v3618_v9, %v3265_v8 }
 0x317   : > { %v3620_v12 = vpop.f32.mrf.mxu1 }
 0x318   : > { %5335 = vst [vmem:[%s7367_s12 + $0x2e8] sm:$0xff] %v6008_v10  ;;  %v3621_v14 = vadd.f32 %v3620_v12, %v3267_v11  ;;  %v3271_v15 = vpop.f32.mrf.mxu0 }
 0x319   : > { %v3624_v16 = vpop.f32.mrf.mxu1 }
 0x31a   : > { %v6010_v17 = vpack.c.bf16 %v3621_v14, %v3619_v13  ;;  %v3273_v18 = vpop.f32.mrf.mxu0  ;;  %v3625_v20 = vadd.f32 %v3624_v16, %v3271_v15 }
 0x31b   : > { %v3626_v19 = vpop.f32.mrf.mxu1 }
 0x31c   : > { %5337 = vst [vmem:[%s7367_s12 + $0x2f8] sm:$0xff] %v6010_v17  ;;  %v3627_v21 = vadd.f32 %v3626_v19, %v3273_v18  ;;  %v3275_v22 = vpop.f32.mrf.mxu0 }
 0x31d   : > { %v3628_v23 = vpop.f32.mrf.mxu1 }
 0x31e   : > { %v6012_v24 = vpack.c.bf16 %v3627_v21, %v3625_v20  ;;  %v3277_v25 = vpop.f32.mrf.mxu0  ;;  %v3629_v27 = vadd.f32 %v3628_v23, %v3275_v22 }
 0x31f   : > { %v3630_v26 = vpop.f32.mrf.mxu1 }
 0x320   : > { %5339 = vst [vmem:[%s7367_s12 + $0x308] sm:$0xff] %v6012_v24  ;;  %v3631_v28 = vadd.f32 %v3630_v26, %v3277_v25  ;;  %v3281_v29 = vpop.f32.mrf.mxu0 }
 0x321   : > { %v3634_v30 = vpop.f32.mrf.mxu1 }
 0x322   : > { %v6014_v31 = vpack.c.bf16 %v3631_v28, %v3629_v27  ;;  %v3283_v32 = vpop.f32.mrf.mxu0  ;;  %v3635_v34 = vadd.f32 %v3634_v30, %v3281_v29 }
 0x323   : > { %v3636_v33 = vpop.f32.mrf.mxu1 }
 0x324   : > { %5341 = vst [vmem:[%s7367_s12 + $0x318] sm:$0xff] %v6014_v31  ;;  %v3637_v35 = vadd.f32 %v3636_v33, %v3283_v32  ;;  %v3285_v36 = vpop.f32.mrf.mxu0 }
 0x325   : > { %v3638_v37 = vpop.f32.mrf.mxu1 }
 0x326   : > { %v6016_v38 = vpack.c.bf16 %v3637_v35, %v3635_v34  ;;  %v3287_v39 = vpop.f32.mrf.mxu0  ;;  %v3639_v41 = vadd.f32 %v3638_v37, %v3285_v36 }
 0x327   : > { %v3640_v40 = vpop.f32.mrf.mxu1 }
 0x328   : > { %5343 = vst [vmem:[%s7367_s12 + $0x328] sm:$0xff] %v6016_v38  ;;  %v3641_v42 = vadd.f32 %v3640_v40, %v3287_v39  ;;  %v3291_v43 = vpop.f32.mrf.mxu0 }
 0x329   : > { %v3644_v44 = vpop.f32.mrf.mxu1 }
 0x32a   : > { %v6018_v45 = vpack.c.bf16 %v3641_v42, %v3639_v41  ;;  %v3293_v46 = vpop.f32.mrf.mxu0  ;;  %v3645_v48 = vadd.f32 %v3644_v44, %v3291_v43 }
 0x32b   : > { %v3646_v47 = vpop.f32.mrf.mxu1 }
 0x32c   : > { %5345 = vst [vmem:[%s7367_s12 + $0x338] sm:$0xff] %v6018_v45  ;;  %v3647_v49 = vadd.f32 %v3646_v47, %v3293_v46  ;;  %v3295_v50 = vpop.f32.mrf.mxu0 }
 0x32d   : > { %v3648_v51 = vpop.f32.mrf.mxu1 }
 0x32e   : > { %v6020_v52 = vpack.c.bf16 %v3647_v49, %v3645_v48  ;;  %v3297_v53 = vpop.f32.mrf.mxu0  ;;  %v3649_v55 = vadd.f32 %v3648_v51, %v3295_v50 }
 0x32f   : > { %v3650_v54 = vpop.f32.mrf.mxu1 }
 0x330   : > { %5347 = vst [vmem:[%s7367_s12 + $0x348] sm:$0xff] %v6020_v52  ;;  %v3651_v56 = vadd.f32 %v3650_v54, %v3297_v53  ;;  %v3301_v57 = vpop.f32.mrf.mxu0 }
 0x331   : > { %v3654_v58 = vpop.f32.mrf.mxu1 }
 0x332   : > { %v6022_v59 = vpack.c.bf16 %v3651_v56, %v3649_v55  ;;  %v3303_v60 = vpop.f32.mrf.mxu0  ;;  %v3655_v62 = vadd.f32 %v3654_v58, %v3301_v57 }
 0x333   : > { %v3656_v61 = vpop.f32.mrf.mxu1 }
 0x334   : > { %5349 = vst [vmem:[%s7367_s12 + $0x358] sm:$0xff] %v6022_v59  ;;  %v3657_v63 = vadd.f32 %v3656_v61, %v3303_v60  ;;  %v3305_v0 = vpop.f32.mrf.mxu0 }
 0x335   : > { %v3658_v1 = vpop.f32.mrf.mxu1 }
 0x336   : > { %v6024_v2 = vpack.c.bf16 %v3657_v63, %v3655_v62  ;;  %v3307_v3 = vpop.f32.mrf.mxu0  ;;  %v3659_v5 = vadd.f32 %v3658_v1, %v3305_v0 }
 0x337   : > { %v3660_v4 = vpop.f32.mrf.mxu1 }
 0x338   : > { %5351 = vst [vmem:[%s7367_s12 + $0x368] sm:$0xff] %v6024_v2  ;;  %v3661_v6 = vadd.f32 %v3660_v4, %v3307_v3  ;;  %v3311_v7 = vpop.f32.mrf.mxu0 }
 0x339   : > { %v3664_v8 = vpop.f32.mrf.mxu1 }
 0x33a   : > { %v6026_v9 = vpack.c.bf16 %v3661_v6, %v3659_v5  ;;  %v3313_v10 = vpop.f32.mrf.mxu0  ;;  %v3665_v12 = vadd.f32 %v3664_v8, %v3311_v7 }
 0x33b   : > { %v3666_v11 = vpop.f32.mrf.mxu1 }
 0x33c   : > { %5353 = vst [vmem:[%s7367_s12 + $0x378] sm:$0xff] %v6026_v9  ;;  %v3667_v13 = vadd.f32 %v3666_v11, %v3313_v10  ;;  %v3315_v14 = vpop.f32.mrf.mxu0 }
 0x33d   : > { %v3668_v15 = vpop.f32.mrf.mxu1 }
 0x33e   : > { %v6028_v16 = vpack.c.bf16 %v3667_v13, %v3665_v12  ;;  %v3317_v17 = vpop.f32.mrf.mxu0  ;;  %v3669_v19 = vadd.f32 %v3668_v15, %v3315_v14 }
 0x33f   : > { %v3670_v18 = vpop.f32.mrf.mxu1 }
 0x340   : > { %5355 = vst [vmem:[%s7367_s12 + $0x388] sm:$0xff] %v6028_v16  ;;  %v3671_v20 = vadd.f32 %v3670_v18, %v3317_v17  ;;  %v3321_v21 = vpop.f32.mrf.mxu0 }
 0x341   : > { %v3674_v22 = vpop.f32.mrf.mxu1 }
 0x342   : > { %v6030_v23 = vpack.c.bf16 %v3671_v20, %v3669_v19  ;;  %v3323_v24 = vpop.f32.mrf.mxu0  ;;  %v3675_v26 = vadd.f32 %v3674_v22, %v3321_v21 }
 0x343   : > { %v3676_v25 = vpop.f32.mrf.mxu1 }
 0x344   : > { %5357 = vst [vmem:[%s7367_s12 + $0x398] sm:$0xff] %v6030_v23  ;;  %v3677_v27 = vadd.f32 %v3676_v25, %v3323_v24  ;;  %v3325_v28 = vpop.f32.mrf.mxu0 }
 0x345   : > { %v3678_v29 = vpop.f32.mrf.mxu1 }
 0x346   : > { %v6032_v30 = vpack.c.bf16 %v3677_v27, %v3675_v26  ;;  %v3327_v31 = vpop.f32.mrf.mxu0  ;;  %v3679_v33 = vadd.f32 %v3678_v29, %v3325_v28 }
 0x347   : > { %v3680_v32 = vpop.f32.mrf.mxu1 }
 0x348   : > { %5359 = vst [vmem:[%s7367_s12 + $0x3a8] sm:$0xff] %v6032_v30  ;;  %v3681_v34 = vadd.f32 %v3680_v32, %v3327_v31  ;;  %v3331_v35 = vpop.f32.mrf.mxu0 }
 0x349   : > { %v3684_v36 = vpop.f32.mrf.mxu1 }
 0x34a   : > { %v6034_v37 = vpack.c.bf16 %v3681_v34, %v3679_v33  ;;  %v3333_v38 = vpop.f32.mrf.mxu0  ;;  %v3685_v40 = vadd.f32 %v3684_v36, %v3331_v35 }
 0x34b   : > { %v3686_v39 = vpop.f32.mrf.mxu1 }
 0x34c   : > { %5361 = vst [vmem:[%s7367_s12 + $0x3b8] sm:$0xff] %v6034_v37  ;;  %v3687_v41 = vadd.f32 %v3686_v39, %v3333_v38  ;;  %v3335_v42 = vpop.f32.mrf.mxu0 }
 0x34d   : > { %v3688_v43 = vpop.f32.mrf.mxu1 }
 0x34e   : > { %v6036_v44 = vpack.c.bf16 %v3687_v41, %v3685_v40  ;;  %v3337_v45 = vpop.f32.mrf.mxu0  ;;  %v3689_v47 = vadd.f32 %v3688_v43, %v3335_v42 }
 0x34f   : > { %v3690_v46 = vpop.f32.mrf.mxu1 }
 0x350   : > { %5363 = vst [vmem:[%s7367_s12 + $0x3c8] sm:$0xff] %v6036_v44  ;;  %v3691_v48 = vadd.f32 %v3690_v46, %v3337_v45  ;;  %v3341_v49 = vpop.f32.mrf.mxu0 }
 0x351   : > { %v3694_v50 = vpop.f32.mrf.mxu1 }
 0x352   : > { %v6038_v51 = vpack.c.bf16 %v3691_v48, %v3689_v47  ;;  %v3343_v52 = vpop.f32.mrf.mxu0  ;;  %v3695_v54 = vadd.f32 %v3694_v50, %v3341_v49 }
 0x353   : > { %v3696_v53 = vpop.f32.mrf.mxu1 }
 0x354   : > { %5365 = vst [vmem:[%s7367_s12 + $0x3d8] sm:$0xff] %v6038_v51  ;;  %v3697_v55 = vadd.f32 %v3696_v53, %v3343_v52  ;;  %v3345_v56 = vpop.f32.mrf.mxu0 }
 0x355   : > { %v3698_v57 = vpop.f32.mrf.mxu1 }
 0x356   : > { %v6040_v58 = vpack.c.bf16 %v3697_v55, %v3695_v54  ;;  %v3347_v59 = vpop.f32.mrf.mxu0  ;;  %v3699_v61 = vadd.f32 %v3698_v57, %v3345_v56 }
 0x357   : > { %v3700_v60 = vpop.f32.mrf.mxu1 }
 0x358   : > { %5367 = vst [vmem:[%s7367_s12 + $0x3e8] sm:$0xff] %v6040_v58  ;;  %v3701_v62 = vadd.f32 %v3700_v60, %v3347_v59 }
 0x35a   : > { %v6042_v63 = vpack.c.bf16 %v3701_v62, %v3699_v61 }
 0x35c   : > { %5369 = vst [vmem:[%s7367_s12 + $0x3f8] sm:$0xff] %v6042_v63 }
 0x35d   : > { %6762 = shalt.err (!%p6759_p4)
}
 0x35e   : > { %s6763_s28 = scalar_lea.hbm %s7652_s21, 16384  ;;  %s6767_s29 = scalar_lea.hbm %s7771_s4, 65536 }
 0x35f   : > { %p6764_p5 = scmp.ne.s32.totalorder %s7652_s21, %s6763_s28  ;;  %p6768_p3 = scmp.lt.s32.totalorder %s7652_s21, %s7771_s4 }
 0x360   : > { %p6769_p13 = scmp.lt.s32.totalorder %s6767_s29, %s6763_s28 }
 0x361   : > { %p6765_p10 = pnand %p6764_p5, %p7772_p7 }
 0x362   : > { %p6770_p0 = por %p6769_p13, %p6768_p3 }
 0x363   : > { %p6766_p12 = pneg %p6765_p10 }
 0x365   : > { %p6771_p6 = pnand %p6770_p0, %p6766_p12 }
 0x367   : > { %6774 = shalt.err (!%p6771_p6)
}
 0x368   : > { %s6905_s8 = smov 256   ;;  %s6906_s30 = smov 512  }
 0x369   : > { %s6907_s26 = smov 16  }
 0x36a   : > { %6048 = dma.vmem_to_hbm [thread:$0]  (%p7772_p7), %s7654_s23, 16384, %s7652_s21, %s7659_s3, %s6905_s8, %s6906_s30, %s6907_s26  }
 0x36b PF: > { %p6062_p11 = scmp.ge.s32.totalorder %s6897_s22, 2  ;;  %s5402_s5 = sand.u32 1, %s6845_s9  }
 0x36c   : > { %p7773_p8 = scmp.ne.s32.totalorder %s7765_s27, 0  ;;  %s5403_s15 = scalar_lea.sflag [#allocation5], %s5402_s5 }
 0x36e   : > { %p6058_p9 = pnand %p6062_p11, %p7773_p8 }
 0x370   : > { %p6059_p1 = pneg %p6058_p9 }
 0x372   : > { %6840 = dma.done.wait (%p6059_p1), %s5403_s15, 16384  }
 0x373   : > { %6842 = vsyncadd (%p6059_p1), %s5403_s15, 4294950912  ;;  %s21_s22 = sadd.s32 1, %s6897_s22   ;;  %s7775_s18 = sld [smem:[#allocation16_spill]] }
 0x374   : > { %p7687_p2 = scmp.ge.s32.totalorder %s21_s22, 6   ;;  %s7776_s19 = sld [smem:[#allocation13_spill]] }
 0x375   : > { %s7777_s27 = sld [smem:[#allocation14_spill]]  ;;  %s7779_s9 = smov %s6849_s10 }
 0x376   : > { %s7778_s21 = sld [smem:[#allocation15_spill]]  ;;  %s7780_s10 = smov %s6853_s11 }
 0x377   : > { %s7781_s11 = smov %s7089_s0  ;;  %s7782_s12 = smov %s6861_s13 }
 0x378   : > { %s7783_s13 = smov %s6865_s14  ;;  %s7785_s15 = smov %s6873_s16 }
 0x379   : > { %s7784_s14 = smov %s7775_s18  ;;  %s7786_s16 = smov %s6877_s17 }
 0x37a   : > { %s7787_s17 = smov %s7086_s2  ;;  %s7788_s18 = smov %s6889_s20 }
 0x37b   : > { %s7789_s20 = smov %s7777_s27  ;;  %20 = sbr.rel (!%p7687_p2) target bundleno = 15 (0xf), region = 94 }
 0x380   :  { %5408 = vsyncpa [#allocation4], 1 }
 0x381   :  { %5410 = vsyncpa [#allocation4 + $0x1], 1 }
 0x382   :  { %5411 = vsyncpa [#allocation7], 1 }
 0x383   :  { %5413 = vsyncpa [#allocation7 + $0x1], 1 }
 0x384   :  { %5414 = vsyncpa [#allocation5], 1 }
 0x385   :  { %5416 = vsyncpa [#allocation5 + $0x1], 1 }

</bundles_post_ra>
